<compile_context>
chip_gen: v5e
topology: v5e:2x2
jax: 0.10.0
libtpu: 0.0.40
codegen_flags: <defaults>
</compile_context>

<pallas_src>
import functools

import jax
import jax.numpy as jnp
import numpy as np
from jax.experimental import pallas as pl
from jax.experimental.pallas import tpu as pltpu


# ----------------------------- Fused model kernel ----------------------------
def _fused_lstm_fc_kernel(*refs, T, B, H, num_layers):
    """Whole-model forward in one kernel invocation.

    refs layout (all VMEM):
      refs[0]                      : x        (T*B, F)   time-major, batch-padded
      refs[1 : 1+3L]               : per layer (w_ih_t (in,4H), w_hh_t (H,4H), bias (1,4H))
      refs[1+3L], refs[2+3L]       : w_fc_t (H, O), b_fc (1, O)
      refs[3+3L]                   : out      (B, O)
      refs[4+3L]                   : seq_scr  (T*B, H)   inter-layer sequence scratch
    """
    n_in = 1 + 3 * num_layers + 2
    x_ref = refs[0]
    layer_refs = refs[1:1 + 3 * num_layers]
    wfc_ref = refs[1 + 3 * num_layers]
    bfc_ref = refs[2 + 3 * num_layers]
    out_ref = refs[n_in]
    seq_scr = refs[n_in + 1]

    seq_in = x_ref[...]                                  # (T*B, F) layer-0 input

    h = jnp.zeros((B, H), jnp.float32)
    for layer in range(num_layers):
        wih = layer_refs[3 * layer][...]                 # (in, 4H)
        whh = layer_refs[3 * layer + 1][...]             # (H, 4H)
        bias = layer_refs[3 * layer + 2][...]            # (1, 4H)

        # Hoisted input projection for ALL timesteps of this layer.
        xg = jnp.dot(seq_in, wih, preferred_element_type=jnp.float32) + bias  # (T*B, 4H)

        h = jnp.zeros((B, H), jnp.float32)
        c = jnp.zeros((B, H), jnp.float32)
        last = layer == num_layers - 1

        # Serial recurrence: only h @ W_hh remains on the critical path.
        for t in range(T):
            gates = xg[t * B:(t + 1) * B, :] + jnp.dot(
                h, whh, preferred_element_type=jnp.float32)          # (B, 4H)
            # Full-vreg activations (4H = 128 lanes), then static lane slices.
            sg = jax.nn.sigmoid(gates)
            tg = jnp.tanh(gates)
            i_g = sg[:, 0 * H:1 * H]
            f_g = sg[:, 1 * H:2 * H]
            g_g = tg[:, 2 * H:3 * H]
            o_g = sg[:, 3 * H:4 * H]

            c = f_g * c + i_g * g_g
            h = o_g * jnp.tanh(c)

            if not last:
                seq_scr[t * B:(t + 1) * B, :] = h        # sequence for next layer

        if not last:
            seq_in = seq_scr[...]                        # (T*B, H)

    # Fused final Linear on the last timestep's hidden state.
    out_ref[...] = (
        jnp.dot(h, wfc_ref[...], preferred_element_type=jnp.float32) + bfc_ref[...]
    )


# ----------------------------- Full model forward ----------------------------
@jax.jit
def lstm_classifier_forward(x, params):
    """x: (B, T, F) float32 (batch_first, matches PyTorch).  Returns (B, output_dim)."""
    x = x.astype(jnp.float32)
    B, T, F = x.shape
    H = params["lstm_layers"][0][1].shape[0]
    O = params["w_fc_t"].shape[1]
    num_layers = len(params["lstm_layers"])

    # Pad batch to the sublane count (8) and flatten to time-major (T*B_pad, F).
    B_pad = ((B + 7) // 8) * 8
    x_tm = jnp.transpose(x, (1, 0, 2))                   # (T, B, F)
    x_tm = jnp.pad(x_tm, ((0, 0), (0, B_pad - B), (0, 0)))
    x_flat = x_tm.reshape(T * B_pad, F)

    args = [x_flat]
    for (w_ih_t, w_hh_t, bias) in params["lstm_layers"]:
        args.extend([w_ih_t, w_hh_t, bias])
    args.extend([params["w_fc_t"], params["b_fc"]])

    kernel = functools.partial(
        _fused_lstm_fc_kernel, T=T, B=B_pad, H=H, num_layers=num_layers)

    out_pad = pl.pallas_call(
        kernel,
        out_shape=jax.ShapeDtypeStruct((B_pad, O), jnp.float32),
        in_specs=[pl.BlockSpec(memory_space=pltpu.MemorySpace.VMEM)] * len(args),
        out_specs=pl.BlockSpec(memory_space=pltpu.MemorySpace.VMEM),
        scratch_shapes=[pltpu.VMEM((T * B_pad, H), jnp.float32)],
    )(*args)

    return out_pad[:B]


# ----------------------------- Reference (pure JAX) ---------------------------
def _reference_forward(x, params):
    x = x.astype(jnp.float32)
    B = x.shape[0]
    h_seq = jnp.transpose(x, (1, 0, 2))  # (T, B, F)
    for (w_ih_t, w_hh_t, bias) in params["lstm_layers"]:
        H = w_hh_t.shape[0]

        def step(carry, x_t):
            h_prev, c_prev = carry
            gates = x_t @ w_ih_t + h_prev @ w_hh_t + bias
            i_g = jax.nn.sigmoid(gates[:, 0 * H:1 * H])
            f_g = jax.nn.sigmoid(gates[:, 1 * H:2 * H])
            g_g = jnp.tanh(gates[:, 2 * H:3 * H])
            o_g = jax.nn.sigmoid(gates[:, 3 * H:4 * H])
            c_new = f_g * c_prev + i_g * g_g
            h_new = o_g * jnp.tanh(c_new)
            return (h_new, c_new), h_new

        init = (jnp.zeros((B, H), jnp.float32), jnp.zeros((B, H), jnp.float32))
        _, h_seq = jax.lax.scan(step, init, h_seq)
    return h_seq[-1] @ params["w_fc_t"] + params["b_fc"]


# ----------------------------- Parameter init ---------------------------------
def init_params(key, feature_size, hidden_size, num_layers, output_dim):
    """PyTorch-style uniform(-1/sqrt(H), 1/sqrt(H)) init, deterministic."""
    bound = 1.0 / np.sqrt(hidden_size)
    layers = []
    for layer in range(num_layers):
        in_size = feature_size if layer == 0 else hidden_size
        key, k1, k2, k3, k4 = jax.random.split(key, 5)
        # PyTorch stores weight_ih as (4H, in); we keep the transposed (in, 4H).
        w_ih_t = jax.random.uniform(k1, (in_size, 4 * hidden_size),
                                    jnp.float32, -bound, bound)
        w_hh_t = jax.random.uniform(k2, (hidden_size, 4 * hidden_size),
                                    jnp.float32, -bound, bound)
        b_ih = jax.random.uniform(k3, (4 * hidden_size,), jnp.float32, -bound, bound)
        b_hh = jax.random.uniform(k4, (4 * hidden_size,), jnp.float32, -bound, bound)
        layers.append((w_ih_t, w_hh_t, (b_ih + b_hh).reshape(1, -1)))

    key, k5, k6 = jax.random.split(key, 3)
    fc_bound = 1.0 / np.sqrt(hidden_size)
    w_fc_t = jax.random.uniform(k5, (hidden_size, output_dim),
                                jnp.float32, -fc_bound, fc_bound)
    b_fc = jax.random.uniform(k6, (1, output_dim), jnp.float32, -fc_bound, fc_bound)
    return {"lstm_layers": layers, "w_fc_t": w_fc_t, "b_fc": b_fc}


# ----------------------------- Main -------------------------------------------
if __name__ == "__main__":
    BATCH, SEQ, FEATURE = 2, 8, 16
    HIDDEN, LAYERS, OUT_DIM = 32, 4, 2

    key = jax.random.PRNGKey(0)
    key, kx = jax.random.split(key)
    x = jax.random.normal(kx, (BATCH, SEQ, FEATURE), jnp.float32)  # (B, T, F), batch_first
    # `t` argument of the PyTorch forward is unused in the computation.

    params = init_params(key, FEATURE, HIDDEN, LAYERS, OUT_DIM)

    out = lstm_classifier_forward(x, params)
    out = jax.block_until_ready(out)

    ref = jax.block_until_ready(_reference_forward(x, params))
    np.testing.assert_allclose(np.asarray(out), np.asarray(ref), rtol=1e-4, atol=1e-4)
    assert out.shape == (BATCH, OUT_DIM)

    print("KERNEL_OK")
</pallas_src>

<mosaic_0001>
module attributes {stable_mosaic.version = 11 : i64} {
  func.func @_fused_lstm_fc_kernel(%arg0: memref<64x16xf32, #tpu.memory_space<vmem>>, %arg1: memref<16x128xf32, #tpu.memory_space<vmem>>, %arg2: memref<32x128xf32, #tpu.memory_space<vmem>>, %arg3: memref<1x128xf32, #tpu.memory_space<vmem>>, %arg4: memref<32x128xf32, #tpu.memory_space<vmem>>, %arg5: memref<32x128xf32, #tpu.memory_space<vmem>>, %arg6: memref<1x128xf32, #tpu.memory_space<vmem>>, %arg7: memref<32x128xf32, #tpu.memory_space<vmem>>, %arg8: memref<32x128xf32, #tpu.memory_space<vmem>>, %arg9: memref<1x128xf32, #tpu.memory_space<vmem>>, %arg10: memref<32x128xf32, #tpu.memory_space<vmem>>, %arg11: memref<32x128xf32, #tpu.memory_space<vmem>>, %arg12: memref<1x128xf32, #tpu.memory_space<vmem>>, %arg13: memref<32x2xf32, #tpu.memory_space<vmem>>, %arg14: memref<1x2xf32, #tpu.memory_space<vmem>>, %arg15: memref<8x2xf32, #tpu.memory_space<vmem>>, %arg16: memref<64x32xf32, #tpu.memory_space<vmem>>) attributes {dimension_semantics = [], scalar_prefetch = 0 : i64, scratch_operands = 1 : i64, tpu.core_type = #tpu.core_type<tc>} {
    %c0 = arith.constant 0 : index
    %c0_0 = arith.constant 0 : index
    %0 = vector.load %arg0[%c0, %c0_0] : memref<64x16xf32, #tpu.memory_space<vmem>>, vector<64x16xf32>
    %c0_1 = arith.constant 0 : index
    %c0_2 = arith.constant 0 : index
    %1 = vector.load %arg1[%c0_1, %c0_2] : memref<16x128xf32, #tpu.memory_space<vmem>>, vector<16x128xf32>
    %c0_3 = arith.constant 0 : index
    %c0_4 = arith.constant 0 : index
    %2 = vector.load %arg2[%c0_3, %c0_4] : memref<32x128xf32, #tpu.memory_space<vmem>>, vector<32x128xf32>
    %c0_5 = arith.constant 0 : index
    %c0_6 = arith.constant 0 : index
    %3 = vector.load %arg3[%c0_5, %c0_6] : memref<1x128xf32, #tpu.memory_space<vmem>>, vector<1x128xf32>
    %cst = arith.constant dense<0.000000e+00> : vector<64x128xf32>
    %4 = tpu.matmul %0, %1, %cst {dimension_numbers = #tpu.dot_dimension_numbers<[1], [0], [0], [1], [0, 0, 1, 1], [], []>} : vector<64x16xf32>, vector<16x128xf32>, vector<64x128xf32> -> vector<64x128xf32>
    %5 = vector.broadcast %3 : vector<1x128xf32> to vector<64x128xf32>
    %6 = arith.addf %4, %5 : vector<64x128xf32>
    %cst_7 = arith.constant 0.000000e+00 : f32
    %7 = vector.broadcast %cst_7 : f32 to vector<8x32xf32>
    %cst_8 = arith.constant 0.000000e+00 : f32
    %8 = vector.broadcast %cst_8 : f32 to vector<8x32xf32>
    %9 = vector.extract_strided_slice %6 {offsets = [0, 0], sizes = [8, 128], strides = [1, 1]} : vector<64x128xf32> to vector<8x128xf32>
    %cst_9 = arith.constant dense<0.000000e+00> : vector<8x128xf32>
    %10 = tpu.matmul %7, %2, %cst_9 {dimension_numbers = #tpu.dot_dimension_numbers<[1], [0], [0], [1], [0, 0, 1, 1], [], []>} : vector<8x32xf32>, vector<32x128xf32>, vector<8x128xf32> -> vector<8x128xf32>
    %11 = arith.addf %9, %10 : vector<8x128xf32>
    %12 = arith.negf %11 : vector<8x128xf32>
    %13 = math.exp %12 : vector<8x128xf32>
    %cst_10 = arith.constant 1.000000e+00 : f32
    %14 = vector.broadcast %cst_10 : f32 to vector<8x128xf32>
    %15 = arith.addf %14, %13 : vector<8x128xf32>
    %16 = arith.divf %14, %15 : vector<8x128xf32>
    %17 = math.tanh %11 : vector<8x128xf32>
    %18 = vector.extract_strided_slice %16 {offsets = [0, 0], sizes = [8, 32], strides = [1, 1]} : vector<8x128xf32> to vector<8x32xf32>
    %19 = vector.extract_strided_slice %16 {offsets = [0, 32], sizes = [8, 32], strides = [1, 1]} : vector<8x128xf32> to vector<8x32xf32>
    %20 = vector.extract_strided_slice %17 {offsets = [0, 64], sizes = [8, 32], strides = [1, 1]} : vector<8x128xf32> to vector<8x32xf32>
    %21 = vector.extract_strided_slice %16 {offsets = [0, 96], sizes = [8, 32], strides = [1, 1]} : vector<8x128xf32> to vector<8x32xf32>
    %22 = arith.mulf %19, %8 : vector<8x32xf32>
    %23 = arith.mulf %18, %20 : vector<8x32xf32>
    %24 = arith.addf %22, %23 : vector<8x32xf32>
    %25 = math.tanh %24 : vector<8x32xf32>
    %26 = arith.mulf %21, %25 : vector<8x32xf32>
    %c0_11 = arith.constant 0 : index
    %c0_12 = arith.constant 0 : index
    %27 = vector.load %arg16[%c0_11, %c0_12] : memref<64x32xf32, #tpu.memory_space<vmem>>, vector<8x32xf32>
    tpu.vector_store %arg16[%c0_11, %c0_12], %26 {strides = array<i32>} : memref<64x32xf32, #tpu.memory_space<vmem>>, vector<8x32xf32>,
    %28 = vector.extract_strided_slice %6 {offsets = [8, 0], sizes = [8, 128], strides = [1, 1]} : vector<64x128xf32> to vector<8x128xf32>
    %cst_13 = arith.constant dense<0.000000e+00> : vector<8x128xf32>
    %29 = tpu.matmul %26, %2, %cst_13 {dimension_numbers = #tpu.dot_dimension_numbers<[1], [0], [0], [1], [0, 0, 1, 1], [], []>} : vector<8x32xf32>, vector<32x128xf32>, vector<8x128xf32> -> vector<8x128xf32>
    %30 = arith.addf %28, %29 : vector<8x128xf32>
    %31 = arith.negf %30 : vector<8x128xf32>
    %32 = math.exp %31 : vector<8x128xf32>
    %cst_14 = arith.constant 1.000000e+00 : f32
    %33 = vector.broadcast %cst_14 : f32 to vector<8x128xf32>
    %34 = arith.addf %33, %32 : vector<8x128xf32>
    %35 = arith.divf %33, %34 : vector<8x128xf32>
    %36 = math.tanh %30 : vector<8x128xf32>
    %37 = vector.extract_strided_slice %35 {offsets = [0, 0], sizes = [8, 32], strides = [1, 1]} : vector<8x128xf32> to vector<8x32xf32>
    %38 = vector.extract_strided_slice %35 {offsets = [0, 32], sizes = [8, 32], strides = [1, 1]} : vector<8x128xf32> to vector<8x32xf32>
    %39 = vector.extract_strided_slice %36 {offsets = [0, 64], sizes = [8, 32], strides = [1, 1]} : vector<8x128xf32> to vector<8x32xf32>
    %40 = vector.extract_strided_slice %35 {offsets = [0, 96], sizes = [8, 32], strides = [1, 1]} : vector<8x128xf32> to vector<8x32xf32>
    %41 = arith.mulf %38, %24 : vector<8x32xf32>
    %42 = arith.mulf %37, %39 : vector<8x32xf32>
    %43 = arith.addf %41, %42 : vector<8x32xf32>
    %44 = math.tanh %43 : vector<8x32xf32>
    %45 = arith.mulf %40, %44 : vector<8x32xf32>
    %c8 = arith.constant 8 : index
    %c0_15 = arith.constant 0 : index
    %46 = vector.load %arg16[%c8, %c0_15] : memref<64x32xf32, #tpu.memory_space<vmem>>, vector<8x32xf32>
    tpu.vector_store %arg16[%c8, %c0_15], %45 {strides = array<i32>} : memref<64x32xf32, #tpu.memory_space<vmem>>, vector<8x32xf32>,
    %47 = vector.extract_strided_slice %6 {offsets = [16, 0], sizes = [8, 128], strides = [1, 1]} : vector<64x128xf32> to vector<8x128xf32>
    %cst_16 = arith.constant dense<0.000000e+00> : vector<8x128xf32>
    %48 = tpu.matmul %45, %2, %cst_16 {dimension_numbers = #tpu.dot_dimension_numbers<[1], [0], [0], [1], [0, 0, 1, 1], [], []>} : vector<8x32xf32>, vector<32x128xf32>, vector<8x128xf32> -> vector<8x128xf32>
    %49 = arith.addf %47, %48 : vector<8x128xf32>
    %50 = arith.negf %49 : vector<8x128xf32>
    %51 = math.exp %50 : vector<8x128xf32>
    %cst_17 = arith.constant 1.000000e+00 : f32
    %52 = vector.broadcast %cst_17 : f32 to vector<8x128xf32>
    %53 = arith.addf %52, %51 : vector<8x128xf32>
    %54 = arith.divf %52, %53 : vector<8x128xf32>
    %55 = math.tanh %49 : vector<8x128xf32>
    %56 = vector.extract_strided_slice %54 {offsets = [0, 0], sizes = [8, 32], strides = [1, 1]} : vector<8x128xf32> to vector<8x32xf32>
    %57 = vector.extract_strided_slice %54 {offsets = [0, 32], sizes = [8, 32], strides = [1, 1]} : vector<8x128xf32> to vector<8x32xf32>
    %58 = vector.extract_strided_slice %55 {offsets = [0, 64], sizes = [8, 32], strides = [1, 1]} : vector<8x128xf32> to vector<8x32xf32>
    %59 = vector.extract_strided_slice %54 {offsets = [0, 96], sizes = [8, 32], strides = [1, 1]} : vector<8x128xf32> to vector<8x32xf32>
    %60 = arith.mulf %57, %43 : vector<8x32xf32>
    %61 = arith.mulf %56, %58 : vector<8x32xf32>
    %62 = arith.addf %60, %61 : vector<8x32xf32>
    %63 = math.tanh %62 : vector<8x32xf32>
    %64 = arith.mulf %59, %63 : vector<8x32xf32>
    %c16 = arith.constant 16 : index
    %c0_18 = arith.constant 0 : index
    %65 = vector.load %arg16[%c16, %c0_18] : memref<64x32xf32, #tpu.memory_space<vmem>>, vector<8x32xf32>
    tpu.vector_store %arg16[%c16, %c0_18], %64 {strides = array<i32>} : memref<64x32xf32, #tpu.memory_space<vmem>>, vector<8x32xf32>,
    %66 = vector.extract_strided_slice %6 {offsets = [24, 0], sizes = [8, 128], strides = [1, 1]} : vector<64x128xf32> to vector<8x128xf32>
    %cst_19 = arith.constant dense<0.000000e+00> : vector<8x128xf32>
    %67 = tpu.matmul %64, %2, %cst_19 {dimension_numbers = #tpu.dot_dimension_numbers<[1], [0], [0], [1], [0, 0, 1, 1], [], []>} : vector<8x32xf32>, vector<32x128xf32>, vector<8x128xf32> -> vector<8x128xf32>
    %68 = arith.addf %66, %67 : vector<8x128xf32>
    %69 = arith.negf %68 : vector<8x128xf32>
    %70 = math.exp %69 : vector<8x128xf32>
    %cst_20 = arith.constant 1.000000e+00 : f32
    %71 = vector.broadcast %cst_20 : f32 to vector<8x128xf32>
    %72 = arith.addf %71, %70 : vector<8x128xf32>
    %73 = arith.divf %71, %72 : vector<8x128xf32>
    %74 = math.tanh %68 : vector<8x128xf32>
    %75 = vector.extract_strided_slice %73 {offsets = [0, 0], sizes = [8, 32], strides = [1, 1]} : vector<8x128xf32> to vector<8x32xf32>
    %76 = vector.extract_strided_slice %73 {offsets = [0, 32], sizes = [8, 32], strides = [1, 1]} : vector<8x128xf32> to vector<8x32xf32>
    %77 = vector.extract_strided_slice %74 {offsets = [0, 64], sizes = [8, 32], strides = [1, 1]} : vector<8x128xf32> to vector<8x32xf32>
    %78 = vector.extract_strided_slice %73 {offsets = [0, 96], sizes = [8, 32], strides = [1, 1]} : vector<8x128xf32> to vector<8x32xf32>
    %79 = arith.mulf %76, %62 : vector<8x32xf32>
    %80 = arith.mulf %75, %77 : vector<8x32xf32>
    %81 = arith.addf %79, %80 : vector<8x32xf32>
    %82 = math.tanh %81 : vector<8x32xf32>
    %83 = arith.mulf %78, %82 : vector<8x32xf32>
    %c24 = arith.constant 24 : index
    %c0_21 = arith.constant 0 : index
    %84 = vector.load %arg16[%c24, %c0_21] : memref<64x32xf32, #tpu.memory_space<vmem>>, vector<8x32xf32>
    tpu.vector_store %arg16[%c24, %c0_21], %83 {strides = array<i32>} : memref<64x32xf32, #tpu.memory_space<vmem>>, vector<8x32xf32>,
    %85 = vector.extract_strided_slice %6 {offsets = [32, 0], sizes = [8, 128], strides = [1, 1]} : vector<64x128xf32> to vector<8x128xf32>
    %cst_22 = arith.constant dense<0.000000e+00> : vector<8x128xf32>
    %86 = tpu.matmul %83, %2, %cst_22 {dimension_numbers = #tpu.dot_dimension_numbers<[1], [0], [0], [1], [0, 0, 1, 1], [], []>} : vector<8x32xf32>, vector<32x128xf32>, vector<8x128xf32> -> vector<8x128xf32>
    %87 = arith.addf %85, %86 : vector<8x128xf32>
    %88 = arith.negf %87 : vector<8x128xf32>
    %89 = math.exp %88 : vector<8x128xf32>
    %cst_23 = arith.constant 1.000000e+00 : f32
    %90 = vector.broadcast %cst_23 : f32 to vector<8x128xf32>
    %91 = arith.addf %90, %89 : vector<8x128xf32>
    %92 = arith.divf %90, %91 : vector<8x128xf32>
    %93 = math.tanh %87 : vector<8x128xf32>
    %94 = vector.extract_strided_slice %92 {offsets = [0, 0], sizes = [8, 32], strides = [1, 1]} : vector<8x128xf32> to vector<8x32xf32>
    %95 = vector.extract_strided_slice %92 {offsets = [0, 32], sizes = [8, 32], strides = [1, 1]} : vector<8x128xf32> to vector<8x32xf32>
    %96 = vector.extract_strided_slice %93 {offsets = [0, 64], sizes = [8, 32], strides = [1, 1]} : vector<8x128xf32> to vector<8x32xf32>
    %97 = vector.extract_strided_slice %92 {offsets = [0, 96], sizes = [8, 32], strides = [1, 1]} : vector<8x128xf32> to vector<8x32xf32>
    %98 = arith.mulf %95, %81 : vector<8x32xf32>
    %99 = arith.mulf %94, %96 : vector<8x32xf32>
    %100 = arith.addf %98, %99 : vector<8x32xf32>
    %101 = math.tanh %100 : vector<8x32xf32>
    %102 = arith.mulf %97, %101 : vector<8x32xf32>
    %c32 = arith.constant 32 : index
    %c0_24 = arith.constant 0 : index
    %103 = vector.load %arg16[%c32, %c0_24] : memref<64x32xf32, #tpu.memory_space<vmem>>, vector<8x32xf32>
    tpu.vector_store %arg16[%c32, %c0_24], %102 {strides = array<i32>} : memref<64x32xf32, #tpu.memory_space<vmem>>, vector<8x32xf32>,
    %104 = vector.extract_strided_slice %6 {offsets = [40, 0], sizes = [8, 128], strides = [1, 1]} : vector<64x128xf32> to vector<8x128xf32>
    %cst_25 = arith.constant dense<0.000000e+00> : vector<8x128xf32>
    %105 = tpu.matmul %102, %2, %cst_25 {dimension_numbers = #tpu.dot_dimension_numbers<[1], [0], [0], [1], [0, 0, 1, 1], [], []>} : vector<8x32xf32>, vector<32x128xf32>, vector<8x128xf32> -> vector<8x128xf32>
    %106 = arith.addf %104, %105 : vector<8x128xf32>
    %107 = arith.negf %106 : vector<8x128xf32>
    %108 = math.exp %107 : vector<8x128xf32>
    %cst_26 = arith.constant 1.000000e+00 : f32
    %109 = vector.broadcast %cst_26 : f32 to vector<8x128xf32>
    %110 = arith.addf %109, %108 : vector<8x128xf32>
    %111 = arith.divf %109, %110 : vector<8x128xf32>
    %112 = math.tanh %106 : vector<8x128xf32>
    %113 = vector.extract_strided_slice %111 {offsets = [0, 0], sizes = [8, 32], strides = [1, 1]} : vector<8x128xf32> to vector<8x32xf32>
    %114 = vector.extract_strided_slice %111 {offsets = [0, 32], sizes = [8, 32], strides = [1, 1]} : vector<8x128xf32> to vector<8x32xf32>
    %115 = vector.extract_strided_slice %112 {offsets = [0, 64], sizes = [8, 32], strides = [1, 1]} : vector<8x128xf32> to vector<8x32xf32>
    %116 = vector.extract_strided_slice %111 {offsets = [0, 96], sizes = [8, 32], strides = [1, 1]} : vector<8x128xf32> to vector<8x32xf32>
    %117 = arith.mulf %114, %100 : vector<8x32xf32>
    %118 = arith.mulf %113, %115 : vector<8x32xf32>
    %119 = arith.addf %117, %118 : vector<8x32xf32>
    %120 = math.tanh %119 : vector<8x32xf32>
    %121 = arith.mulf %116, %120 : vector<8x32xf32>
    %c40 = arith.constant 40 : index
    %c0_27 = arith.constant 0 : index
    %122 = vector.load %arg16[%c40, %c0_27] : memref<64x32xf32, #tpu.memory_space<vmem>>, vector<8x32xf32>
    tpu.vector_store %arg16[%c40, %c0_27], %121 {strides = array<i32>} : memref<64x32xf32, #tpu.memory_space<vmem>>, vector<8x32xf32>,
    %123 = vector.extract_strided_slice %6 {offsets = [48, 0], sizes = [8, 128], strides = [1, 1]} : vector<64x128xf32> to vector<8x128xf32>
    %cst_28 = arith.constant dense<0.000000e+00> : vector<8x128xf32>
    %124 = tpu.matmul %121, %2, %cst_28 {dimension_numbers = #tpu.dot_dimension_numbers<[1], [0], [0], [1], [0, 0, 1, 1], [], []>} : vector<8x32xf32>, vector<32x128xf32>, vector<8x128xf32> -> vector<8x128xf32>
    %125 = arith.addf %123, %124 : vector<8x128xf32>
    %126 = arith.negf %125 : vector<8x128xf32>
    %127 = math.exp %126 : vector<8x128xf32>
    %cst_29 = arith.constant 1.000000e+00 : f32
    %128 = vector.broadcast %cst_29 : f32 to vector<8x128xf32>
    %129 = arith.addf %128, %127 : vector<8x128xf32>
    %130 = arith.divf %128, %129 : vector<8x128xf32>
    %131 = math.tanh %125 : vector<8x128xf32>
    %132 = vector.extract_strided_slice %130 {offsets = [0, 0], sizes = [8, 32], strides = [1, 1]} : vector<8x128xf32> to vector<8x32xf32>
    %133 = vector.extract_strided_slice %130 {offsets = [0, 32], sizes = [8, 32], strides = [1, 1]} : vector<8x128xf32> to vector<8x32xf32>
    %134 = vector.extract_strided_slice %131 {offsets = [0, 64], sizes = [8, 32], strides = [1, 1]} : vector<8x128xf32> to vector<8x32xf32>
    %135 = vector.extract_strided_slice %130 {offsets = [0, 96], sizes = [8, 32], strides = [1, 1]} : vector<8x128xf32> to vector<8x32xf32>
    %136 = arith.mulf %133, %119 : vector<8x32xf32>
    %137 = arith.mulf %132, %134 : vector<8x32xf32>
    %138 = arith.addf %136, %137 : vector<8x32xf32>
    %139 = math.tanh %138 : vector<8x32xf32>
    %140 = arith.mulf %135, %139 : vector<8x32xf32>
    %c48 = arith.constant 48 : index
    %c0_30 = arith.constant 0 : index
    %141 = vector.load %arg16[%c48, %c0_30] : memref<64x32xf32, #tpu.memory_space<vmem>>, vector<8x32xf32>
    tpu.vector_store %arg16[%c48, %c0_30], %140 {strides = array<i32>} : memref<64x32xf32, #tpu.memory_space<vmem>>, vector<8x32xf32>,
    %142 = vector.extract_strided_slice %6 {offsets = [56, 0], sizes = [8, 128], strides = [1, 1]} : vector<64x128xf32> to vector<8x128xf32>
    %cst_31 = arith.constant dense<0.000000e+00> : vector<8x128xf32>
    %143 = tpu.matmul %140, %2, %cst_31 {dimension_numbers = #tpu.dot_dimension_numbers<[1], [0], [0], [1], [0, 0, 1, 1], [], []>} : vector<8x32xf32>, vector<32x128xf32>, vector<8x128xf32> -> vector<8x128xf32>
    %144 = arith.addf %142, %143 : vector<8x128xf32>
    %145 = arith.negf %144 : vector<8x128xf32>
    %146 = math.exp %145 : vector<8x128xf32>
    %cst_32 = arith.constant 1.000000e+00 : f32
    %147 = vector.broadcast %cst_32 : f32 to vector<8x128xf32>
    %148 = arith.addf %147, %146 : vector<8x128xf32>
    %149 = arith.divf %147, %148 : vector<8x128xf32>
    %150 = math.tanh %144 : vector<8x128xf32>
    %151 = vector.extract_strided_slice %149 {offsets = [0, 0], sizes = [8, 32], strides = [1, 1]} : vector<8x128xf32> to vector<8x32xf32>
    %152 = vector.extract_strided_slice %149 {offsets = [0, 32], sizes = [8, 32], strides = [1, 1]} : vector<8x128xf32> to vector<8x32xf32>
    %153 = vector.extract_strided_slice %150 {offsets = [0, 64], sizes = [8, 32], strides = [1, 1]} : vector<8x128xf32> to vector<8x32xf32>
    %154 = vector.extract_strided_slice %149 {offsets = [0, 96], sizes = [8, 32], strides = [1, 1]} : vector<8x128xf32> to vector<8x32xf32>
    %155 = arith.mulf %152, %138 : vector<8x32xf32>
    %156 = arith.mulf %151, %153 : vector<8x32xf32>
    %157 = arith.addf %155, %156 : vector<8x32xf32>
    %158 = math.tanh %157 : vector<8x32xf32>
    %159 = arith.mulf %154, %158 : vector<8x32xf32>
    %c56 = arith.constant 56 : index
    %c0_33 = arith.constant 0 : index
    %160 = vector.load %arg16[%c56, %c0_33] : memref<64x32xf32, #tpu.memory_space<vmem>>, vector<8x32xf32>
    tpu.vector_store %arg16[%c56, %c0_33], %159 {strides = array<i32>} : memref<64x32xf32, #tpu.memory_space<vmem>>, vector<8x32xf32>,
    %c0_34 = arith.constant 0 : index
    %c0_35 = arith.constant 0 : index
    %161 = vector.load %arg16[%c0_34, %c0_35] : memref<64x32xf32, #tpu.memory_space<vmem>>, vector<64x32xf32>
    %c0_36 = arith.constant 0 : index
    %c0_37 = arith.constant 0 : index
    %162 = vector.load %arg4[%c0_36, %c0_37] : memref<32x128xf32, #tpu.memory_space<vmem>>, vector<32x128xf32>
    %c0_38 = arith.constant 0 : index
    %c0_39 = arith.constant 0 : index
    %163 = vector.load %arg5[%c0_38, %c0_39] : memref<32x128xf32, #tpu.memory_space<vmem>>, vector<32x128xf32>
    %c0_40 = arith.constant 0 : index
    %c0_41 = arith.constant 0 : index
    %164 = vector.load %arg6[%c0_40, %c0_41] : memref<1x128xf32, #tpu.memory_space<vmem>>, vector<1x128xf32>
    %cst_42 = arith.constant dense<0.000000e+00> : vector<64x128xf32>
    %165 = tpu.matmul %161, %162, %cst_42 {dimension_numbers = #tpu.dot_dimension_numbers<[1], [0], [0], [1], [0, 0, 1, 1], [], []>} : vector<64x32xf32>, vector<32x128xf32>, vector<64x128xf32> -> vector<64x128xf32>
    %166 = vector.broadcast %164 : vector<1x128xf32> to vector<64x128xf32>
    %167 = arith.addf %165, %166 : vector<64x128xf32>
    %cst_43 = arith.constant 0.000000e+00 : f32
    %168 = vector.broadcast %cst_43 : f32 to vector<8x32xf32>
    %cst_44 = arith.constant 0.000000e+00 : f32
    %169 = vector.broadcast %cst_44 : f32 to vector<8x32xf32>
    %170 = vector.extract_strided_slice %167 {offsets = [0, 0], sizes = [8, 128], strides = [1, 1]} : vector<64x128xf32> to vector<8x128xf32>
    %cst_45 = arith.constant dense<0.000000e+00> : vector<8x128xf32>
    %171 = tpu.matmul %168, %163, %cst_45 {dimension_numbers = #tpu.dot_dimension_numbers<[1], [0], [0], [1], [0, 0, 1, 1], [], []>} : vector<8x32xf32>, vector<32x128xf32>, vector<8x128xf32> -> vector<8x128xf32>
    %172 = arith.addf %170, %171 : vector<8x128xf32>
    %173 = arith.negf %172 : vector<8x128xf32>
    %174 = math.exp %173 : vector<8x128xf32>
    %cst_46 = arith.constant 1.000000e+00 : f32
    %175 = vector.broadcast %cst_46 : f32 to vector<8x128xf32>
    %176 = arith.addf %175, %174 : vector<8x128xf32>
    %177 = arith.divf %175, %176 : vector<8x128xf32>
    %178 = math.tanh %172 : vector<8x128xf32>
    %179 = vector.extract_strided_slice %177 {offsets = [0, 0], sizes = [8, 32], strides = [1, 1]} : vector<8x128xf32> to vector<8x32xf32>
    %180 = vector.extract_strided_slice %177 {offsets = [0, 32], sizes = [8, 32], strides = [1, 1]} : vector<8x128xf32> to vector<8x32xf32>
    %181 = vector.extract_strided_slice %178 {offsets = [0, 64], sizes = [8, 32], strides = [1, 1]} : vector<8x128xf32> to vector<8x32xf32>
    %182 = vector.extract_strided_slice %177 {offsets = [0, 96], sizes = [8, 32], strides = [1, 1]} : vector<8x128xf32> to vector<8x32xf32>
    %183 = arith.mulf %180, %169 : vector<8x32xf32>
    %184 = arith.mulf %179, %181 : vector<8x32xf32>
    %185 = arith.addf %183, %184 : vector<8x32xf32>
    %186 = math.tanh %185 : vector<8x32xf32>
    %187 = arith.mulf %182, %186 : vector<8x32xf32>
    %c0_47 = arith.constant 0 : index
    %c0_48 = arith.constant 0 : index
    %188 = vector.load %arg16[%c0_47, %c0_48] : memref<64x32xf32, #tpu.memory_space<vmem>>, vector<8x32xf32>
    tpu.vector_store %arg16[%c0_47, %c0_48], %187 {strides = array<i32>} : memref<64x32xf32, #tpu.memory_space<vmem>>, vector<8x32xf32>,
    %189 = vector.extract_strided_slice %167 {offsets = [8, 0], sizes = [8, 128], strides = [1, 1]} : vector<64x128xf32> to vector<8x128xf32>
    %cst_49 = arith.constant dense<0.000000e+00> : vector<8x128xf32>
    %190 = tpu.matmul %187, %163, %cst_49 {dimension_numbers = #tpu.dot_dimension_numbers<[1], [0], [0], [1], [0, 0, 1, 1], [], []>} : vector<8x32xf32>, vector<32x128xf32>, vector<8x128xf32> -> vector<8x128xf32>
    %191 = arith.addf %189, %190 : vector<8x128xf32>
    %192 = arith.negf %191 : vector<8x128xf32>
    %193 = math.exp %192 : vector<8x128xf32>
    %cst_50 = arith.constant 1.000000e+00 : f32
    %194 = vector.broadcast %cst_50 : f32 to vector<8x128xf32>
    %195 = arith.addf %194, %193 : vector<8x128xf32>
    %196 = arith.divf %194, %195 : vector<8x128xf32>
    %197 = math.tanh %191 : vector<8x128xf32>
    %198 = vector.extract_strided_slice %196 {offsets = [0, 0], sizes = [8, 32], strides = [1, 1]} : vector<8x128xf32> to vector<8x32xf32>
    %199 = vector.extract_strided_slice %196 {offsets = [0, 32], sizes = [8, 32], strides = [1, 1]} : vector<8x128xf32> to vector<8x32xf32>
    %200 = vector.extract_strided_slice %197 {offsets = [0, 64], sizes = [8, 32], strides = [1, 1]} : vector<8x128xf32> to vector<8x32xf32>
    %201 = vector.extract_strided_slice %196 {offsets = [0, 96], sizes = [8, 32], strides = [1, 1]} : vector<8x128xf32> to vector<8x32xf32>
    %202 = arith.mulf %199, %185 : vector<8x32xf32>
    %203 = arith.mulf %198, %200 : vector<8x32xf32>
    %204 = arith.addf %202, %203 : vector<8x32xf32>
    %205 = math.tanh %204 : vector<8x32xf32>
    %206 = arith.mulf %201, %205 : vector<8x32xf32>
    %c8_51 = arith.constant 8 : index
    %c0_52 = arith.constant 0 : index
    %207 = vector.load %arg16[%c8_51, %c0_52] : memref<64x32xf32, #tpu.memory_space<vmem>>, vector<8x32xf32>
    tpu.vector_store %arg16[%c8_51, %c0_52], %206 {strides = array<i32>} : memref<64x32xf32, #tpu.memory_space<vmem>>, vector<8x32xf32>,
    %208 = vector.extract_strided_slice %167 {offsets = [16, 0], sizes = [8, 128], strides = [1, 1]} : vector<64x128xf32> to vector<8x128xf32>
    %cst_53 = arith.constant dense<0.000000e+00> : vector<8x128xf32>
    %209 = tpu.matmul %206, %163, %cst_53 {dimension_numbers = #tpu.dot_dimension_numbers<[1], [0], [0], [1], [0, 0, 1, 1], [], []>} : vector<8x32xf32>, vector<32x128xf32>, vector<8x128xf32> -> vector<8x128xf32>
    %210 = arith.addf %208, %209 : vector<8x128xf32>
    %211 = arith.negf %210 : vector<8x128xf32>
    %212 = math.exp %211 : vector<8x128xf32>
    %cst_54 = arith.constant 1.000000e+00 : f32
    %213 = vector.broadcast %cst_54 : f32 to vector<8x128xf32>
    %214 = arith.addf %213, %212 : vector<8x128xf32>
    %215 = arith.divf %213, %214 : vector<8x128xf32>
    %216 = math.tanh %210 : vector<8x128xf32>
    %217 = vector.extract_strided_slice %215 {offsets = [0, 0], sizes = [8, 32], strides = [1, 1]} : vector<8x128xf32> to vector<8x32xf32>
    %218 = vector.extract_strided_slice %215 {offsets = [0, 32], sizes = [8, 32], strides = [1, 1]} : vector<8x128xf32> to vector<8x32xf32>
    %219 = vector.extract_strided_slice %216 {offsets = [0, 64], sizes = [8, 32], strides = [1, 1]} : vector<8x128xf32> to vector<8x32xf32>
    %220 = vector.extract_strided_slice %215 {offsets = [0, 96], sizes = [8, 32], strides = [1, 1]} : vector<8x128xf32> to vector<8x32xf32>
    %221 = arith.mulf %218, %204 : vector<8x32xf32>
    %222 = arith.mulf %217, %219 : vector<8x32xf32>
    %223 = arith.addf %221, %222 : vector<8x32xf32>
    %224 = math.tanh %223 : vector<8x32xf32>
    %225 = arith.mulf %220, %224 : vector<8x32xf32>
    %c16_55 = arith.constant 16 : index
    %c0_56 = arith.constant 0 : index
    %226 = vector.load %arg16[%c16_55, %c0_56] : memref<64x32xf32, #tpu.memory_space<vmem>>, vector<8x32xf32>
    tpu.vector_store %arg16[%c16_55, %c0_56], %225 {strides = array<i32>} : memref<64x32xf32, #tpu.memory_space<vmem>>, vector<8x32xf32>,
    %227 = vector.extract_strided_slice %167 {offsets = [24, 0], sizes = [8, 128], strides = [1, 1]} : vector<64x128xf32> to vector<8x128xf32>
    %cst_57 = arith.constant dense<0.000000e+00> : vector<8x128xf32>
    %228 = tpu.matmul %225, %163, %cst_57 {dimension_numbers = #tpu.dot_dimension_numbers<[1], [0], [0], [1], [0, 0, 1, 1], [], []>} : vector<8x32xf32>, vector<32x128xf32>, vector<8x128xf32> -> vector<8x128xf32>
    %229 = arith.addf %227, %228 : vector<8x128xf32>
    %230 = arith.negf %229 : vector<8x128xf32>
    %231 = math.exp %230 : vector<8x128xf32>
    %cst_58 = arith.constant 1.000000e+00 : f32
    %232 = vector.broadcast %cst_58 : f32 to vector<8x128xf32>
    %233 = arith.addf %232, %231 : vector<8x128xf32>
    %234 = arith.divf %232, %233 : vector<8x128xf32>
    %235 = math.tanh %229 : vector<8x128xf32>
    %236 = vector.extract_strided_slice %234 {offsets = [0, 0], sizes = [8, 32], strides = [1, 1]} : vector<8x128xf32> to vector<8x32xf32>
    %237 = vector.extract_strided_slice %234 {offsets = [0, 32], sizes = [8, 32], strides = [1, 1]} : vector<8x128xf32> to vector<8x32xf32>
    %238 = vector.extract_strided_slice %235 {offsets = [0, 64], sizes = [8, 32], strides = [1, 1]} : vector<8x128xf32> to vector<8x32xf32>
    %239 = vector.extract_strided_slice %234 {offsets = [0, 96], sizes = [8, 32], strides = [1, 1]} : vector<8x128xf32> to vector<8x32xf32>
    %240 = arith.mulf %237, %223 : vector<8x32xf32>
    %241 = arith.mulf %236, %238 : vector<8x32xf32>
    %242 = arith.addf %240, %241 : vector<8x32xf32>
    %243 = math.tanh %242 : vector<8x32xf32>
    %244 = arith.mulf %239, %243 : vector<8x32xf32>
    %c24_59 = arith.constant 24 : index
    %c0_60 = arith.constant 0 : index
    %245 = vector.load %arg16[%c24_59, %c0_60] : memref<64x32xf32, #tpu.memory_space<vmem>>, vector<8x32xf32>
    tpu.vector_store %arg16[%c24_59, %c0_60], %244 {strides = array<i32>} : memref<64x32xf32, #tpu.memory_space<vmem>>, vector<8x32xf32>,
    %246 = vector.extract_strided_slice %167 {offsets = [32, 0], sizes = [8, 128], strides = [1, 1]} : vector<64x128xf32> to vector<8x128xf32>
    %cst_61 = arith.constant dense<0.000000e+00> : vector<8x128xf32>
    %247 = tpu.matmul %244, %163, %cst_61 {dimension_numbers = #tpu.dot_dimension_numbers<[1], [0], [0], [1], [0, 0, 1, 1], [], []>} : vector<8x32xf32>, vector<32x128xf32>, vector<8x128xf32> -> vector<8x128xf32>
    %248 = arith.addf %246, %247 : vector<8x128xf32>
    %249 = arith.negf %248 : vector<8x128xf32>
    %250 = math.exp %249 : vector<8x128xf32>
    %cst_62 = arith.constant 1.000000e+00 : f32
    %251 = vector.broadcast %cst_62 : f32 to vector<8x128xf32>
    %252 = arith.addf %251, %250 : vector<8x128xf32>
    %253 = arith.divf %251, %252 : vector<8x128xf32>
    %254 = math.tanh %248 : vector<8x128xf32>
    %255 = vector.extract_strided_slice %253 {offsets = [0, 0], sizes = [8, 32], strides = [1, 1]} : vector<8x128xf32> to vector<8x32xf32>
    %256 = vector.extract_strided_slice %253 {offsets = [0, 32], sizes = [8, 32], strides = [1, 1]} : vector<8x128xf32> to vector<8x32xf32>
    %257 = vector.extract_strided_slice %254 {offsets = [0, 64], sizes = [8, 32], strides = [1, 1]} : vector<8x128xf32> to vector<8x32xf32>
    %258 = vector.extract_strided_slice %253 {offsets = [0, 96], sizes = [8, 32], strides = [1, 1]} : vector<8x128xf32> to vector<8x32xf32>
    %259 = arith.mulf %256, %242 : vector<8x32xf32>
    %260 = arith.mulf %255, %257 : vector<8x32xf32>
    %261 = arith.addf %259, %260 : vector<8x32xf32>
    %262 = math.tanh %261 : vector<8x32xf32>
    %263 = arith.mulf %258, %262 : vector<8x32xf32>
    %c32_63 = arith.constant 32 : index
    %c0_64 = arith.constant 0 : index
    %264 = vector.load %arg16[%c32_63, %c0_64] : memref<64x32xf32, #tpu.memory_space<vmem>>, vector<8x32xf32>
    tpu.vector_store %arg16[%c32_63, %c0_64], %263 {strides = array<i32>} : memref<64x32xf32, #tpu.memory_space<vmem>>, vector<8x32xf32>,
    %265 = vector.extract_strided_slice %167 {offsets = [40, 0], sizes = [8, 128], strides = [1, 1]} : vector<64x128xf32> to vector<8x128xf32>
    %cst_65 = arith.constant dense<0.000000e+00> : vector<8x128xf32>
    %266 = tpu.matmul %263, %163, %cst_65 {dimension_numbers = #tpu.dot_dimension_numbers<[1], [0], [0], [1], [0, 0, 1, 1], [], []>} : vector<8x32xf32>, vector<32x128xf32>, vector<8x128xf32> -> vector<8x128xf32>
    %267 = arith.addf %265, %266 : vector<8x128xf32>
    %268 = arith.negf %267 : vector<8x128xf32>
    %269 = math.exp %268 : vector<8x128xf32>
    %cst_66 = arith.constant 1.000000e+00 : f32
    %270 = vector.broadcast %cst_66 : f32 to vector<8x128xf32>
    %271 = arith.addf %270, %269 : vector<8x128xf32>
    %272 = arith.divf %270, %271 : vector<8x128xf32>
    %273 = math.tanh %267 : vector<8x128xf32>
    %274 = vector.extract_strided_slice %272 {offsets = [0, 0], sizes = [8, 32], strides = [1, 1]} : vector<8x128xf32> to vector<8x32xf32>
    %275 = vector.extract_strided_slice %272 {offsets = [0, 32], sizes = [8, 32], strides = [1, 1]} : vector<8x128xf32> to vector<8x32xf32>
    %276 = vector.extract_strided_slice %273 {offsets = [0, 64], sizes = [8, 32], strides = [1, 1]} : vector<8x128xf32> to vector<8x32xf32>
    %277 = vector.extract_strided_slice %272 {offsets = [0, 96], sizes = [8, 32], strides = [1, 1]} : vector<8x128xf32> to vector<8x32xf32>
    %278 = arith.mulf %275, %261 : vector<8x32xf32>
    %279 = arith.mulf %274, %276 : vector<8x32xf32>
    %280 = arith.addf %278, %279 : vector<8x32xf32>
    %281 = math.tanh %280 : vector<8x32xf32>
    %282 = arith.mulf %277, %281 : vector<8x32xf32>
    %c40_67 = arith.constant 40 : index
    %c0_68 = arith.constant 0 : index
    %283 = vector.load %arg16[%c40_67, %c0_68] : memref<64x32xf32, #tpu.memory_space<vmem>>, vector<8x32xf32>
    tpu.vector_store %arg16[%c40_67, %c0_68], %282 {strides = array<i32>} : memref<64x32xf32, #tpu.memory_space<vmem>>, vector<8x32xf32>,
    %284 = vector.extract_strided_slice %167 {offsets = [48, 0], sizes = [8, 128], strides = [1, 1]} : vector<64x128xf32> to vector<8x128xf32>
    %cst_69 = arith.constant dense<0.000000e+00> : vector<8x128xf32>
    %285 = tpu.matmul %282, %163, %cst_69 {dimension_numbers = #tpu.dot_dimension_numbers<[1], [0], [0], [1], [0, 0, 1, 1], [], []>} : vector<8x32xf32>, vector<32x128xf32>, vector<8x128xf32> -> vector<8x128xf32>
    %286 = arith.addf %284, %285 : vector<8x128xf32>
    %287 = arith.negf %286 : vector<8x128xf32>
    %288 = math.exp %287 : vector<8x128xf32>
    %cst_70 = arith.constant 1.000000e+00 : f32
    %289 = vector.broadcast %cst_70 : f32 to vector<8x128xf32>
    %290 = arith.addf %289, %288 : vector<8x128xf32>
    %291 = arith.divf %289, %290 : vector<8x128xf32>
    %292 = math.tanh %286 : vector<8x128xf32>
    %293 = vector.extract_strided_slice %291 {offsets = [0, 0], sizes = [8, 32], strides = [1, 1]} : vector<8x128xf32> to vector<8x32xf32>
    %294 = vector.extract_strided_slice %291 {offsets = [0, 32], sizes = [8, 32], strides = [1, 1]} : vector<8x128xf32> to vector<8x32xf32>
    %295 = vector.extract_strided_slice %292 {offsets = [0, 64], sizes = [8, 32], strides = [1, 1]} : vector<8x128xf32> to vector<8x32xf32>
    %296 = vector.extract_strided_slice %291 {offsets = [0, 96], sizes = [8, 32], strides = [1, 1]} : vector<8x128xf32> to vector<8x32xf32>
    %297 = arith.mulf %294, %280 : vector<8x32xf32>
    %298 = arith.mulf %293, %295 : vector<8x32xf32>
    %299 = arith.addf %297, %298 : vector<8x32xf32>
    %300 = math.tanh %299 : vector<8x32xf32>
    %301 = arith.mulf %296, %300 : vector<8x32xf32>
    %c48_71 = arith.constant 48 : index
    %c0_72 = arith.constant 0 : index
    %302 = vector.load %arg16[%c48_71, %c0_72] : memref<64x32xf32, #tpu.memory_space<vmem>>, vector<8x32xf32>
    tpu.vector_store %arg16[%c48_71, %c0_72], %301 {strides = array<i32>} : memref<64x32xf32, #tpu.memory_space<vmem>>, vector<8x32xf32>,
    %303 = vector.extract_strided_slice %167 {offsets = [56, 0], sizes = [8, 128], strides = [1, 1]} : vector<64x128xf32> to vector<8x128xf32>
    %cst_73 = arith.constant dense<0.000000e+00> : vector<8x128xf32>
    %304 = tpu.matmul %301, %163, %cst_73 {dimension_numbers = #tpu.dot_dimension_numbers<[1], [0], [0], [1], [0, 0, 1, 1], [], []>} : vector<8x32xf32>, vector<32x128xf32>, vector<8x128xf32> -> vector<8x128xf32>
    %305 = arith.addf %303, %304 : vector<8x128xf32>
    %306 = arith.negf %305 : vector<8x128xf32>
    %307 = math.exp %306 : vector<8x128xf32>
    %cst_74 = arith.constant 1.000000e+00 : f32
    %308 = vector.broadcast %cst_74 : f32 to vector<8x128xf32>
    %309 = arith.addf %308, %307 : vector<8x128xf32>
    %310 = arith.divf %308, %309 : vector<8x128xf32>
    %311 = math.tanh %305 : vector<8x128xf32>
    %312 = vector.extract_strided_slice %310 {offsets = [0, 0], sizes = [8, 32], strides = [1, 1]} : vector<8x128xf32> to vector<8x32xf32>
    %313 = vector.extract_strided_slice %310 {offsets = [0, 32], sizes = [8, 32], strides = [1, 1]} : vector<8x128xf32> to vector<8x32xf32>
    %314 = vector.extract_strided_slice %311 {offsets = [0, 64], sizes = [8, 32], strides = [1, 1]} : vector<8x128xf32> to vector<8x32xf32>
    %315 = vector.extract_strided_slice %310 {offsets = [0, 96], sizes = [8, 32], strides = [1, 1]} : vector<8x128xf32> to vector<8x32xf32>
    %316 = arith.mulf %313, %299 : vector<8x32xf32>
    %317 = arith.mulf %312, %314 : vector<8x32xf32>
    %318 = arith.addf %316, %317 : vector<8x32xf32>
    %319 = math.tanh %318 : vector<8x32xf32>
    %320 = arith.mulf %315, %319 : vector<8x32xf32>
    %c56_75 = arith.constant 56 : index
    %c0_76 = arith.constant 0 : index
    %321 = vector.load %arg16[%c56_75, %c0_76] : memref<64x32xf32, #tpu.memory_space<vmem>>, vector<8x32xf32>
    tpu.vector_store %arg16[%c56_75, %c0_76], %320 {strides = array<i32>} : memref<64x32xf32, #tpu.memory_space<vmem>>, vector<8x32xf32>,
    %c0_77 = arith.constant 0 : index
    %c0_78 = arith.constant 0 : index
    %322 = vector.load %arg16[%c0_77, %c0_78] : memref<64x32xf32, #tpu.memory_space<vmem>>, vector<64x32xf32>
    %c0_79 = arith.constant 0 : index
    %c0_80 = arith.constant 0 : index
    %323 = vector.load %arg7[%c0_79, %c0_80] : memref<32x128xf32, #tpu.memory_space<vmem>>, vector<32x128xf32>
    %c0_81 = arith.constant 0 : index
    %c0_82 = arith.constant 0 : index
    %324 = vector.load %arg8[%c0_81, %c0_82] : memref<32x128xf32, #tpu.memory_space<vmem>>, vector<32x128xf32>
    %c0_83 = arith.constant 0 : index
    %c0_84 = arith.constant 0 : index
    %325 = vector.load %arg9[%c0_83, %c0_84] : memref<1x128xf32, #tpu.memory_space<vmem>>, vector<1x128xf32>
    %cst_85 = arith.constant dense<0.000000e+00> : vector<64x128xf32>
    %326 = tpu.matmul %322, %323, %cst_85 {dimension_numbers = #tpu.dot_dimension_numbers<[1], [0], [0], [1], [0, 0, 1, 1], [], []>} : vector<64x32xf32>, vector<32x128xf32>, vector<64x128xf32> -> vector<64x128xf32>
    %327 = vector.broadcast %325 : vector<1x128xf32> to vector<64x128xf32>
    %328 = arith.addf %326, %327 : vector<64x128xf32>
    %cst_86 = arith.constant 0.000000e+00 : f32
    %329 = vector.broadcast %cst_86 : f32 to vector<8x32xf32>
    %cst_87 = arith.constant 0.000000e+00 : f32
    %330 = vector.broadcast %cst_87 : f32 to vector<8x32xf32>
    %331 = vector.extract_strided_slice %328 {offsets = [0, 0], sizes = [8, 128], strides = [1, 1]} : vector<64x128xf32> to vector<8x128xf32>
    %cst_88 = arith.constant dense<0.000000e+00> : vector<8x128xf32>
    %332 = tpu.matmul %329, %324, %cst_88 {dimension_numbers = #tpu.dot_dimension_numbers<[1], [0], [0], [1], [0, 0, 1, 1], [], []>} : vector<8x32xf32>, vector<32x128xf32>, vector<8x128xf32> -> vector<8x128xf32>
    %333 = arith.addf %331, %332 : vector<8x128xf32>
    %334 = arith.negf %333 : vector<8x128xf32>
    %335 = math.exp %334 : vector<8x128xf32>
    %cst_89 = arith.constant 1.000000e+00 : f32
    %336 = vector.broadcast %cst_89 : f32 to vector<8x128xf32>
    %337 = arith.addf %336, %335 : vector<8x128xf32>
    %338 = arith.divf %336, %337 : vector<8x128xf32>
    %339 = math.tanh %333 : vector<8x128xf32>
    %340 = vector.extract_strided_slice %338 {offsets = [0, 0], sizes = [8, 32], strides = [1, 1]} : vector<8x128xf32> to vector<8x32xf32>
    %341 = vector.extract_strided_slice %338 {offsets = [0, 32], sizes = [8, 32], strides = [1, 1]} : vector<8x128xf32> to vector<8x32xf32>
    %342 = vector.extract_strided_slice %339 {offsets = [0, 64], sizes = [8, 32], strides = [1, 1]} : vector<8x128xf32> to vector<8x32xf32>
    %343 = vector.extract_strided_slice %338 {offsets = [0, 96], sizes = [8, 32], strides = [1, 1]} : vector<8x128xf32> to vector<8x32xf32>
    %344 = arith.mulf %341, %330 : vector<8x32xf32>
    %345 = arith.mulf %340, %342 : vector<8x32xf32>
    %346 = arith.addf %344, %345 : vector<8x32xf32>
    %347 = math.tanh %346 : vector<8x32xf32>
    %348 = arith.mulf %343, %347 : vector<8x32xf32>
    %c0_90 = arith.constant 0 : index
    %c0_91 = arith.constant 0 : index
    %349 = vector.load %arg16[%c0_90, %c0_91] : memref<64x32xf32, #tpu.memory_space<vmem>>, vector<8x32xf32>
    tpu.vector_store %arg16[%c0_90, %c0_91], %348 {strides = array<i32>} : memref<64x32xf32, #tpu.memory_space<vmem>>, vector<8x32xf32>,
    %350 = vector.extract_strided_slice %328 {offsets = [8, 0], sizes = [8, 128], strides = [1, 1]} : vector<64x128xf32> to vector<8x128xf32>
    %cst_92 = arith.constant dense<0.000000e+00> : vector<8x128xf32>
    %351 = tpu.matmul %348, %324, %cst_92 {dimension_numbers = #tpu.dot_dimension_numbers<[1], [0], [0], [1], [0, 0, 1, 1], [], []>} : vector<8x32xf32>, vector<32x128xf32>, vector<8x128xf32> -> vector<8x128xf32>
    %352 = arith.addf %350, %351 : vector<8x128xf32>
    %353 = arith.negf %352 : vector<8x128xf32>
    %354 = math.exp %353 : vector<8x128xf32>
    %cst_93 = arith.constant 1.000000e+00 : f32
    %355 = vector.broadcast %cst_93 : f32 to vector<8x128xf32>
    %356 = arith.addf %355, %354 : vector<8x128xf32>
    %357 = arith.divf %355, %356 : vector<8x128xf32>
    %358 = math.tanh %352 : vector<8x128xf32>
    %359 = vector.extract_strided_slice %357 {offsets = [0, 0], sizes = [8, 32], strides = [1, 1]} : vector<8x128xf32> to vector<8x32xf32>
    %360 = vector.extract_strided_slice %357 {offsets = [0, 32], sizes = [8, 32], strides = [1, 1]} : vector<8x128xf32> to vector<8x32xf32>
    %361 = vector.extract_strided_slice %358 {offsets = [0, 64], sizes = [8, 32], strides = [1, 1]} : vector<8x128xf32> to vector<8x32xf32>
    %362 = vector.extract_strided_slice %357 {offsets = [0, 96], sizes = [8, 32], strides = [1, 1]} : vector<8x128xf32> to vector<8x32xf32>
    %363 = arith.mulf %360, %346 : vector<8x32xf32>
    %364 = arith.mulf %359, %361 : vector<8x32xf32>
    %365 = arith.addf %363, %364 : vector<8x32xf32>
    %366 = math.tanh %365 : vector<8x32xf32>
    %367 = arith.mulf %362, %366 : vector<8x32xf32>
    %c8_94 = arith.constant 8 : index
    %c0_95 = arith.constant 0 : index
    %368 = vector.load %arg16[%c8_94, %c0_95] : memref<64x32xf32, #tpu.memory_space<vmem>>, vector<8x32xf32>
    tpu.vector_store %arg16[%c8_94, %c0_95], %367 {strides = array<i32>} : memref<64x32xf32, #tpu.memory_space<vmem>>, vector<8x32xf32>,
    %369 = vector.extract_strided_slice %328 {offsets = [16, 0], sizes = [8, 128], strides = [1, 1]} : vector<64x128xf32> to vector<8x128xf32>
    %cst_96 = arith.constant dense<0.000000e+00> : vector<8x128xf32>
    %370 = tpu.matmul %367, %324, %cst_96 {dimension_numbers = #tpu.dot_dimension_numbers<[1], [0], [0], [1], [0, 0, 1, 1], [], []>} : vector<8x32xf32>, vector<32x128xf32>, vector<8x128xf32> -> vector<8x128xf32>
    %371 = arith.addf %369, %370 : vector<8x128xf32>
    %372 = arith.negf %371 : vector<8x128xf32>
    %373 = math.exp %372 : vector<8x128xf32>
    %cst_97 = arith.constant 1.000000e+00 : f32
    %374 = vector.broadcast %cst_97 : f32 to vector<8x128xf32>
    %375 = arith.addf %374, %373 : vector<8x128xf32>
    %376 = arith.divf %374, %375 : vector<8x128xf32>
    %377 = math.tanh %371 : vector<8x128xf32>
    %378 = vector.extract_strided_slice %376 {offsets = [0, 0], sizes = [8, 32], strides = [1, 1]} : vector<8x128xf32> to vector<8x32xf32>
    %379 = vector.extract_strided_slice %376 {offsets = [0, 32], sizes = [8, 32], strides = [1, 1]} : vector<8x128xf32> to vector<8x32xf32>
    %380 = vector.extract_strided_slice %377 {offsets = [0, 64], sizes = [8, 32], strides = [1, 1]} : vector<8x128xf32> to vector<8x32xf32>
    %381 = vector.extract_strided_slice %376 {offsets = [0, 96], sizes = [8, 32], strides = [1, 1]} : vector<8x128xf32> to vector<8x32xf32>
    %382 = arith.mulf %379, %365 : vector<8x32xf32>
    %383 = arith.mulf %378, %380 : vector<8x32xf32>
    %384 = arith.addf %382, %383 : vector<8x32xf32>
    %385 = math.tanh %384 : vector<8x32xf32>
    %386 = arith.mulf %381, %385 : vector<8x32xf32>
    %c16_98 = arith.constant 16 : index
    %c0_99 = arith.constant 0 : index
    %387 = vector.load %arg16[%c16_98, %c0_99] : memref<64x32xf32, #tpu.memory_space<vmem>>, vector<8x32xf32>
    tpu.vector_store %arg16[%c16_98, %c0_99], %386 {strides = array<i32>} : memref<64x32xf32, #tpu.memory_space<vmem>>, vector<8x32xf32>,
    %388 = vector.extract_strided_slice %328 {offsets = [24, 0], sizes = [8, 128], strides = [1, 1]} : vector<64x128xf32> to vector<8x128xf32>
    %cst_100 = arith.constant dense<0.000000e+00> : vector<8x128xf32>
    %389 = tpu.matmul %386, %324, %cst_100 {dimension_numbers = #tpu.dot_dimension_numbers<[1], [0], [0], [1], [0, 0, 1, 1], [], []>} : vector<8x32xf32>, vector<32x128xf32>, vector<8x128xf32> -> vector<8x128xf32>
    %390 = arith.addf %388, %389 : vector<8x128xf32>
    %391 = arith.negf %390 : vector<8x128xf32>
    %392 = math.exp %391 : vector<8x128xf32>
    %cst_101 = arith.constant 1.000000e+00 : f32
    %393 = vector.broadcast %cst_101 : f32 to vector<8x128xf32>
    %394 = arith.addf %393, %392 : vector<8x128xf32>
    %395 = arith.divf %393, %394 : vector<8x128xf32>
    %396 = math.tanh %390 : vector<8x128xf32>
    %397 = vector.extract_strided_slice %395 {offsets = [0, 0], sizes = [8, 32], strides = [1, 1]} : vector<8x128xf32> to vector<8x32xf32>
    %398 = vector.extract_strided_slice %395 {offsets = [0, 32], sizes = [8, 32], strides = [1, 1]} : vector<8x128xf32> to vector<8x32xf32>
    %399 = vector.extract_strided_slice %396 {offsets = [0, 64], sizes = [8, 32], strides = [1, 1]} : vector<8x128xf32> to vector<8x32xf32>
    %400 = vector.extract_strided_slice %395 {offsets = [0, 96], sizes = [8, 32], strides = [1, 1]} : vector<8x128xf32> to vector<8x32xf32>
    %401 = arith.mulf %398, %384 : vector<8x32xf32>
    %402 = arith.mulf %397, %399 : vector<8x32xf32>
    %403 = arith.addf %401, %402 : vector<8x32xf32>
    %404 = math.tanh %403 : vector<8x32xf32>
    %405 = arith.mulf %400, %404 : vector<8x32xf32>
    %c24_102 = arith.constant 24 : index
    %c0_103 = arith.constant 0 : index
    %406 = vector.load %arg16[%c24_102, %c0_103] : memref<64x32xf32, #tpu.memory_space<vmem>>, vector<8x32xf32>
    tpu.vector_store %arg16[%c24_102, %c0_103], %405 {strides = array<i32>} : memref<64x32xf32, #tpu.memory_space<vmem>>, vector<8x32xf32>,
    %407 = vector.extract_strided_slice %328 {offsets = [32, 0], sizes = [8, 128], strides = [1, 1]} : vector<64x128xf32> to vector<8x128xf32>
    %cst_104 = arith.constant dense<0.000000e+00> : vector<8x128xf32>
    %408 = tpu.matmul %405, %324, %cst_104 {dimension_numbers = #tpu.dot_dimension_numbers<[1], [0], [0], [1], [0, 0, 1, 1], [], []>} : vector<8x32xf32>, vector<32x128xf32>, vector<8x128xf32> -> vector<8x128xf32>
    %409 = arith.addf %407, %408 : vector<8x128xf32>
    %410 = arith.negf %409 : vector<8x128xf32>
    %411 = math.exp %410 : vector<8x128xf32>
    %cst_105 = arith.constant 1.000000e+00 : f32
    %412 = vector.broadcast %cst_105 : f32 to vector<8x128xf32>
    %413 = arith.addf %412, %411 : vector<8x128xf32>
    %414 = arith.divf %412, %413 : vector<8x128xf32>
    %415 = math.tanh %409 : vector<8x128xf32>
    %416 = vector.extract_strided_slice %414 {offsets = [0, 0], sizes = [8, 32], strides = [1, 1]} : vector<8x128xf32> to vector<8x32xf32>
    %417 = vector.extract_strided_slice %414 {offsets = [0, 32], sizes = [8, 32], strides = [1, 1]} : vector<8x128xf32> to vector<8x32xf32>
    %418 = vector.extract_strided_slice %415 {offsets = [0, 64], sizes = [8, 32], strides = [1, 1]} : vector<8x128xf32> to vector<8x32xf32>
    %419 = vector.extract_strided_slice %414 {offsets = [0, 96], sizes = [8, 32], strides = [1, 1]} : vector<8x128xf32> to vector<8x32xf32>
    %420 = arith.mulf %417, %403 : vector<8x32xf32>
    %421 = arith.mulf %416, %418 : vector<8x32xf32>
    %422 = arith.addf %420, %421 : vector<8x32xf32>
    %423 = math.tanh %422 : vector<8x32xf32>
    %424 = arith.mulf %419, %423 : vector<8x32xf32>
    %c32_106 = arith.constant 32 : index
    %c0_107 = arith.constant 0 : index
    %425 = vector.load %arg16[%c32_106, %c0_107] : memref<64x32xf32, #tpu.memory_space<vmem>>, vector<8x32xf32>
    tpu.vector_store %arg16[%c32_106, %c0_107], %424 {strides = array<i32>} : memref<64x32xf32, #tpu.memory_space<vmem>>, vector<8x32xf32>,
    %426 = vector.extract_strided_slice %328 {offsets = [40, 0], sizes = [8, 128], strides = [1, 1]} : vector<64x128xf32> to vector<8x128xf32>
    %cst_108 = arith.constant dense<0.000000e+00> : vector<8x128xf32>
    %427 = tpu.matmul %424, %324, %cst_108 {dimension_numbers = #tpu.dot_dimension_numbers<[1], [0], [0], [1], [0, 0, 1, 1], [], []>} : vector<8x32xf32>, vector<32x128xf32>, vector<8x128xf32> -> vector<8x128xf32>
    %428 = arith.addf %426, %427 : vector<8x128xf32>
    %429 = arith.negf %428 : vector<8x128xf32>
    %430 = math.exp %429 : vector<8x128xf32>
    %cst_109 = arith.constant 1.000000e+00 : f32
    %431 = vector.broadcast %cst_109 : f32 to vector<8x128xf32>
    %432 = arith.addf %431, %430 : vector<8x128xf32>
    %433 = arith.divf %431, %432 : vector<8x128xf32>
    %434 = math.tanh %428 : vector<8x128xf32>
    %435 = vector.extract_strided_slice %433 {offsets = [0, 0], sizes = [8, 32], strides = [1, 1]} : vector<8x128xf32> to vector<8x32xf32>
    %436 = vector.extract_strided_slice %433 {offsets = [0, 32], sizes = [8, 32], strides = [1, 1]} : vector<8x128xf32> to vector<8x32xf32>
    %437 = vector.extract_strided_slice %434 {offsets = [0, 64], sizes = [8, 32], strides = [1, 1]} : vector<8x128xf32> to vector<8x32xf32>
    %438 = vector.extract_strided_slice %433 {offsets = [0, 96], sizes = [8, 32], strides = [1, 1]} : vector<8x128xf32> to vector<8x32xf32>
    %439 = arith.mulf %436, %422 : vector<8x32xf32>
    %440 = arith.mulf %435, %437 : vector<8x32xf32>
    %441 = arith.addf %439, %440 : vector<8x32xf32>
    %442 = math.tanh %441 : vector<8x32xf32>
    %443 = arith.mulf %438, %442 : vector<8x32xf32>
    %c40_110 = arith.constant 40 : index
    %c0_111 = arith.constant 0 : index
    %444 = vector.load %arg16[%c40_110, %c0_111] : memref<64x32xf32, #tpu.memory_space<vmem>>, vector<8x32xf32>
    tpu.vector_store %arg16[%c40_110, %c0_111], %443 {strides = array<i32>} : memref<64x32xf32, #tpu.memory_space<vmem>>, vector<8x32xf32>,
    %445 = vector.extract_strided_slice %328 {offsets = [48, 0], sizes = [8, 128], strides = [1, 1]} : vector<64x128xf32> to vector<8x128xf32>
    %cst_112 = arith.constant dense<0.000000e+00> : vector<8x128xf32>
    %446 = tpu.matmul %443, %324, %cst_112 {dimension_numbers = #tpu.dot_dimension_numbers<[1], [0], [0], [1], [0, 0, 1, 1], [], []>} : vector<8x32xf32>, vector<32x128xf32>, vector<8x128xf32> -> vector<8x128xf32>
    %447 = arith.addf %445, %446 : vector<8x128xf32>
    %448 = arith.negf %447 : vector<8x128xf32>
    %449 = math.exp %448 : vector<8x128xf32>
    %cst_113 = arith.constant 1.000000e+00 : f32
    %450 = vector.broadcast %cst_113 : f32 to vector<8x128xf32>
    %451 = arith.addf %450, %449 : vector<8x128xf32>
    %452 = arith.divf %450, %451 : vector<8x128xf32>
    %453 = math.tanh %447 : vector<8x128xf32>
    %454 = vector.extract_strided_slice %452 {offsets = [0, 0], sizes = [8, 32], strides = [1, 1]} : vector<8x128xf32> to vector<8x32xf32>
    %455 = vector.extract_strided_slice %452 {offsets = [0, 32], sizes = [8, 32], strides = [1, 1]} : vector<8x128xf32> to vector<8x32xf32>
    %456 = vector.extract_strided_slice %453 {offsets = [0, 64], sizes = [8, 32], strides = [1, 1]} : vector<8x128xf32> to vector<8x32xf32>
    %457 = vector.extract_strided_slice %452 {offsets = [0, 96], sizes = [8, 32], strides = [1, 1]} : vector<8x128xf32> to vector<8x32xf32>
    %458 = arith.mulf %455, %441 : vector<8x32xf32>
    %459 = arith.mulf %454, %456 : vector<8x32xf32>
    %460 = arith.addf %458, %459 : vector<8x32xf32>
    %461 = math.tanh %460 : vector<8x32xf32>
    %462 = arith.mulf %457, %461 : vector<8x32xf32>
    %c48_114 = arith.constant 48 : index
    %c0_115 = arith.constant 0 : index
    %463 = vector.load %arg16[%c48_114, %c0_115] : memref<64x32xf32, #tpu.memory_space<vmem>>, vector<8x32xf32>
    tpu.vector_store %arg16[%c48_114, %c0_115], %462 {strides = array<i32>} : memref<64x32xf32, #tpu.memory_space<vmem>>, vector<8x32xf32>,
    %464 = vector.extract_strided_slice %328 {offsets = [56, 0], sizes = [8, 128], strides = [1, 1]} : vector<64x128xf32> to vector<8x128xf32>
    %cst_116 = arith.constant dense<0.000000e+00> : vector<8x128xf32>
    %465 = tpu.matmul %462, %324, %cst_116 {dimension_numbers = #tpu.dot_dimension_numbers<[1], [0], [0], [1], [0, 0, 1, 1], [], []>} : vector<8x32xf32>, vector<32x128xf32>, vector<8x128xf32> -> vector<8x128xf32>
    %466 = arith.addf %464, %465 : vector<8x128xf32>
    %467 = arith.negf %466 : vector<8x128xf32>
    %468 = math.exp %467 : vector<8x128xf32>
    %cst_117 = arith.constant 1.000000e+00 : f32
    %469 = vector.broadcast %cst_117 : f32 to vector<8x128xf32>
    %470 = arith.addf %469, %468 : vector<8x128xf32>
    %471 = arith.divf %469, %470 : vector<8x128xf32>
    %472 = math.tanh %466 : vector<8x128xf32>
    %473 = vector.extract_strided_slice %471 {offsets = [0, 0], sizes = [8, 32], strides = [1, 1]} : vector<8x128xf32> to vector<8x32xf32>
    %474 = vector.extract_strided_slice %471 {offsets = [0, 32], sizes = [8, 32], strides = [1, 1]} : vector<8x128xf32> to vector<8x32xf32>
    %475 = vector.extract_strided_slice %472 {offsets = [0, 64], sizes = [8, 32], strides = [1, 1]} : vector<8x128xf32> to vector<8x32xf32>
    %476 = vector.extract_strided_slice %471 {offsets = [0, 96], sizes = [8, 32], strides = [1, 1]} : vector<8x128xf32> to vector<8x32xf32>
    %477 = arith.mulf %474, %460 : vector<8x32xf32>
    %478 = arith.mulf %473, %475 : vector<8x32xf32>
    %479 = arith.addf %477, %478 : vector<8x32xf32>
    %480 = math.tanh %479 : vector<8x32xf32>
    %481 = arith.mulf %476, %480 : vector<8x32xf32>
    %c56_118 = arith.constant 56 : index
    %c0_119 = arith.constant 0 : index
    %482 = vector.load %arg16[%c56_118, %c0_119] : memref<64x32xf32, #tpu.memory_space<vmem>>, vector<8x32xf32>
    tpu.vector_store %arg16[%c56_118, %c0_119], %481 {strides = array<i32>} : memref<64x32xf32, #tpu.memory_space<vmem>>, vector<8x32xf32>,
    %c0_120 = arith.constant 0 : index
    %c0_121 = arith.constant 0 : index
    %483 = vector.load %arg16[%c0_120, %c0_121] : memref<64x32xf32, #tpu.memory_space<vmem>>, vector<64x32xf32>
    %c0_122 = arith.constant 0 : index
    %c0_123 = arith.constant 0 : index
    %484 = vector.load %arg10[%c0_122, %c0_123] : memref<32x128xf32, #tpu.memory_space<vmem>>, vector<32x128xf32>
    %c0_124 = arith.constant 0 : index
    %c0_125 = arith.constant 0 : index
    %485 = vector.load %arg11[%c0_124, %c0_125] : memref<32x128xf32, #tpu.memory_space<vmem>>, vector<32x128xf32>
    %c0_126 = arith.constant 0 : index
    %c0_127 = arith.constant 0 : index
    %486 = vector.load %arg12[%c0_126, %c0_127] : memref<1x128xf32, #tpu.memory_space<vmem>>, vector<1x128xf32>
    %cst_128 = arith.constant dense<0.000000e+00> : vector<64x128xf32>
    %487 = tpu.matmul %483, %484, %cst_128 {dimension_numbers = #tpu.dot_dimension_numbers<[1], [0], [0], [1], [0, 0, 1, 1], [], []>} : vector<64x32xf32>, vector<32x128xf32>, vector<64x128xf32> -> vector<64x128xf32>
    %488 = vector.broadcast %486 : vector<1x128xf32> to vector<64x128xf32>
    %489 = arith.addf %487, %488 : vector<64x128xf32>
    %cst_129 = arith.constant 0.000000e+00 : f32
    %490 = vector.broadcast %cst_129 : f32 to vector<8x32xf32>
    %cst_130 = arith.constant 0.000000e+00 : f32
    %491 = vector.broadcast %cst_130 : f32 to vector<8x32xf32>
    %492 = vector.extract_strided_slice %489 {offsets = [0, 0], sizes = [8, 128], strides = [1, 1]} : vector<64x128xf32> to vector<8x128xf32>
    %cst_131 = arith.constant dense<0.000000e+00> : vector<8x128xf32>
    %493 = tpu.matmul %490, %485, %cst_131 {dimension_numbers = #tpu.dot_dimension_numbers<[1], [0], [0], [1], [0, 0, 1, 1], [], []>} : vector<8x32xf32>, vector<32x128xf32>, vector<8x128xf32> -> vector<8x128xf32>
    %494 = arith.addf %492, %493 : vector<8x128xf32>
    %495 = arith.negf %494 : vector<8x128xf32>
    %496 = math.exp %495 : vector<8x128xf32>
    %cst_132 = arith.constant 1.000000e+00 : f32
    %497 = vector.broadcast %cst_132 : f32 to vector<8x128xf32>
    %498 = arith.addf %497, %496 : vector<8x128xf32>
    %499 = arith.divf %497, %498 : vector<8x128xf32>
    %500 = math.tanh %494 : vector<8x128xf32>
    %501 = vector.extract_strided_slice %499 {offsets = [0, 0], sizes = [8, 32], strides = [1, 1]} : vector<8x128xf32> to vector<8x32xf32>
    %502 = vector.extract_strided_slice %499 {offsets = [0, 32], sizes = [8, 32], strides = [1, 1]} : vector<8x128xf32> to vector<8x32xf32>
    %503 = vector.extract_strided_slice %500 {offsets = [0, 64], sizes = [8, 32], strides = [1, 1]} : vector<8x128xf32> to vector<8x32xf32>
    %504 = vector.extract_strided_slice %499 {offsets = [0, 96], sizes = [8, 32], strides = [1, 1]} : vector<8x128xf32> to vector<8x32xf32>
    %505 = arith.mulf %502, %491 : vector<8x32xf32>
    %506 = arith.mulf %501, %503 : vector<8x32xf32>
    %507 = arith.addf %505, %506 : vector<8x32xf32>
    %508 = math.tanh %507 : vector<8x32xf32>
    %509 = arith.mulf %504, %508 : vector<8x32xf32>
    %510 = vector.extract_strided_slice %489 {offsets = [8, 0], sizes = [8, 128], strides = [1, 1]} : vector<64x128xf32> to vector<8x128xf32>
    %cst_133 = arith.constant dense<0.000000e+00> : vector<8x128xf32>
    %511 = tpu.matmul %509, %485, %cst_133 {dimension_numbers = #tpu.dot_dimension_numbers<[1], [0], [0], [1], [0, 0, 1, 1], [], []>} : vector<8x32xf32>, vector<32x128xf32>, vector<8x128xf32> -> vector<8x128xf32>
    %512 = arith.addf %510, %511 : vector<8x128xf32>
    %513 = arith.negf %512 : vector<8x128xf32>
    %514 = math.exp %513 : vector<8x128xf32>
    %cst_134 = arith.constant 1.000000e+00 : f32
    %515 = vector.broadcast %cst_134 : f32 to vector<8x128xf32>
    %516 = arith.addf %515, %514 : vector<8x128xf32>
    %517 = arith.divf %515, %516 : vector<8x128xf32>
    %518 = math.tanh %512 : vector<8x128xf32>
    %519 = vector.extract_strided_slice %517 {offsets = [0, 0], sizes = [8, 32], strides = [1, 1]} : vector<8x128xf32> to vector<8x32xf32>
    %520 = vector.extract_strided_slice %517 {offsets = [0, 32], sizes = [8, 32], strides = [1, 1]} : vector<8x128xf32> to vector<8x32xf32>
    %521 = vector.extract_strided_slice %518 {offsets = [0, 64], sizes = [8, 32], strides = [1, 1]} : vector<8x128xf32> to vector<8x32xf32>
    %522 = vector.extract_strided_slice %517 {offsets = [0, 96], sizes = [8, 32], strides = [1, 1]} : vector<8x128xf32> to vector<8x32xf32>
    %523 = arith.mulf %520, %507 : vector<8x32xf32>
    %524 = arith.mulf %519, %521 : vector<8x32xf32>
    %525 = arith.addf %523, %524 : vector<8x32xf32>
    %526 = math.tanh %525 : vector<8x32xf32>
    %527 = arith.mulf %522, %526 : vector<8x32xf32>
    %528 = vector.extract_strided_slice %489 {offsets = [16, 0], sizes = [8, 128], strides = [1, 1]} : vector<64x128xf32> to vector<8x128xf32>
    %cst_135 = arith.constant dense<0.000000e+00> : vector<8x128xf32>
    %529 = tpu.matmul %527, %485, %cst_135 {dimension_numbers = #tpu.dot_dimension_numbers<[1], [0], [0], [1], [0, 0, 1, 1], [], []>} : vector<8x32xf32>, vector<32x128xf32>, vector<8x128xf32> -> vector<8x128xf32>
    %530 = arith.addf %528, %529 : vector<8x128xf32>
    %531 = arith.negf %530 : vector<8x128xf32>
    %532 = math.exp %531 : vector<8x128xf32>
    %cst_136 = arith.constant 1.000000e+00 : f32
    %533 = vector.broadcast %cst_136 : f32 to vector<8x128xf32>
    %534 = arith.addf %533, %532 : vector<8x128xf32>
    %535 = arith.divf %533, %534 : vector<8x128xf32>
    %536 = math.tanh %530 : vector<8x128xf32>
    %537 = vector.extract_strided_slice %535 {offsets = [0, 0], sizes = [8, 32], strides = [1, 1]} : vector<8x128xf32> to vector<8x32xf32>
    %538 = vector.extract_strided_slice %535 {offsets = [0, 32], sizes = [8, 32], strides = [1, 1]} : vector<8x128xf32> to vector<8x32xf32>
    %539 = vector.extract_strided_slice %536 {offsets = [0, 64], sizes = [8, 32], strides = [1, 1]} : vector<8x128xf32> to vector<8x32xf32>
    %540 = vector.extract_strided_slice %535 {offsets = [0, 96], sizes = [8, 32], strides = [1, 1]} : vector<8x128xf32> to vector<8x32xf32>
    %541 = arith.mulf %538, %525 : vector<8x32xf32>
    %542 = arith.mulf %537, %539 : vector<8x32xf32>
    %543 = arith.addf %541, %542 : vector<8x32xf32>
    %544 = math.tanh %543 : vector<8x32xf32>
    %545 = arith.mulf %540, %544 : vector<8x32xf32>
    %546 = vector.extract_strided_slice %489 {offsets = [24, 0], sizes = [8, 128], strides = [1, 1]} : vector<64x128xf32> to vector<8x128xf32>
    %cst_137 = arith.constant dense<0.000000e+00> : vector<8x128xf32>
    %547 = tpu.matmul %545, %485, %cst_137 {dimension_numbers = #tpu.dot_dimension_numbers<[1], [0], [0], [1], [0, 0, 1, 1], [], []>} : vector<8x32xf32>, vector<32x128xf32>, vector<8x128xf32> -> vector<8x128xf32>
    %548 = arith.addf %546, %547 : vector<8x128xf32>
    %549 = arith.negf %548 : vector<8x128xf32>
    %550 = math.exp %549 : vector<8x128xf32>
    %cst_138 = arith.constant 1.000000e+00 : f32
    %551 = vector.broadcast %cst_138 : f32 to vector<8x128xf32>
    %552 = arith.addf %551, %550 : vector<8x128xf32>
    %553 = arith.divf %551, %552 : vector<8x128xf32>
    %554 = math.tanh %548 : vector<8x128xf32>
    %555 = vector.extract_strided_slice %553 {offsets = [0, 0], sizes = [8, 32], strides = [1, 1]} : vector<8x128xf32> to vector<8x32xf32>
    %556 = vector.extract_strided_slice %553 {offsets = [0, 32], sizes = [8, 32], strides = [1, 1]} : vector<8x128xf32> to vector<8x32xf32>
    %557 = vector.extract_strided_slice %554 {offsets = [0, 64], sizes = [8, 32], strides = [1, 1]} : vector<8x128xf32> to vector<8x32xf32>
    %558 = vector.extract_strided_slice %553 {offsets = [0, 96], sizes = [8, 32], strides = [1, 1]} : vector<8x128xf32> to vector<8x32xf32>
    %559 = arith.mulf %556, %543 : vector<8x32xf32>
    %560 = arith.mulf %555, %557 : vector<8x32xf32>
    %561 = arith.addf %559, %560 : vector<8x32xf32>
    %562 = math.tanh %561 : vector<8x32xf32>
    %563 = arith.mulf %558, %562 : vector<8x32xf32>
    %564 = vector.extract_strided_slice %489 {offsets = [32, 0], sizes = [8, 128], strides = [1, 1]} : vector<64x128xf32> to vector<8x128xf32>
    %cst_139 = arith.constant dense<0.000000e+00> : vector<8x128xf32>
    %565 = tpu.matmul %563, %485, %cst_139 {dimension_numbers = #tpu.dot_dimension_numbers<[1], [0], [0], [1], [0, 0, 1, 1], [], []>} : vector<8x32xf32>, vector<32x128xf32>, vector<8x128xf32> -> vector<8x128xf32>
    %566 = arith.addf %564, %565 : vector<8x128xf32>
    %567 = arith.negf %566 : vector<8x128xf32>
    %568 = math.exp %567 : vector<8x128xf32>
    %cst_140 = arith.constant 1.000000e+00 : f32
    %569 = vector.broadcast %cst_140 : f32 to vector<8x128xf32>
    %570 = arith.addf %569, %568 : vector<8x128xf32>
    %571 = arith.divf %569, %570 : vector<8x128xf32>
    %572 = math.tanh %566 : vector<8x128xf32>
    %573 = vector.extract_strided_slice %571 {offsets = [0, 0], sizes = [8, 32], strides = [1, 1]} : vector<8x128xf32> to vector<8x32xf32>
    %574 = vector.extract_strided_slice %571 {offsets = [0, 32], sizes = [8, 32], strides = [1, 1]} : vector<8x128xf32> to vector<8x32xf32>
    %575 = vector.extract_strided_slice %572 {offsets = [0, 64], sizes = [8, 32], strides = [1, 1]} : vector<8x128xf32> to vector<8x32xf32>
    %576 = vector.extract_strided_slice %571 {offsets = [0, 96], sizes = [8, 32], strides = [1, 1]} : vector<8x128xf32> to vector<8x32xf32>
    %577 = arith.mulf %574, %561 : vector<8x32xf32>
    %578 = arith.mulf %573, %575 : vector<8x32xf32>
    %579 = arith.addf %577, %578 : vector<8x32xf32>
    %580 = math.tanh %579 : vector<8x32xf32>
    %581 = arith.mulf %576, %580 : vector<8x32xf32>
    %582 = vector.extract_strided_slice %489 {offsets = [40, 0], sizes = [8, 128], strides = [1, 1]} : vector<64x128xf32> to vector<8x128xf32>
    %cst_141 = arith.constant dense<0.000000e+00> : vector<8x128xf32>
    %583 = tpu.matmul %581, %485, %cst_141 {dimension_numbers = #tpu.dot_dimension_numbers<[1], [0], [0], [1], [0, 0, 1, 1], [], []>} : vector<8x32xf32>, vector<32x128xf32>, vector<8x128xf32> -> vector<8x128xf32>
    %584 = arith.addf %582, %583 : vector<8x128xf32>
    %585 = arith.negf %584 : vector<8x128xf32>
    %586 = math.exp %585 : vector<8x128xf32>
    %cst_142 = arith.constant 1.000000e+00 : f32
    %587 = vector.broadcast %cst_142 : f32 to vector<8x128xf32>
    %588 = arith.addf %587, %586 : vector<8x128xf32>
    %589 = arith.divf %587, %588 : vector<8x128xf32>
    %590 = math.tanh %584 : vector<8x128xf32>
    %591 = vector.extract_strided_slice %589 {offsets = [0, 0], sizes = [8, 32], strides = [1, 1]} : vector<8x128xf32> to vector<8x32xf32>
    %592 = vector.extract_strided_slice %589 {offsets = [0, 32], sizes = [8, 32], strides = [1, 1]} : vector<8x128xf32> to vector<8x32xf32>
    %593 = vector.extract_strided_slice %590 {offsets = [0, 64], sizes = [8, 32], strides = [1, 1]} : vector<8x128xf32> to vector<8x32xf32>
    %594 = vector.extract_strided_slice %589 {offsets = [0, 96], sizes = [8, 32], strides = [1, 1]} : vector<8x128xf32> to vector<8x32xf32>
    %595 = arith.mulf %592, %579 : vector<8x32xf32>
    %596 = arith.mulf %591, %593 : vector<8x32xf32>
    %597 = arith.addf %595, %596 : vector<8x32xf32>
    %598 = math.tanh %597 : vector<8x32xf32>
    %599 = arith.mulf %594, %598 : vector<8x32xf32>
    %600 = vector.extract_strided_slice %489 {offsets = [48, 0], sizes = [8, 128], strides = [1, 1]} : vector<64x128xf32> to vector<8x128xf32>
    %cst_143 = arith.constant dense<0.000000e+00> : vector<8x128xf32>
    %601 = tpu.matmul %599, %485, %cst_143 {dimension_numbers = #tpu.dot_dimension_numbers<[1], [0], [0], [1], [0, 0, 1, 1], [], []>} : vector<8x32xf32>, vector<32x128xf32>, vector<8x128xf32> -> vector<8x128xf32>
    %602 = arith.addf %600, %601 : vector<8x128xf32>
    %603 = arith.negf %602 : vector<8x128xf32>
    %604 = math.exp %603 : vector<8x128xf32>
    %cst_144 = arith.constant 1.000000e+00 : f32
    %605 = vector.broadcast %cst_144 : f32 to vector<8x128xf32>
    %606 = arith.addf %605, %604 : vector<8x128xf32>
    %607 = arith.divf %605, %606 : vector<8x128xf32>
    %608 = math.tanh %602 : vector<8x128xf32>
    %609 = vector.extract_strided_slice %607 {offsets = [0, 0], sizes = [8, 32], strides = [1, 1]} : vector<8x128xf32> to vector<8x32xf32>
    %610 = vector.extract_strided_slice %607 {offsets = [0, 32], sizes = [8, 32], strides = [1, 1]} : vector<8x128xf32> to vector<8x32xf32>
    %611 = vector.extract_strided_slice %608 {offsets = [0, 64], sizes = [8, 32], strides = [1, 1]} : vector<8x128xf32> to vector<8x32xf32>
    %612 = vector.extract_strided_slice %607 {offsets = [0, 96], sizes = [8, 32], strides = [1, 1]} : vector<8x128xf32> to vector<8x32xf32>
    %613 = arith.mulf %610, %597 : vector<8x32xf32>
    %614 = arith.mulf %609, %611 : vector<8x32xf32>
    %615 = arith.addf %613, %614 : vector<8x32xf32>
    %616 = math.tanh %615 : vector<8x32xf32>
    %617 = arith.mulf %612, %616 : vector<8x32xf32>
    %618 = vector.extract_strided_slice %489 {offsets = [56, 0], sizes = [8, 128], strides = [1, 1]} : vector<64x128xf32> to vector<8x128xf32>
    %cst_145 = arith.constant dense<0.000000e+00> : vector<8x128xf32>
    %619 = tpu.matmul %617, %485, %cst_145 {dimension_numbers = #tpu.dot_dimension_numbers<[1], [0], [0], [1], [0, 0, 1, 1], [], []>} : vector<8x32xf32>, vector<32x128xf32>, vector<8x128xf32> -> vector<8x128xf32>
    %620 = arith.addf %618, %619 : vector<8x128xf32>
    %621 = arith.negf %620 : vector<8x128xf32>
    %622 = math.exp %621 : vector<8x128xf32>
    %cst_146 = arith.constant 1.000000e+00 : f32
    %623 = vector.broadcast %cst_146 : f32 to vector<8x128xf32>
    %624 = arith.addf %623, %622 : vector<8x128xf32>
    %625 = arith.divf %623, %624 : vector<8x128xf32>
    %626 = math.tanh %620 : vector<8x128xf32>
    %627 = vector.extract_strided_slice %625 {offsets = [0, 0], sizes = [8, 32], strides = [1, 1]} : vector<8x128xf32> to vector<8x32xf32>
    %628 = vector.extract_strided_slice %625 {offsets = [0, 32], sizes = [8, 32], strides = [1, 1]} : vector<8x128xf32> to vector<8x32xf32>
    %629 = vector.extract_strided_slice %626 {offsets = [0, 64], sizes = [8, 32], strides = [1, 1]} : vector<8x128xf32> to vector<8x32xf32>
    %630 = vector.extract_strided_slice %625 {offsets = [0, 96], sizes = [8, 32], strides = [1, 1]} : vector<8x128xf32> to vector<8x32xf32>
    %631 = arith.mulf %628, %615 : vector<8x32xf32>
    %632 = arith.mulf %627, %629 : vector<8x32xf32>
    %633 = arith.addf %631, %632 : vector<8x32xf32>
    %634 = math.tanh %633 : vector<8x32xf32>
    %635 = arith.mulf %630, %634 : vector<8x32xf32>
    %c0_147 = arith.constant 0 : index
    %c0_148 = arith.constant 0 : index
    %636 = vector.load %arg13[%c0_147, %c0_148] : memref<32x2xf32, #tpu.memory_space<vmem>>, vector<32x2xf32>
    %cst_149 = arith.constant dense<0.000000e+00> : vector<8x2xf32>
    %637 = tpu.matmul %635, %636, %cst_149 {dimension_numbers = #tpu.dot_dimension_numbers<[1], [0], [0], [1], [0, 0, 1, 1], [], []>} : vector<8x32xf32>, vector<32x2xf32>, vector<8x2xf32> -> vector<8x2xf32>
    %c0_150 = arith.constant 0 : index
    %c0_151 = arith.constant 0 : index
    %638 = vector.load %arg14[%c0_150, %c0_151] : memref<1x2xf32, #tpu.memory_space<vmem>>, vector<1x2xf32>
    %639 = vector.broadcast %638 : vector<1x2xf32> to vector<8x2xf32>
    %640 = arith.addf %637, %639 : vector<8x2xf32>
    %c0_152 = arith.constant 0 : index
    %c0_153 = arith.constant 0 : index
    %641 = vector.load %arg15[%c0_152, %c0_153] : memref<8x2xf32, #tpu.memory_space<vmem>>, vector<8x2xf32>
    tpu.vector_store %arg15[%c0_152, %c0_153], %640 {strides = array<i32>} : memref<8x2xf32, #tpu.memory_space<vmem>>, vector<8x2xf32>,
    return
  }
}

</mosaic_0001>

<bundles_post_ra>
// kernel: lstm_classifier_forward.1
= control target key start
LH: loop header
LB: loop body
LE: loop exit
PB: predicated region body
PF: predicated region fallthrough
CT: control target
= control target key end

     0   :  { %20 = vsyncpa [#allocation4], 0  ;;  %s3703_s0 = inlined_call_operand.vmem [shape: f32[64,16], index: 0, kind: input, shape index: {}]   ;;  %s3704_s1 = inlined_call_operand.vmem [shape: f32[16,128], index: 1, kind: input, shape index: {}]   ;;  %s3705_s2 = inlined_call_operand.vmem [shape: f32[32,128], index: 2, kind: input, shape index: {}]   ;;  %s3706_s3 = inlined_call_operand.vmem [shape: f32[1,128], index: 3, kind: input, shape index: {}]   ;;  %s3707_s4 = inlined_call_operand.vmem [shape: f32[32,128], index: 4, kind: input, shape index: {}]   ;;  %s3708_s5 = inlined_call_operand.vmem [shape: f32[32,128], index: 5, kind: input, shape index: {}]   ;;  %s3709_s6 = inlined_call_operand.vmem [shape: f32[1,128], index: 6, kind: input, shape index: {}]   ;;  %s3710_s7 = inlined_call_operand.vmem [shape: f32[32,128], index: 7, kind: input, shape index: {}]   ;;  %s3711_s8 = inlined_call_operand.hbm [shape: f32[32,128], index: 8, kind: input, shape index: {}]   ;;  %s3712_s9 = inlined_call_operand.vmem [shape: f32[1,128], index: 9, kind: input, shape index: {}]   ;;  %s3713_s10 = inlined_call_operand.hbm [shape: f32[32,128], index: 10, kind: input, shape index: {}]   ;;  %s3714_s11 = inlined_call_operand.hbm [shape: f32[32,128], index: 11, kind: input, shape index: {}]   ;;  %s3715_s12 = inlined_call_operand.hbm [shape: f32[1,128], index: 12, kind: input, shape index: {}]   ;;  %s3716_s13 = inlined_call_operand.vmem [shape: f32[32,2], index: 13, kind: input, shape index: {}]   ;;  %s3717_s14 = inlined_call_operand.vmem [shape: f32[1,2], index: 14, kind: input, shape index: {}]   ;;  %s3718_s15 = inlined_call_operand.vmem [shape: f32[8,2], index: 15, kind: output, shape index: {}]  }
   0x1   :  { %21 = vsyncpa [#allocation6], 0 }
   0x2   :  { %22 = vsyncpa [#allocation9], 0  ;;  %s58_s20 = sshll.u32 %s3713_s10, 4  ;;  %s3019_s21 = smov [#allocation5]   ;;  %s59_s20 = int_to_ptr.hbm [resolvable:$true] %s58_s20 }
   0x3   :  { %s60_s22 = sshll.u32 %s3019_s21, 4  ;;  %s43_s25 = sshll.u32 %s3711_s8, 4  ;;  %s61_s22 = int_to_ptr.vmem [resolvable:$true] %s60_s22  ;;  %s44_s25 = int_to_ptr.hbm [resolvable:$true] %s43_s25 }
   0x4   :  { %s3020_s26 = smov 128   ;;  %s3021_s27 = smov 8  }
   0x5   :  { %66 = dma.hbm_to_vmem [thread:$0]  %s59_s20, 512, %s61_s22, [#allocation6], %s3020_s26, %s3020_s26, %s3021_s27  }
   0x6   :  { %s3022_s28 = smov [#allocation3]   ;;  %s71_s17 = sshll.u32 %s3714_s11, 4  ;;  %s72_s17 = int_to_ptr.hbm [resolvable:$true] %s71_s17 }
   0x7   :  { %s45_s29 = sshll.u32 %s3022_s28, 4  ;;  %s85_s19 = sshll.u32 %s3715_s12, 4  ;;  %s46_s29 = int_to_ptr.vmem [resolvable:$true] %s45_s29  ;;  %s86_s19 = int_to_ptr.hbm [resolvable:$true] %s85_s19 }
   0x8   :  { %51 = dma.hbm_to_vmem [thread:$0]  %s44_s25, 512, %s46_s29, [#allocation4], %s3020_s26, %s3020_s26, %s3021_s27  }
   0x9   :  { %s3023_s21 = smov [#allocation7]   ;;  %s3024_s8 = smov [#allocation8]  }
   0xa   :  { %s73_s23 = sshll.u32 %s3023_s21, 4  ;;  %s87_s20 = sshll.u32 %s3024_s8, 4  ;;  %s74_s23 = int_to_ptr.vmem [resolvable:$true] %s73_s23  ;;  %s88_s20 = int_to_ptr.vmem [resolvable:$true] %s87_s20 }
   0xb   :  { %79 = dma.hbm_to_vmem [thread:$0]  %s72_s17, 512, %s74_s23, [#allocation6], %s3020_s26, %s3020_s26, %s3021_s27  }
   0xc   :  { %90 = dma.hbm_to_vmem [thread:$0]  %s86_s19, 16, %s88_s20, [#allocation9]  }
   0xd   :  { %3013 = dma.done.wait [#allocation4], 512  }
   0xe   :  { %3014 = vsyncadd [#allocation4], 4294966784 }
   0xf   :  { %3015 = dma.done.wait [#allocation6], 1024  }
  0x10   :  { %3016 = vsyncadd [#allocation6], 4294966272 }
  0x11   :  { %3017 = dma.done.wait [#allocation9], 16  }
  0x12   :  { %3018 = vsyncadd [#allocation9], 4294967280  ;;  %v3123_v0 = vld [vmem:[%s3705_s2 + $0x18] sm:$0xff]  ;;  %v120_v1 = vld [vmem:[%s3704_s1 + $0x8] sm:$0xff]  ;;  %vm129_vm0 = vcmask 130048   ;;  %v3025_v7 = vmov 0.0  }
  0x13   :  { %v3131_v2 = vld [vmem:[%s3705_s2 + $0x10] sm:$0xff]  ;;  %211 = vmatpush.msra.mxu1 %v3123_v0  ;;  %168 = vmatpush.msra.mxu0 %v120_v1  ;;  %v119_v3 = vld [vmem:[%s3704_s1] sm:$0xff]  ;;  %v3143_v5 = vld [vmem:[%s3705_s2 + $0x8] sm:$0xff]  ;;  %s3026_s19 = smov 64   ;;  %s3027_s21 = smov 32   ;;  %vm195_vm5 = vcmask 261120  }
  0x14   :  { %v111_v4 = vld [vmem:[%s3703_s0] sm:$0xff]  ;;  %2642 = vmatpush.msra.mxu2 %v120_v1  ;;  %341 = vmatpush.msra.mxu3 %v3123_v0  ;;  %v117_v33 = vld [vmem:[%s3703_s0 + $0x30] sm:$0xff]  ;;  %v118_v34 = vld [vmem:[%s3703_s0 + $0x38] sm:$0xff] }
  0x15   :  { %212 = vmatpush.msra.mxu1 %v3131_v2  ;;  %169 = vmatpush.msra.mxu0 %v119_v3  ;;  %v3151_v6 = vld [vmem:[%s3705_s2] sm:$0xff]  ;;  %v112_v37 = vld [vmem:[%s3703_s0 + $0x8] sm:$0xff] }
  0x16   :  { %2549 = vmatmul.msk.f32.vlgmr.msra.gmra.mxu0 %vm129_vm0, %v111_v4  ;;  %2643 = vmatpush.msra.mxu2 %v119_v3  ;;  %v3178_v8 = vld [vmem:[%s3706_s3] ss:$0 sm:$0xff]  ;;  %v113_v3 = vld [vmem:[%s3703_s0 + $0x10] sm:$0xff] }
  0x17   :  { %213 = vmatpush.msra.mxu1 %v3143_v5  ;;  %342 = vmatpush.msra.mxu3 %v3131_v2 }
  0x18   :  { %276 = vmatpush.msrb.mxu2 %v3123_v0 }
  0x19   :  { %214 = vmatpush.msra.mxu1 %v3151_v6  ;;  %343 = vmatpush.msra.mxu3 %v3143_v5 }
  0x1a   :  { %277 = vmatpush.msrb.mxu2 %v3131_v2  ;;  %215 = vmatmul.f32.vlgmr.msra.gmra.mxu1 %v3025_v7 }
  0x1b   :  { %406 = vmatpush.msrb.mxu1 %v3123_v0  ;;  %344 = vmatpush.msra.mxu3 %v3151_v6 }
  0x1c   :  { %278 = vmatpush.msrb.mxu2 %v3143_v5 }
  0x1d   :  { %407 = vmatpush.msrb.mxu1 %v3131_v2  ;;  %536 = vmatpush.msrb.mxu3 %v3123_v0 }
  0x1e   :  { %279 = vmatpush.msrb.mxu2 %v3151_v6  ;;  %2550 = vmatmul.msk.f32.gmra.mxu0 %vm129_vm0, %v112_v37 }
  0x1f   :  { %408 = vmatpush.msrb.mxu1 %v3143_v5  ;;  %537 = vmatpush.msrb.mxu3 %v3131_v2 }
  0x20   :  { %2555 = vmatmul.msk.f32.vlgmr.msra.gmra.mxu2 %vm129_vm0, %v117_v33 }
  0x21   :  { %409 = vmatpush.msrb.mxu1 %v3151_v6  ;;  %538 = vmatpush.msrb.mxu3 %v3143_v5 }
  0x22   :  { %471 = vmatpush.msra.mxu2 %v3123_v0 }
  0x23   :  { %601 = vmatpush.msra.mxu1 %v3123_v0  ;;  %539 = vmatpush.msrb.mxu3 %v3151_v6 }
  0x24   :  { %472 = vmatpush.msra.mxu2 %v3131_v2 }
  0x25   :  { %602 = vmatpush.msra.mxu1 %v3131_v2 }
  0x26   :  { %473 = vmatpush.msra.mxu2 %v3143_v5  ;;  %2551 = vmatmul.msk.f32.gmra.mxu0 %vm129_vm0, %v113_v3 }
  0x27   :  { %603 = vmatpush.msra.mxu1 %v3143_v5 }
  0x28   :  { %474 = vmatpush.msra.mxu2 %v3151_v6 }
  0x29   :  { %604 = vmatpush.msra.mxu1 %v3151_v6  ;;  %2556 = vmatmul.msk.f32.gmra.mxu2 %vm129_vm0, %v118_v34 }
  0x93   :  { %v171_v9 = vpop.f32.mrf.mxu0 }
  0x94   :  { %v172_v10 = vadd.f32 %v3178_v8, %v171_v9 }
  0x97   :  { %v216_v11 = vpop.f32.mrf.mxu1 }
  0x98   :  { %v219_v12 = vadd.f32 %v216_v11, %v172_v10 }
  0x9a   :  { %2658 = vtanh.f32 %v219_v12  ;;  %v2557_v14 = vmul.f32 -1.442695, %v219_v12 }
  0x9b   :  { %v174_v41 = vpop.f32.mrf.mxu0 }
  0x9c   :  { %2660 = vpow2.f32 %v2557_v14  ;;  %v175_v42 = vadd.f32 %v3178_v8, %v174_v41 }
  0xa0   :  { %v2659_v13 = vpop.eup %2658 }
  0xa1   :  { %242 = vrot.lane.b32.xlu0 %v2659_v13, %s3026_s19 }
  0xa2   :  { %v2661_v15 = vpop.eup %2660 }
  0xa3   :  { %v223_v16 = vadd.f32 1.0, %v2661_v15  ;;  %v3207_v39 = vpop.f32.mrf.mxu2 }
  0xa5   :  { %2662 = vrcp.f32 %v223_v16  ;;  %v235_v22 = vand.u32 2147483648, %v223_v16  ;;  %vm229_vm2 = vweird.f32 %v223_v16  ;;  %v233_v23 = vand.u32 2147483647, %v223_v16 }
  0xa7   :  { %v236_v25 = vor.u32 1.1754944e-38, %v235_v22  ;;  %vm234_vm4 = vcmp.eq.f32.partialorder %v233_v23, 8.507059e+37 }
  0xab   :  { %v2663_v17 = vpop.eup %2662 }
  0xac   :  { %v225_v18 = vmul.f32 %v2663_v17, %v223_v16  ;;  %vm230_vm1 = vweird.f32 %v2663_v17  ;;  %v3209_v40 = vpop.f32.mrf.mxu2 }
  0xad   :  { %vm231_vm3 = vmor %vm229_vm2, %vm230_vm1 }
  0xae   :  { %v226_v19 = vsub.f32 1.0, %v225_v18 }
  0xb0   :  { %v227_v20 = vmul.f32 %v2663_v17, %v226_v19 }
  0xb2   :  { %v228_v21 = vadd.f32 %v2663_v17, %v227_v20 }
  0xb4   :  { %v232_v24 = vsel %vm231_vm3, %v2663_v17, %v228_v21 }
  0xb5   :  { %v237_v27 = vsel %vm234_vm4, %v236_v25, %v232_v24 }
  0xb6   :  { %v240_v29 = vmul.f32 0.0, %v237_v27 }
 0x113   :  { %v243_v26 = vpop.permute.xlu0 %242 }
 0x114   :  { %v245_v28 = vmul.f32 %v243_v26, %v237_v27 }
 0x116   :  { %247 = vrot.lane.b32.xlu0 %v245_v28, %s3027_s21 }
 0x188   :  { %v248_v30 = vpop.permute.xlu0 %247 }
 0x189   :  { %v250_v31 = vadd.f32 %v248_v30, %v240_v29 }
 0x18b   :  { %2664 = vtanh.f32 %v250_v31 }
 0x191   :  { %v2665_v32 = vpop.eup %2664 }
 0x192   :  { %253 = vrot.lane.b32.xlu1 %v2665_v32, %s3026_s19 }
 0x204   :  { %v254_v35 = vpop.permute.xlu1 %253 }
 0x205   :  { %v256_v36 = vmul.f32 %v254_v35, %v237_v27 }
 0x207   :  { %258 = vrot.lane.b32.xlu1 %v256_v36, %s3027_s21 }
 0x279   :  { %v259_v38 = vpop.permute.xlu1 %258 }
 0x27a   :  { %261 = vst.msk [vmem:[#allocation2] sm:$0xff] %vm195_vm5, %v259_v38  ;;  %2558 = vmatmul.msk.f32.vlgmr.msrb.gmra.mxu2 %vm195_vm5, %v259_v38 }
 0x27b   :  { %666 = vmatpush.msrb.mxu2 %v3123_v0 }
 0x27d   :  { %667 = vmatpush.msrb.mxu2 %v3131_v2 }
 0x27f   :  { %668 = vmatpush.msrb.mxu2 %v3143_v5  ;;  %v177_v5 = vpop.f32.mrf.mxu0 }
 0x281   :  { %669 = vmatpush.msrb.mxu2 %v3151_v6  ;;  %v178_v6 = vadd.f32 %v3178_v8, %v177_v5 }
 0x2fd   :  { %v281_v43 = vpop.f32.mrf.mxu2 }
 0x2fe   :  { %v284_v44 = vadd.f32 %v281_v43, %v175_v42 }
 0x300   :  { %2666 = vtanh.f32 %v284_v44  ;;  %v2559_v46 = vmul.f32 -1.442695, %v284_v44 }
 0x302   :  { %2668 = vpow2.f32 %v2559_v46 }
 0x306   :  { %v2667_v45 = vpop.eup %2666 }
 0x307   :  { %307 = vrot.lane.b32.xlu2 %v2667_v45, %s3026_s19 }
 0x308   :  { %v2669_v47 = vpop.eup %2668 }
 0x309   :  { %v288_v48 = vadd.f32 1.0, %v2669_v47 }
 0x30b   :  { %2670 = vrcp.f32 %v288_v48  ;;  %v300_v54 = vand.u32 2147483648, %v288_v48  ;;  %vm294_vm7 = vweird.f32 %v288_v48  ;;  %v298_v55 = vand.u32 2147483647, %v288_v48 }
 0x30d   :  { %v301_v57 = vor.u32 1.1754944e-38, %v300_v54  ;;  %vm299_vm9 = vcmp.eq.f32.partialorder %v298_v55, 8.507059e+37 }
 0x311   :  { %v2671_v49 = vpop.eup %2670 }
 0x312   :  { %v290_v50 = vmul.f32 %v2671_v49, %v288_v48  ;;  %vm295_vm6 = vweird.f32 %v2671_v49 }
 0x313   :  { %vm296_vm8 = vmor %vm294_vm7, %vm295_vm6 }
 0x314   :  { %v291_v51 = vsub.f32 1.0, %v290_v50 }
 0x316   :  { %v292_v52 = vmul.f32 %v2671_v49, %v291_v51 }
 0x318   :  { %v293_v53 = vadd.f32 %v2671_v49, %v292_v52 }
 0x31a   :  { %v297_v56 = vsel %vm296_vm8, %v2671_v49, %v293_v53 }
 0x31b   :  { %v302_v59 = vsel %vm299_vm9, %v301_v57, %v297_v56 }
 0x31c   :  { %v305_v61 = vmul.f32 %v302_v59, %v250_v31  ;;  %v114_v31 = vld [vmem:[%s3703_s0 + $0x18] sm:$0xff] }
 0x31d   :  { %2552 = vmatmul.msk.f32.gmra.mxu0 %vm129_vm0, %v114_v31  ;;  %v116_v31 = vld [vmem:[%s3703_s0 + $0x28] sm:$0xff] }
 0x361   :  { %v308_v58 = vpop.permute.xlu2 %307 }
 0x362   :  { %v310_v60 = vmul.f32 %v308_v58, %v302_v59 }
 0x364   :  { %312 = vrot.lane.b32.xlu2 %v310_v60, %s3027_s21 }
 0x39a   :  { %v180_v35 = vpop.f32.mrf.mxu0 }
 0x39b   :  { %v181_v36 = vadd.f32 %v3178_v8, %v180_v35  ;;  %v717_v35 = vld [vmem:[#allocation2] sm:$0xff] }
 0x3be   :  { %v313_v62 = vpop.permute.xlu2 %312 }
 0x3bf   :  { %v315_v63 = vadd.f32 %v313_v62, %v305_v61 }
 0x3c1   :  { %2672 = vtanh.f32 %v315_v63 }
 0x3c7   :  { %v2673_v0 = vpop.eup %2672 }
 0x3c8   :  { %318 = vrot.lane.b32.xlu0 %v2673_v0, %s3026_s19 }
 0x43a   :  { %v319_v1 = vpop.permute.xlu0 %318 }
 0x43b   :  { %v321_v2 = vmul.f32 %v319_v1, %v302_v59 }
 0x43d   :  { %323 = vrot.lane.b32.xlu1 %v321_v2, %s3027_s21 }
 0x4af   :  { %v324_v4 = vpop.permute.xlu1 %323 }
 0x4b0   :  { %326 = vst.msk [vmem:[#allocation2 + $0x8] sm:$0xff] %vm195_vm5, %v324_v4  ;;  %2560 = vmatmul.msk.f32.vlgmr.msra.gmra.mxu3 %vm195_vm5, %v324_v4 }
 0x533   :  { %v346_v9 = vpop.f32.mrf.mxu3 }
 0x534   :  { %v349_v10 = vadd.f32 %v346_v9, %v178_v6 }
 0x536   :  { %2674 = vtanh.f32 %v349_v10  ;;  %v2561_v12 = vmul.f32 -1.442695, %v349_v10 }
 0x538   :  { %2676 = vpow2.f32 %v2561_v12 }
 0x53c   :  { %v2675_v11 = vpop.eup %2674 }
 0x53d   :  { %372 = vrot.lane.b32.xlu2 %v2675_v11, %s3026_s19 }
 0x53e   :  { %v2677_v13 = vpop.eup %2676 }
 0x53f   :  { %v353_v14 = vadd.f32 1.0, %v2677_v13 }
 0x541   :  { %2678 = vrcp.f32 %v353_v14  ;;  %v365_v20 = vand.u32 2147483648, %v353_v14  ;;  %vm359_vm11 = vweird.f32 %v353_v14  ;;  %v363_v21 = vand.u32 2147483647, %v353_v14 }
 0x543   :  { %v366_v23 = vor.u32 1.1754944e-38, %v365_v20  ;;  %vm364_vm13 = vcmp.eq.f32.partialorder %v363_v21, 8.507059e+37 }
 0x547   :  { %v2679_v15 = vpop.eup %2678 }
 0x548   :  { %v355_v16 = vmul.f32 %v2679_v15, %v353_v14  ;;  %vm360_vm10 = vweird.f32 %v2679_v15 }
 0x549   :  { %vm361_vm12 = vmor %vm359_vm11, %vm360_vm10 }
 0x54a   :  { %v356_v17 = vsub.f32 1.0, %v355_v16 }
 0x54c   :  { %v357_v18 = vmul.f32 %v2679_v15, %v356_v17 }
 0x54e   :  { %v358_v19 = vadd.f32 %v2679_v15, %v357_v18 }
 0x550   :  { %v362_v22 = vsel %vm361_vm12, %v2679_v15, %v358_v19 }
 0x551   :  { %v367_v25 = vsel %vm364_vm13, %v366_v23, %v362_v22 }
 0x552   :  { %v370_v27 = vmul.f32 %v367_v25, %v315_v63  ;;  %v115_v63 = vld [vmem:[%s3703_s0 + $0x20] sm:$0xff] }
 0x553   :  { %2553 = vmatmul.msk.f32.gmra.mxu0 %vm129_vm0, %v115_v63 }
 0x55b   :  { %2554 = vmatmul.msk.f32.gmra.mxu0 %vm129_vm0, %v116_v31 }
 0x597   :  { %v373_v24 = vpop.permute.xlu2 %372 }
 0x598   :  { %v375_v26 = vmul.f32 %v373_v24, %v367_v25 }
 0x59a   :  { %377 = vrot.lane.b32.xlu0 %v375_v26, %s3027_s21 }
 0x5d0   :  { %v183_v1 = vpop.f32.mrf.mxu0 }
 0x5d1   :  { %v184_v2 = vadd.f32 %v3178_v8, %v183_v1 }
 0x60c   :  { %v378_v28 = vpop.permute.xlu0 %377 }
 0x60d   :  { %v380_v29 = vadd.f32 %v378_v28, %v370_v27 }
 0x60f   :  { %2680 = vtanh.f32 %v380_v29 }
 0x615   :  { %v2681_v30 = vpop.eup %2680 }
 0x616   :  { %383 = vrot.lane.b32.xlu1 %v2681_v30, %s3026_s19  ;;  %v727_v30 = vld [vmem:[%s3707_s4 + $0x10] sm:$0xff] }
 0x688   :  { %v384_v32 = vpop.permute.xlu1 %383 }
 0x689   :  { %v386_v33 = vmul.f32 %v384_v32, %v367_v25  ;;  %v726_v32 = vld [vmem:[%s3707_s4 + $0x8] sm:$0xff] }
 0x68b   :  { %388 = vrot.lane.b32.xlu2 %v386_v33, %s3027_s21  ;;  %v725_v33 = vld [vmem:[%s3707_s4] sm:$0xff] }
 0x6e5   :  { %v389_v34 = vpop.permute.xlu2 %388 }
 0x6e6   :  { %391 = vst.msk [vmem:[#allocation2 + $0x10] sm:$0xff] %vm195_vm5, %v389_v34  ;;  %2562 = vmatmul.msk.f32.vlgmr.msrb.gmra.mxu1 %vm195_vm5, %v389_v34 }
 0x763   :  { %v411_v37 = vpop.f32.mrf.mxu1 }
 0x764   :  { %v414_v38 = vadd.f32 %v411_v37, %v181_v36  ;;  %v718_v36 = vld [vmem:[#allocation2 + $0x8] sm:$0xff]  ;;  %v719_v37 = vld [vmem:[#allocation2 + $0x10] sm:$0xff] }
 0x766   :  { %2682 = vtanh.f32 %v414_v38  ;;  %v2563_v42 = vmul.f32 -1.442695, %v414_v38 }
 0x768   :  { %2684 = vpow2.f32 %v2563_v42  ;;  %v186_v42 = vpop.f32.mrf.mxu0 }
 0x76c   :  { %v2683_v41 = vpop.eup %2682 }
 0x76d   :  { %437 = vrot.lane.b32.xlu0 %v2683_v41, %s3026_s19 }
 0x76e   :  { %v2685_v43 = vpop.eup %2684 }
 0x76f   :  { %v418_v44 = vadd.f32 1.0, %v2685_v43  ;;  %v187_v43 = vadd.f32 %v3178_v8, %v186_v42 }
 0x771   :  { %2686 = vrcp.f32 %v418_v44  ;;  %v430_v50 = vand.u32 2147483648, %v418_v44  ;;  %vm424_vm15 = vweird.f32 %v418_v44  ;;  %v428_v51 = vand.u32 2147483647, %v418_v44 }
 0x773   :  { %v431_v53 = vor.u32 1.1754944e-38, %v430_v50  ;;  %vm429_vm2 = vcmp.eq.f32.partialorder %v428_v51, 8.507059e+37 }
 0x777   :  { %v2687_v45 = vpop.eup %2686 }
 0x778   :  { %v420_v46 = vmul.f32 %v2687_v45, %v418_v44  ;;  %vm425_vm14 = vweird.f32 %v2687_v45 }
 0x779   :  { %vm426_vm1 = vmor %vm424_vm15, %vm425_vm14 }
 0x77a   :  { %v421_v47 = vsub.f32 1.0, %v420_v46 }
 0x77c   :  { %v422_v48 = vmul.f32 %v2687_v45, %v421_v47 }
 0x77e   :  { %v423_v49 = vadd.f32 %v2687_v45, %v422_v48 }
 0x780   :  { %v427_v52 = vsel %vm426_vm1, %v2687_v45, %v423_v49 }
 0x781   :  { %v432_v55 = vsel %vm429_vm2, %v431_v53, %v427_v52 }
 0x782   :  { %v435_v57 = vmul.f32 %v432_v55, %v380_v29  ;;  %v728_v29 = vld [vmem:[%s3707_s4 + $0x18] sm:$0xff] }
 0x783   :  { %773 = vmatpush.msra.mxu3 %v728_v29 }
 0x785   :  { %774 = vmatpush.msra.mxu3 %v727_v30 }
 0x787   :  { %775 = vmatpush.msra.mxu3 %v726_v32 }
 0x789   :  { %776 = vmatpush.msra.mxu3 %v725_v33 }
 0x7df   :  { %v438_v54 = vpop.permute.xlu0 %437 }
 0x7e0   :  { %v440_v56 = vmul.f32 %v438_v54, %v432_v55 }
 0x7e2   :  { %442 = vrot.lane.b32.xlu1 %v440_v56, %s3027_s21 }
 0x854   :  { %v443_v58 = vpop.permute.xlu1 %442 }
 0x855   :  { %v445_v59 = vadd.f32 %v443_v58, %v435_v57 }
 0x857   :  { %2688 = vtanh.f32 %v445_v59 }
 0x85d   :  { %v2689_v60 = vpop.eup %2688 }
 0x85e   :  { %448 = vrot.lane.b32.xlu2 %v2689_v60, %s3026_s19 }
 0x8b8   :  { %v449_v61 = vpop.permute.xlu2 %448 }
 0x8b9   :  { %v451_v62 = vmul.f32 %v449_v61, %v432_v55 }
 0x8bb   :  { %453 = vrot.lane.b32.xlu0 %v451_v62, %s3027_s21 }
 0x92d   :  { %v454_v0 = vpop.permute.xlu0 %453 }
 0x92e   :  { %456 = vst.msk [vmem:[#allocation2 + $0x18] sm:$0xff] %vm195_vm5, %v454_v0  ;;  %2564 = vmatmul.msk.f32.vlgmr.msra.gmra.mxu2 %vm195_vm5, %v454_v0 }
 0x935   :  { %v720_v38 = vld [vmem:[#allocation2 + $0x18] sm:$0xff] }
 0x9b1   :  { %v476_v3 = vpop.f32.mrf.mxu2 }
 0x9b2   :  { %v479_v4 = vadd.f32 %v476_v3, %v184_v2 }
 0x9b4   :  { %2690 = vtanh.f32 %v479_v4  ;;  %v2565_v6 = vmul.f32 -1.442695, %v479_v4  ;;  %v3283_v4 = vld [vmem:[%s3708_s5 + $0x18] sm:$0xff] }
 0x9b5   :  { %814 = vmatpush.msrb.mxu1 %v3283_v4  ;;  %879 = vmatpush.msra.mxu2 %v3283_v4 }
 0x9b6   :  { %2692 = vpow2.f32 %v2565_v6  ;;  %v3295_v6 = vld [vmem:[%s3708_s5 + $0x8] sm:$0xff] }
 0x9ba   :  { %v2691_v5 = vpop.eup %2690 }
 0x9bb   :  { %502 = vrot.lane.b32.xlu1 %v2691_v5, %s3026_s19  ;;  %v3288_v5 = vld [vmem:[%s3708_s5 + $0x10] sm:$0xff] }
 0x9bc   :  { %v2693_v9 = vpop.eup %2692  ;;  %815 = vmatpush.msrb.mxu1 %v3288_v5  ;;  %880 = vmatpush.msra.mxu2 %v3288_v5 }
 0x9bd   :  { %v483_v10 = vadd.f32 1.0, %v2693_v9  ;;  %v3302_v9 = vld [vmem:[%s3708_s5] sm:$0xff] }
 0x9be   :  { %816 = vmatpush.msrb.mxu1 %v3295_v6  ;;  %881 = vmatpush.msra.mxu2 %v3295_v6 }
 0x9bf   :  { %2694 = vrcp.f32 %v483_v10  ;;  %v495_v16 = vand.u32 2147483648, %v483_v10  ;;  %vm489_vm4 = vweird.f32 %v483_v10  ;;  %v493_v17 = vand.u32 2147483647, %v483_v10 }
 0x9c0   :  { %817 = vmatpush.msrb.mxu1 %v3302_v9  ;;  %882 = vmatpush.msra.mxu2 %v3302_v9 }
 0x9c1   :  { %v496_v19 = vor.u32 1.1754944e-38, %v495_v16  ;;  %vm494_vm7 = vcmp.eq.f32.partialorder %v493_v17, 8.507059e+37 }
 0x9c5   :  { %v2695_v11 = vpop.eup %2694 }
 0x9c6   :  { %v485_v12 = vmul.f32 %v2695_v11, %v483_v10  ;;  %vm490_vm3 = vweird.f32 %v2695_v11 }
 0x9c7   :  { %vm491_vm6 = vmor %vm489_vm4, %vm490_vm3 }
 0x9c8   :  { %v486_v13 = vsub.f32 1.0, %v485_v12  ;;  %v190_v12 = vadd.f32 %v3178_v8, %v3207_v39 }
 0x9ca   :  { %v487_v14 = vmul.f32 %v2695_v11, %v486_v13 }
 0x9cc   :  { %v488_v15 = vadd.f32 %v2695_v11, %v487_v14 }
 0x9ce   :  { %v492_v18 = vsel %vm491_vm6, %v2695_v11, %v488_v15  ;;  %v3325_v15 = vld [vmem:[%s3709_s6] ss:$0 sm:$0xff] }
 0x9cf   :  { %v497_v21 = vsel %vm494_vm7, %v496_v19, %v492_v18 }
 0x9d0   :  { %v500_v23 = vmul.f32 %v497_v21, %v445_v59 }
 0xa2d   :  { %v503_v20 = vpop.permute.xlu1 %502 }
 0xa2e   :  { %v505_v22 = vmul.f32 %v503_v20, %v497_v21 }
 0xa30   :  { %507 = vrot.lane.b32.xlu2 %v505_v22, %s3027_s21 }
 0xa8a   :  { %v508_v24 = vpop.permute.xlu2 %507 }
 0xa8b   :  { %v510_v25 = vadd.f32 %v508_v24, %v500_v23 }
 0xa8d   :  { %2696 = vtanh.f32 %v510_v25 }
 0xa93   :  { %v2697_v26 = vpop.eup %2696 }
 0xa94   :  { %513 = vrot.lane.b32.xlu0 %v2697_v26, %s3026_s19 }
 0xb06   :  { %v514_v27 = vpop.permute.xlu0 %513 }
 0xb07   :  { %v516_v28 = vmul.f32 %v514_v27, %v497_v21 }
 0xb09   :  { %518 = vrot.lane.b32.xlu1 %v516_v28, %s3027_s21 }
 0xb7b   :  { %v519_v34 = vpop.permute.xlu1 %518 }
 0xb7c   :  { %521 = vst.msk [vmem:[#allocation2 + $0x20] sm:$0xff] %vm195_vm5, %v519_v34  ;;  %2566 = vmatmul.msk.f32.vlgmr.msrb.gmra.mxu3 %vm195_vm5, %v519_v34 }
 0xb83   :  { %v721_v41 = vld [vmem:[#allocation2 + $0x20] sm:$0xff] }
 0xb84   :  { %2572 = vmatmul.msk.f32.vlgmr.msra.gmra.mxu3 %vm195_vm5, %v717_v35 }
 0xb8c   :  { %2573 = vmatmul.msk.f32.gmra.mxu3 %vm195_vm5, %v718_v36 }
 0xb94   :  { %2574 = vmatmul.msk.f32.gmra.mxu3 %vm195_vm5, %v719_v37 }
 0xb9c   :  { %2575 = vmatmul.msk.f32.gmra.mxu3 %vm195_vm5, %v720_v38 }
 0xba4   :  { %2576 = vmatmul.msk.f32.gmra.mxu3 %vm195_vm5, %v721_v41 }
 0xbff   :  { %v541_v44 = vpop.f32.mrf.mxu3 }
 0xc00   :  { %v544_v45 = vadd.f32 %v541_v44, %v187_v43 }
 0xc02   :  { %2698 = vtanh.f32 %v544_v45  ;;  %v2567_v47 = vmul.f32 -1.442695, %v544_v45 }
 0xc04   :  { %2700 = vpow2.f32 %v2567_v47 }
 0xc07   :  { %v778_v16 = vpop.f32.mrf.mxu3 }
 0xc08   :  { %v2699_v46 = vpop.eup %2698  ;;  %v779_v17 = vadd.f32 %v3325_v15, %v778_v16 }
 0xc09   :  { %567 = vrot.lane.b32.xlu2 %v2699_v46, %s3026_s19 }
 0xc0a   :  { %v2701_v48 = vpop.eup %2700 }
 0xc0b   :  { %v548_v49 = vadd.f32 1.0, %v2701_v48 }
 0xc0d   :  { %2702 = vrcp.f32 %v548_v49  ;;  %v560_v55 = vand.u32 2147483648, %v548_v49  ;;  %vm554_vm8 = vweird.f32 %v548_v49  ;;  %v558_v56 = vand.u32 2147483647, %v548_v49 }
 0xc0f   :  { %v561_v58 = vor.u32 1.1754944e-38, %v560_v55  ;;  %vm559_vm10 = vcmp.eq.f32.partialorder %v558_v56, 8.507059e+37 }
 0xc13   :  { %v2703_v50 = vpop.eup %2702 }
 0xc14   :  { %v550_v51 = vmul.f32 %v2703_v50, %v548_v49  ;;  %vm555_vm0 = vweird.f32 %v2703_v50 }
 0xc15   :  { %vm556_vm9 = vmor %vm554_vm8, %vm555_vm0 }
 0xc16   :  { %v551_v52 = vsub.f32 1.0, %v550_v51 }
 0xc18   :  { %v552_v53 = vmul.f32 %v2703_v50, %v551_v52 }
 0xc1a   :  { %v553_v54 = vadd.f32 %v2703_v50, %v552_v53 }
 0xc1c   :  { %v557_v57 = vsel %vm556_vm9, %v2703_v50, %v553_v54 }
 0xc1d   :  { %v562_v60 = vsel %vm559_vm10, %v561_v58, %v557_v57 }
 0xc1e   :  { %v565_v62 = vmul.f32 %v562_v60, %v510_v25 }
 0xc63   :  { %v568_v59 = vpop.permute.xlu2 %567 }
 0xc64   :  { %v570_v61 = vmul.f32 %v568_v59, %v562_v60 }
 0xc66   :  { %572 = vrot.lane.b32.xlu0 %v570_v61, %s3027_s21 }
 0xcd8   :  { %v573_v63 = vpop.permute.xlu0 %572 }
 0xcd9   :  { %v3275_v0 = vadd.f32 %v573_v63, %v565_v62 }
 0xcdb   :  { %2704 = vtanh.f32 %v3275_v0 }
 0xce1   :  { %v2705_v1 = vpop.eup %2704 }
 0xce2   :  { %578 = vrot.lane.b32.xlu1 %v2705_v1, %s3026_s19 }
 0xd54   :  { %v579_v2 = vpop.permute.xlu1 %578 }
 0xd55   :  { %v581_v3 = vmul.f32 %v579_v2, %v562_v60 }
 0xd57   :  { %583 = vrot.lane.b32.xlu2 %v581_v3, %s3027_s21 }
 0xdb1   :  { %v584_v10 = vpop.permute.xlu2 %583 }
 0xdb2   :  { %586 = vst.msk [vmem:[#allocation2 + $0x28] sm:$0xff] %vm195_vm5, %v584_v10  ;;  %2568 = vmatmul.msk.f32.vlgmr.msra.gmra.mxu1 %vm195_vm5, %v584_v10  ;;  %v781_v10 = vpop.f32.mrf.mxu3 }
 0xdb3   :  { %944 = vmatpush.msra.mxu1 %v3283_v4 }
 0xdb5   :  { %945 = vmatpush.msra.mxu1 %v3288_v5 }
 0xdb7   :  { %946 = vmatpush.msra.mxu1 %v3295_v6 }
 0xdb9   :  { %v722_v11 = vld [vmem:[#allocation2 + $0x28] sm:$0xff]  ;;  %947 = vmatpush.msra.mxu1 %v3302_v9 }
 0xdba   :  { %2577 = vmatmul.msk.f32.gmra.mxu3 %vm195_vm5, %v722_v11  ;;  %818 = vmatmul.f32.vlgmr.msrb.gmra.mxu1 %v3025_v7  ;;  %v782_v11 = vadd.f32 %v3325_v15, %v781_v10 }
 0xdbb   :  { %1074 = vmatpush.msrb.mxu1 %v3283_v4 }
 0xdbd   :  { %1075 = vmatpush.msrb.mxu1 %v3288_v5 }
 0xdbf   :  { %1076 = vmatpush.msrb.mxu1 %v3295_v6 }
 0xdc1   :  { %1077 = vmatpush.msrb.mxu1 %v3302_v9 }
 0xe2f   :  { %v606_v13 = vpop.f32.mrf.mxu1 }
 0xe30   :  { %v609_v14 = vadd.f32 %v606_v13, %v190_v12 }
 0xe32   :  { %2706 = vtanh.f32 %v609_v14  ;;  %v2569_v8 = vmul.f32 -1.442695, %v609_v14 }
 0xe37   :  { %v819_v18 = vpop.f32.mrf.mxu1 }
 0xe38   :  { %v2707_v19 = vpop.eup %2706  ;;  %v822_v20 = vadd.f32 %v819_v18, %v779_v17 }
 0xe39   :  { %632 = vrot.lane.b32.xlu0 %v2707_v19, %s3026_s19 }
 0xe3a   :  { %2708 = vtanh.f32 %v822_v20  ;;  %v2580_v39 = vmul.f32 -1.442695, %v822_v20 }
 0xe3b   :  { %2710 = vpow2.f32 %v2569_v8 }
 0xe3c   :  { %2712 = vpow2.f32 %v2580_v39 }
 0xe40   :  { %v2709_v21 = vpop.eup %2708 }
 0xe41   :  { %845 = vrot.lane.b32.xlu1 %v2709_v21, %s3026_s19  ;;  %v2711_v22 = vpop.eup %2710 }
 0xe42   :  { %v613_v23 = vadd.f32 1.0, %v2711_v22  ;;  %v2713_v24 = vpop.eup %2712 }
 0xe43   :  { %v826_v25 = vadd.f32 1.0, %v2713_v24 }
 0xe44   :  { %2714 = vrcp.f32 %v613_v23  ;;  %v625_v34 = vand.u32 2147483648, %v613_v23  ;;  %vm619_vm12 = vweird.f32 %v613_v23  ;;  %v623_v35 = vand.u32 2147483647, %v613_v23 }
 0xe45   :  { %2716 = vrcp.f32 %v826_v25  ;;  %v838_v45 = vand.u32 2147483648, %v826_v25  ;;  %vm832_vm1 = vweird.f32 %v826_v25  ;;  %v836_v46 = vand.u32 2147483647, %v826_v25 }
 0xe46   :  { %v626_v38 = vor.u32 1.1754944e-38, %v625_v34  ;;  %vm624_vm14 = vcmp.eq.f32.partialorder %v623_v35, 8.507059e+37 }
 0xe47   :  { %v839_v48 = vor.u32 1.1754944e-38, %v838_v45  ;;  %vm837_vm3 = vcmp.eq.f32.partialorder %v836_v46, 8.507059e+37 }
 0xe4a   :  { %v2715_v26 = vpop.eup %2714 }
 0xe4b   :  { %v615_v27 = vmul.f32 %v2715_v26, %v613_v23  ;;  %v2717_v29 = vpop.eup %2716  ;;  %vm620_vm11 = vweird.f32 %v2715_v26 }
 0xe4c   :  { %v828_v31 = vmul.f32 %v2717_v29, %v826_v25  ;;  %vm621_vm13 = vmor %vm619_vm12, %vm620_vm11  ;;  %vm833_vm15 = vweird.f32 %v2717_v29 }
 0xe4d   :  { %v616_v28 = vsub.f32 1.0, %v615_v27  ;;  %vm834_vm2 = vmor %vm832_vm1, %vm833_vm15 }
 0xe4e   :  { %v829_v33 = vsub.f32 1.0, %v828_v31 }
 0xe4f   :  { %v617_v30 = vmul.f32 %v2715_v26, %v616_v28 }
 0xe50   :  { %v830_v37 = vmul.f32 %v2717_v29, %v829_v33 }
 0xe51   :  { %v618_v32 = vadd.f32 %v2715_v26, %v617_v30 }
 0xe52   :  { %v831_v44 = vadd.f32 %v2717_v29, %v830_v37 }
 0xe53   :  { %v622_v36 = vsel %vm621_vm13, %v2715_v26, %v618_v32 }
 0xe54   :  { %v627_v42 = vsel %vm624_vm14, %v626_v38, %v622_v36  ;;  %v835_v47 = vsel %vm834_vm2, %v2717_v29, %v831_v44  ;;  %v784_v36 = vpop.f32.mrf.mxu3 }
 0xe55   :  { %v840_v50 = vsel %vm837_vm3, %v839_v48, %v835_v47  ;;  %v630_v52 = vmul.f32 %v627_v42, %v3275_v0  ;;  %v785_v37 = vadd.f32 %v3325_v15, %v784_v36 }
 0xe56   :  { %v843_v56 = vmul.f32 0.0, %v840_v50 }
 0xeab   :  { %v633_v41 = vpop.permute.xlu0 %632 }
 0xeac   :  { %v635_v43 = vmul.f32 %v633_v41, %v627_v42 }
 0xeae   :  { %637 = vrot.lane.b32.xlu2 %v635_v43, %s3027_s21 }
 0xeb3   :  { %v846_v49 = vpop.permute.xlu1 %845 }
 0xeb4   :  { %v848_v51 = vmul.f32 %v846_v49, %v840_v50 }
 0xeb6   :  { %850 = vrot.lane.b32.xlu0 %v848_v51, %s3027_s21 }
 0xf08   :  { %v638_v53 = vpop.permute.xlu2 %637 }
 0xf09   :  { %v3333_v54 = vadd.f32 %v638_v53, %v630_v52 }
 0xf0b   :  { %2718 = vtanh.f32 %v3333_v54 }
 0xf11   :  { %v2719_v55 = vpop.eup %2718 }
 0xf12   :  { %643 = vrot.lane.b32.xlu1 %v2719_v55, %s3026_s19 }
 0xf28   :  { %v851_v57 = vpop.permute.xlu0 %850 }
 0xf29   :  { %v853_v58 = vadd.f32 %v851_v57, %v843_v56 }
 0xf2b   :  { %2720 = vtanh.f32 %v853_v58 }
 0xf31   :  { %v2721_v59 = vpop.eup %2720 }
 0xf32   :  { %856 = vrot.lane.b32.xlu2 %v2721_v59, %s3026_s19 }
 0xf84   :  { %v644_v60 = vpop.permute.xlu1 %643 }
 0xf85   :  { %v646_v61 = vmul.f32 %v644_v60, %v627_v42 }
 0xf87   :  { %648 = vrot.lane.b32.xlu0 %v646_v61, %s3027_s21 }
 0xf8c   :  { %v857_v62 = vpop.permute.xlu2 %856 }
 0xf8d   :  { %v859_v63 = vmul.f32 %v857_v62, %v840_v50 }
 0xf8f   :  { %861 = vrot.lane.b32.xlu1 %v859_v63, %s3027_s21 }
 0xff9   :  { %v649_v0 = vpop.permute.xlu0 %648 }
 0xffa   :  { %651 = vst.msk [vmem:[#allocation2 + $0x30] sm:$0xff] %vm195_vm5, %v649_v0  ;;  %2570 = vmatmul.msk.f32.vlgmr.msrb.gmra.mxu2 %vm195_vm5, %v649_v0 }
 0xffb   :  { %1009 = vmatpush.msrb.mxu2 %v3283_v4 }
 0xffd   :  { %1010 = vmatpush.msrb.mxu2 %v3288_v5 }
 0xfff   :  { %1011 = vmatpush.msrb.mxu2 %v3295_v6 }
0x1001   :  { %v862_v1 = vpop.permute.xlu1 %861  ;;  %v723_v2 = vld [vmem:[#allocation2 + $0x30] sm:$0xff]  ;;  %1012 = vmatpush.msrb.mxu2 %v3302_v9 }
0x1002   :  { %864 = vst.msk [vmem:[#allocation2] sm:$0xff] %vm195_vm5, %v862_v1  ;;  %2578 = vmatmul.msk.f32.gmra.mxu3 %vm195_vm5, %v723_v2  ;;  %2581 = vmatmul.msk.f32.vlgmr.msra.gmra.mxu2 %vm195_vm5, %v862_v1  ;;  %v787_v2 = vpop.f32.mrf.mxu3 }
0x1003   :  { %1139 = vmatpush.msra.mxu2 %v3283_v4  ;;  %v788_v10 = vadd.f32 %v3325_v15, %v787_v2 }
0x1005   :  { %1140 = vmatpush.msra.mxu2 %v3288_v5 }
0x1007   :  { %1141 = vmatpush.msra.mxu2 %v3295_v6 }
0x1009   :  { %1142 = vmatpush.msra.mxu2 %v3302_v9 }
0x107d   :  { %v3353_v3 = vpop.f32.mrf.mxu2 }
0x1085   :  { %v884_v12 = vpop.f32.mrf.mxu2 }
0x1086   :  { %v887_v13 = vadd.f32 %v884_v12, %v782_v11 }
0x1088   :  { %2722 = vtanh.f32 %v887_v13  ;;  %v2582_v16 = vmul.f32 -1.442695, %v887_v13 }
0x108a   :  { %2724 = vpow2.f32 %v2582_v16 }
0x108e   :  { %v2723_v14 = vpop.eup %2722 }
0x108f   :  { %910 = vrot.lane.b32.xlu2 %v2723_v14, %s3026_s19 }
0x1090   :  { %v2725_v17 = vpop.eup %2724 }
0x1091   :  { %v891_v18 = vadd.f32 1.0, %v2725_v17 }
0x1093   :  { %2726 = vrcp.f32 %v891_v18  ;;  %v903_v22 = vand.u32 2147483648, %v891_v18  ;;  %vm897_vm6 = vweird.f32 %v891_v18  ;;  %v901_v23 = vand.u32 2147483647, %v891_v18 }
0x1095   :  { %v904_v25 = vor.u32 1.1754944e-38, %v903_v22  ;;  %vm902_vm0 = vcmp.eq.f32.partialorder %v901_v23, 8.507059e+37 }
0x1099   :  { %v2727_v19 = vpop.eup %2726 }
0x109a   :  { %v893_v20 = vmul.f32 %v2727_v19, %v891_v18  ;;  %vm898_vm4 = vweird.f32 %v2727_v19 }
0x109b   :  { %vm899_vm7 = vmor %vm897_vm6, %vm898_vm4 }
0x109c   :  { %v894_v21 = vsub.f32 1.0, %v893_v20 }
0x109e   :  { %v895_v8 = vmul.f32 %v2727_v19, %v894_v21 }
0x10a0   :  { %v896_v39 = vadd.f32 %v2727_v19, %v895_v8 }
0x10a2   :  { %v900_v24 = vsel %vm899_vm7, %v2727_v19, %v896_v39 }
0x10a3   :  { %v905_v27 = vsel %vm902_vm0, %v904_v25, %v900_v24 }
0x10a4   :  { %v908_v29 = vmul.f32 %v905_v27, %v853_v58 }
0x10e9   :  { %v911_v26 = vpop.permute.xlu2 %910 }
0x10ea   :  { %v913_v28 = vmul.f32 %v911_v26, %v905_v27 }
0x10ec   :  { %915 = vrot.lane.b32.xlu0 %v913_v28, %s3027_s21 }
0x115e   :  { %v916_v30 = vpop.permute.xlu0 %915 }
0x115f   :  { %v918_v31 = vadd.f32 %v916_v30, %v908_v29 }
0x1161   :  { %2728 = vtanh.f32 %v918_v31 }
0x1167   :  { %v2729_v32 = vpop.eup %2728 }
0x1168   :  { %921 = vrot.lane.b32.xlu1 %v2729_v32, %s3026_s19 }
0x11da   :  { %v922_v33 = vpop.permute.xlu1 %921 }
0x11db   :  { %v924_v34 = vmul.f32 %v922_v33, %v905_v27 }
0x11dd   :  { %926 = vrot.lane.b32.xlu2 %v924_v34, %s3027_s21 }
0x1237   :  { %v927_v35 = vpop.permute.xlu2 %926 }
0x1238   :  { %929 = vst.msk [vmem:[#allocation2 + $0x8] sm:$0xff] %vm195_vm5, %v927_v35  ;;  %2583 = vmatmul.msk.f32.vlgmr.msra.gmra.mxu1 %vm195_vm5, %v927_v35 }
0x1239   :  { %1204 = vmatpush.msra.mxu1 %v3283_v4 }
0x123b   :  { %1205 = vmatpush.msra.mxu1 %v3288_v5 }
0x123d   :  { %1206 = vmatpush.msra.mxu1 %v3295_v6 }
0x123f   :  { %1207 = vmatpush.msra.mxu1 %v3302_v9 }
0x12b5   :  { %v949_v38 = vpop.f32.mrf.mxu1 }
0x12b6   :  { %v952_v41 = vadd.f32 %v949_v38, %v785_v37 }
0x12b8   :  { %2730 = vtanh.f32 %v952_v41  ;;  %v2584_v43 = vmul.f32 -1.442695, %v952_v41 }
0x12ba   :  { %2732 = vpow2.f32 %v2584_v43 }
0x12be   :  { %v2731_v42 = vpop.eup %2730 }
0x12bf   :  { %975 = vrot.lane.b32.xlu0 %v2731_v42, %s3026_s19 }
0x12c0   :  { %v2733_v44 = vpop.eup %2732 }
0x12c1   :  { %v956_v45 = vadd.f32 1.0, %v2733_v44 }
0x12c3   :  { %2734 = vrcp.f32 %v956_v45  ;;  %v968_v51 = vand.u32 2147483648, %v956_v45  ;;  %vm962_vm9 = vweird.f32 %v956_v45  ;;  %v966_v52 = vand.u32 2147483647, %v956_v45 }
0x12c5   :  { %v969_v55 = vor.u32 1.1754944e-38, %v968_v51  ;;  %vm967_vm11 = vcmp.eq.f32.partialorder %v966_v52, 8.507059e+37 }
0x12c9   :  { %v2735_v46 = vpop.eup %2734 }
0x12ca   :  { %v958_v47 = vmul.f32 %v2735_v46, %v956_v45  ;;  %vm963_vm8 = vweird.f32 %v2735_v46 }
0x12cb   :  { %vm964_vm10 = vmor %vm962_vm9, %vm963_vm8 }
0x12cc   :  { %v959_v48 = vsub.f32 1.0, %v958_v47 }
0x12ce   :  { %v960_v49 = vmul.f32 %v2735_v46, %v959_v48 }
0x12d0   :  { %v961_v50 = vadd.f32 %v2735_v46, %v960_v49 }
0x12d2   :  { %v965_v53 = vsel %vm964_vm10, %v2735_v46, %v961_v50 }
0x12d3   :  { %v970_v57 = vsel %vm967_vm11, %v969_v55, %v965_v53 }
0x12d4   :  { %v973_v59 = vmul.f32 %v970_v57, %v918_v31  ;;  %v790_v31 = vpop.f32.mrf.mxu3 }
0x12d5   :  { %v791_v32 = vadd.f32 %v3325_v15, %v790_v31  ;;  %v1321_v31 = vld [vmem:[#allocation2 + $0x8] sm:$0xff] }
0x1331   :  { %v976_v56 = vpop.permute.xlu0 %975 }
0x1332   :  { %v978_v58 = vmul.f32 %v976_v56, %v970_v57 }
0x1334   :  { %980 = vrot.lane.b32.xlu1 %v978_v58, %s3027_s21 }
0x13a6   :  { %v981_v60 = vpop.permute.xlu1 %980 }
0x13a7   :  { %v983_v61 = vadd.f32 %v981_v60, %v973_v59 }
0x13a9   :  { %2736 = vtanh.f32 %v983_v61 }
0x13af   :  { %v2737_v62 = vpop.eup %2736 }
0x13b0   :  { %986 = vrot.lane.b32.xlu2 %v2737_v62, %s3026_s19 }
0x140a   :  { %v987_v63 = vpop.permute.xlu2 %986 }
0x140b   :  { %v989_v0 = vmul.f32 %v987_v63, %v970_v57 }
0x140d   :  { %991 = vrot.lane.b32.xlu0 %v989_v0, %s3027_s21 }
0x147f   :  { %v992_v1 = vpop.permute.xlu0 %991 }
0x1480   :  { %994 = vst.msk [vmem:[#allocation2 + $0x10] sm:$0xff] %vm195_vm5, %v992_v1  ;;  %2585 = vmatmul.msk.f32.vlgmr.msrb.gmra.mxu2 %vm195_vm5, %v992_v1 }
0x1481   :  { %1269 = vmatpush.msrb.mxu2 %v3283_v4 }
0x1483   :  { %1270 = vmatpush.msrb.mxu2 %v3288_v5 }
0x1485   :  { %1271 = vmatpush.msrb.mxu2 %v3295_v6 }
0x1487   :  { %1272 = vmatpush.msrb.mxu2 %v3302_v9 }
0x1503   :  { %v1014_v11 = vpop.f32.mrf.mxu2 }
0x1504   :  { %v1017_v12 = vadd.f32 %v1014_v11, %v788_v10 }
0x1506   :  { %2738 = vtanh.f32 %v1017_v12  ;;  %v2586_v14 = vmul.f32 -1.442695, %v1017_v12 }
0x1508   :  { %2740 = vpow2.f32 %v2586_v14 }
0x150c   :  { %v2739_v13 = vpop.eup %2738 }
0x150d   :  { %1040 = vrot.lane.b32.xlu1 %v2739_v13, %s3026_s19 }
0x150e   :  { %v2741_v16 = vpop.eup %2740 }
0x150f   :  { %v1021_v17 = vadd.f32 1.0, %v2741_v16 }
0x1511   :  { %2742 = vrcp.f32 %v1021_v17  ;;  %v1033_v9 = vand.u32 2147483648, %v1021_v17  ;;  %vm1027_vm13 = vweird.f32 %v1021_v17  ;;  %v1031_v20 = vand.u32 2147483647, %v1021_v17 }
0x1513   :  { %v1034_v8 = vor.u32 1.1754944e-38, %v1033_v9  ;;  %vm1032_vm15 = vcmp.eq.f32.partialorder %v1031_v20, 8.507059e+37 }
0x1517   :  { %v2743_v4 = vpop.eup %2742 }
0x1518   :  { %v1023_v5 = vmul.f32 %v2743_v4, %v1021_v17  ;;  %vm1028_vm12 = vweird.f32 %v2743_v4 }
0x1519   :  { %vm1029_vm14 = vmor %vm1027_vm13, %vm1028_vm12 }
0x151a   :  { %v1024_v18 = vsub.f32 1.0, %v1023_v5 }
0x151c   :  { %v1025_v6 = vmul.f32 %v2743_v4, %v1024_v18 }
0x151e   :  { %v1026_v19 = vadd.f32 %v2743_v4, %v1025_v6 }
0x1520   :  { %v1030_v21 = vsel %vm1029_vm14, %v2743_v4, %v1026_v19 }
0x1521   :  { %v1035_v22 = vsel %vm1032_vm15, %v1034_v8, %v1030_v21 }
0x1522   :  { %v1038_v24 = vmul.f32 %v1035_v22, %v983_v61  ;;  %v793_v61 = vpop.f32.mrf.mxu3 }
0x1523   :  { %v794_v62 = vadd.f32 %v3325_v15, %v793_v61 }
0x157f   :  { %v1041_v39 = vpop.permute.xlu1 %1040 }
0x1580   :  { %v1043_v23 = vmul.f32 %v1041_v39, %v1035_v22 }
0x1582   :  { %1045 = vrot.lane.b32.xlu2 %v1043_v23, %s3027_s21 }
0x15dc   :  { %v1046_v25 = vpop.permute.xlu2 %1045 }
0x15dd   :  { %v1048_v26 = vadd.f32 %v1046_v25, %v1038_v24  ;;  %v1331_v25 = vld [vmem:[%s3710_s7 + $0x18] sm:$0xff] }
0x15df   :  { %2744 = vtanh.f32 %v1048_v26 }
0x15e5   :  { %v2745_v27 = vpop.eup %2744 }
0x15e6   :  { %1051 = vrot.lane.b32.xlu0 %v2745_v27, %s3026_s19  ;;  %v1329_v27 = vld [vmem:[%s3710_s7 + $0x8] sm:$0xff] }
0x1658   :  { %v1052_v28 = vpop.permute.xlu0 %1051 }
0x1659   :  { %v1054_v29 = vmul.f32 %v1052_v28, %v1035_v22  ;;  %v1328_v28 = vld [vmem:[%s3710_s7] sm:$0xff] }
0x165b   :  { %1056 = vrot.lane.b32.xlu1 %v1054_v29, %s3027_s21 }
0x16cd   :  { %v1057_v30 = vpop.permute.xlu1 %1056 }
0x16ce   :  { %1059 = vst.msk [vmem:[#allocation2 + $0x18] sm:$0xff] %vm195_vm5, %v1057_v30  ;;  %2587 = vmatmul.msk.f32.vlgmr.msrb.gmra.mxu1 %vm195_vm5, %v1057_v30  ;;  %v1320_v30 = vld [vmem:[#allocation2] sm:$0xff] }
0x16cf   :  { %1376 = vmatpush.msrb.mxu1 %v1331_v25 }
0x174b   :  { %v1079_v33 = vpop.f32.mrf.mxu1 }
0x174c   :  { %v1082_v34 = vadd.f32 %v1079_v33, %v791_v32  ;;  %v1322_v32 = vld [vmem:[#allocation2 + $0x10] sm:$0xff]  ;;  %v1323_v33 = vld [vmem:[#allocation2 + $0x18] sm:$0xff] }
0x174e   :  { %2746 = vtanh.f32 %v1082_v34  ;;  %v2588_v36 = vmul.f32 -1.442695, %v1082_v34 }
0x1750   :  { %2748 = vpow2.f32 %v2588_v36  ;;  %v796_v36 = vpop.f32.mrf.mxu3 }
0x1754   :  { %v2747_v35 = vpop.eup %2746 }
0x1755   :  { %1105 = vrot.lane.b32.xlu2 %v2747_v35, %s3026_s19 }
0x1756   :  { %v2749_v37 = vpop.eup %2748 }
0x1757   :  { %v1086_v38 = vadd.f32 1.0, %v2749_v37  ;;  %v797_v37 = vadd.f32 %v3325_v15, %v796_v36 }
0x1759   :  { %2750 = vrcp.f32 %v1086_v38  ;;  %v1098_v46 = vand.u32 2147483648, %v1086_v38  ;;  %vm1092_vm2 = vweird.f32 %v1086_v38  ;;  %v1096_v47 = vand.u32 2147483647, %v1086_v38 }
0x175b   :  { %v1099_v49 = vor.u32 1.1754944e-38, %v1098_v46  ;;  %vm1097_vm4 = vcmp.eq.f32.partialorder %v1096_v47, 8.507059e+37 }
0x175f   :  { %v2751_v41 = vpop.eup %2750 }
0x1760   :  { %v1088_v42 = vmul.f32 %v2751_v41, %v1086_v38  ;;  %vm1093_vm1 = vweird.f32 %v2751_v41 }
0x1761   :  { %vm1094_vm3 = vmor %vm1092_vm2, %vm1093_vm1 }
0x1762   :  { %v1089_v43 = vsub.f32 1.0, %v1088_v42 }
0x1764   :  { %v1090_v44 = vmul.f32 %v2751_v41, %v1089_v43 }
0x1766   :  { %v1091_v45 = vadd.f32 %v2751_v41, %v1090_v44 }
0x1768   :  { %v1095_v48 = vsel %vm1094_vm3, %v2751_v41, %v1091_v45 }
0x1769   :  { %v1100_v51 = vsel %vm1097_vm4, %v1099_v49, %v1095_v48 }
0x176a   :  { %v1103_v53 = vmul.f32 %v1100_v51, %v1048_v26  ;;  %v1330_v26 = vld [vmem:[%s3710_s7 + $0x10] sm:$0xff] }
0x176b   :  { %1377 = vmatpush.msrb.mxu1 %v1330_v26  ;;  %v3483_v26 = vld [vmem:[%s3712_s9] ss:$0 sm:$0xff] }
0x176d   :  { %1378 = vmatpush.msrb.mxu1 %v1329_v27 }
0x176f   :  { %1379 = vmatpush.msrb.mxu1 %v1328_v28 }
0x17af   :  { %v1106_v50 = vpop.permute.xlu2 %1105 }
0x17b0   :  { %v1108_v52 = vmul.f32 %v1106_v50, %v1100_v51 }
0x17b2   :  { %1110 = vrot.lane.b32.xlu0 %v1108_v52, %s3027_s21 }
0x1824   :  { %v1111_v55 = vpop.permute.xlu0 %1110 }
0x1825   :  { %v1113_v56 = vadd.f32 %v1111_v55, %v1103_v53  ;;  %v2914_v53 = vld [vmem:[%s3706_s3] ss:$0 sm:$0xff] }
0x1826   :  { %v193_v55 = vadd.f32 %v2914_v53, %v3209_v40 }
0x1827   :  { %2752 = vtanh.f32 %v1113_v56 }
0x182d   :  { %v2753_v57 = vpop.eup %2752 }
0x182e   :  { %1116 = vrot.lane.b32.xlu1 %v2753_v57, %s3026_s19  ;;  %v674_v57 = vadd.f32 %v3353_v3, %v193_v55 }
0x1830   :  { %v2571_v3 = vmul.f32 -1.442695, %v674_v57 }
0x18a0   :  { %v1117_v58 = vpop.permute.xlu1 %1116 }
0x18a1   :  { %v1119_v59 = vmul.f32 %v1117_v58, %v1100_v51 }
0x18a3   :  { %1121 = vrot.lane.b32.xlu2 %v1119_v59, %s3027_s21 }
0x18fd   :  { %v1122_v60 = vpop.permute.xlu2 %1121 }
0x18fe   :  { %1124 = vst.msk [vmem:[#allocation2 + $0x20] sm:$0xff] %vm195_vm5, %v1122_v60  ;;  %2589 = vmatmul.msk.f32.vlgmr.msra.gmra.mxu2 %vm195_vm5, %v1122_v60 }
0x1905   :  { %v1324_v34 = vld [vmem:[#allocation2 + $0x20] sm:$0xff] }
0x1981   :  { %v1144_v63 = vpop.f32.mrf.mxu2 }
0x1982   :  { %v1147_v0 = vadd.f32 %v1144_v63, %v794_v62 }
0x1984   :  { %2754 = vtanh.f32 %v1147_v0  ;;  %v2590_v2 = vmul.f32 -1.442695, %v1147_v0 }
0x1986   :  { %2756 = vpow2.f32 %v2590_v2 }
0x198a   :  { %v2755_v1 = vpop.eup %2754 }
0x198b   :  { %1170 = vrot.lane.b32.xlu0 %v2755_v1, %s3026_s19 }
0x198c   :  { %v2757_v10 = vpop.eup %2756 }
0x198d   :  { %v1151_v11 = vadd.f32 1.0, %v2757_v10 }
0x198f   :  { %2758 = vrcp.f32 %v1151_v11  ;;  %v1163_v4 = vand.u32 2147483648, %v1151_v11  ;;  %vm1157_vm7 = vweird.f32 %v1151_v11  ;;  %v1161_v5 = vand.u32 2147483647, %v1151_v11 }
0x1991   :  { %v1164_v6 = vor.u32 1.1754944e-38, %v1163_v4  ;;  %vm1162_vm8 = vcmp.eq.f32.partialorder %v1161_v5, 8.507059e+37 }
0x1995   :  { %v2759_v12 = vpop.eup %2758 }
0x1996   :  { %v1153_v13 = vmul.f32 %v2759_v12, %v1151_v11  ;;  %vm1158_vm6 = vweird.f32 %v2759_v12 }
0x1997   :  { %vm1159_vm0 = vmor %vm1157_vm7, %vm1158_vm6 }
0x1998   :  { %v1154_v14 = vsub.f32 1.0, %v1153_v13 }
0x199a   :  { %v1155_v16 = vmul.f32 %v2759_v12, %v1154_v14 }
0x199c   :  { %v1156_v17 = vadd.f32 %v2759_v12, %v1155_v16 }
0x199e   :  { %v1160_v18 = vsel %vm1159_vm0, %v2759_v12, %v1156_v17 }
0x199f   :  { %v1165_v9 = vsel %vm1162_vm8, %v1164_v6, %v1160_v18 }
0x19a0   :  { %v1168_v21 = vmul.f32 %v1165_v9, %v1113_v56 }
0x19fd   :  { %v1171_v19 = vpop.permute.xlu0 %1170 }
0x19fe   :  { %v1173_v20 = vmul.f32 %v1171_v19, %v1165_v9 }
0x1a00   :  { %1175 = vrot.lane.b32.xlu1 %v1173_v20, %s3027_s21 }
0x1a72   :  { %v1176_v8 = vpop.permute.xlu1 %1175 }
0x1a73   :  { %v3394_v39 = vadd.f32 %v1176_v8, %v1168_v21  ;;  %v3438_v21 = vld [vmem:[#allocation3 + $0x18] sm:$0xff]  ;;  %v3440_v8 = vld [vmem:[#allocation3 + $0x10] sm:$0xff] }
0x1a74   :  { %1417 = vmatpush.msra.mxu2 %v3438_v21  ;;  %1482 = vmatpush.msrb.mxu3 %v3438_v21 }
0x1a75   :  { %2760 = vtanh.f32 %v3394_v39  ;;  %1612 = vmatpush.msrb.mxu0 %v3438_v21 }
0x1a76   :  { %1418 = vmatpush.msra.mxu2 %v3440_v8  ;;  %1483 = vmatpush.msrb.mxu3 %v3440_v8 }
0x1a77   :  { %1613 = vmatpush.msrb.mxu0 %v3440_v8 }
0x1a7b   :  { %v2761_v22 = vpop.eup %2760 }
0x1a7c   :  { %1181 = vrot.lane.b32.xlu2 %v2761_v22, %s3026_s19  ;;  %v3449_v22 = vld [vmem:[#allocation3] sm:$0xff] }
0x1ad6   :  { %v1182_v23 = vpop.permute.xlu2 %1181 }
0x1ad7   :  { %v1184_v24 = vmul.f32 %v1182_v23, %v1165_v9 }
0x1ad9   :  { %1186 = vrot.lane.b32.xlu0 %v1184_v24, %s3027_s21 }
0x1b4b   :  { %v1187_v29 = vpop.permute.xlu0 %1186 }
0x1b4c   :  { %1189 = vst.msk [vmem:[#allocation2 + $0x28] sm:$0xff] %vm195_vm5, %v1187_v29  ;;  %2591 = vmatmul.msk.f32.vlgmr.msra.gmra.mxu1 %vm195_vm5, %v1187_v29 }
0x1b53   :  { %v1325_v35 = vld [vmem:[#allocation2 + $0x28] sm:$0xff] }
0x1b54   :  { %2595 = vmatmul.msk.f32.vlgmr.msrb.gmra.mxu1 %vm195_vm5, %v1320_v30 }
0x1b5c   :  { %2596 = vmatmul.msk.f32.gmra.mxu1 %vm195_vm5, %v1321_v31 }
0x1b64   :  { %2597 = vmatmul.msk.f32.gmra.mxu1 %vm195_vm5, %v1322_v32 }
0x1b6c   :  { %2598 = vmatmul.msk.f32.gmra.mxu1 %vm195_vm5, %v1323_v33 }
0x1b74   :  { %2599 = vmatmul.msk.f32.gmra.mxu1 %vm195_vm5, %v1324_v34 }
0x1b7c   :  { %2600 = vmatmul.msk.f32.gmra.mxu1 %vm195_vm5, %v1325_v35 }
0x1bc9   :  { %v1209_v38 = vpop.f32.mrf.mxu1 }
0x1bca   :  { %v1212_v41 = vadd.f32 %v1209_v38, %v797_v37 }
0x1bcc   :  { %2762 = vtanh.f32 %v1212_v41  ;;  %v2592_v43 = vmul.f32 -1.442695, %v1212_v41 }
0x1bce   :  { %2764 = vpow2.f32 %v2592_v43 }
0x1bd1   :  { %v1381_v27 = vpop.f32.mrf.mxu1 }
0x1bd2   :  { %v2763_v42 = vpop.eup %2762  ;;  %v1382_v28 = vadd.f32 %v3483_v26, %v1381_v27 }
0x1bd3   :  { %1235 = vrot.lane.b32.xlu1 %v2763_v42, %s3026_s19 }
0x1bd4   :  { %v2765_v44 = vpop.eup %2764 }
0x1bd5   :  { %v1216_v45 = vadd.f32 1.0, %v2765_v44 }
0x1bd7   :  { %2766 = vrcp.f32 %v1216_v45  ;;  %v1228_v51 = vand.u32 2147483648, %v1216_v45  ;;  %vm1222_vm10 = vweird.f32 %v1216_v45  ;;  %v1226_v15 = vand.u32 2147483647, %v1216_v45 }
0x1bd8   :  { %2768 = vtanh.f32 %v674_v57 }
0x1bd9   :  { %v1229_v56 = vor.u32 1.1754944e-38, %v1228_v51  ;;  %vm1227_vm12 = vcmp.eq.f32.partialorder %v1226_v15, 8.507059e+37 }
0x1bdd   :  { %v2767_v46 = vpop.eup %2766 }
0x1bde   :  { %v1218_v47 = vmul.f32 %v2767_v46, %v1216_v45  ;;  %vm1223_vm9 = vweird.f32 %v2767_v46  ;;  %v2769_v61 = vpop.eup %2768 }
0x1bdf   :  { %vm1224_vm11 = vmor %vm1222_vm10, %vm1223_vm9 }
0x1be0   :  { %v1219_v48 = vsub.f32 1.0, %v1218_v47 }
0x1be2   :  { %v1220_v49 = vmul.f32 %v2767_v46, %v1219_v48 }
0x1be4   :  { %v1221_v50 = vadd.f32 %v2767_v46, %v1220_v49 }
0x1be6   :  { %v1225_v52 = vsel %vm1224_vm11, %v2767_v46, %v1221_v50 }
0x1be7   :  { %v1230_v59 = vsel %vm1227_vm12, %v1229_v56, %v1225_v52 }
0x1be8   :  { %v1233_v62 = vmul.f32 %v1230_v59, %v3394_v39  ;;  %v3444_v39 = vld [vmem:[#allocation3 + $0x8] sm:$0xff] }
0x1be9   :  { %1419 = vmatpush.msra.mxu2 %v3444_v39  ;;  %1484 = vmatpush.msrb.mxu3 %v3444_v39 }
0x1bea   :  { %1614 = vmatpush.msrb.mxu0 %v3444_v39 }
0x1beb   :  { %1420 = vmatpush.msra.mxu2 %v3449_v22  ;;  %1485 = vmatpush.msrb.mxu3 %v3449_v22 }
0x1bec   :  { %1615 = vmatpush.msrb.mxu0 %v3449_v22 }
0x1bed   :  { %1872 = vmatpush.msra.mxu3 %v3438_v21 }
0x1bee   :  { %1742 = vmatpush.msra.mxu0 %v3438_v21 }
0x1bef   :  { %1873 = vmatpush.msra.mxu3 %v3440_v8 }
0x1bf0   :  { %1743 = vmatpush.msra.mxu0 %v3440_v8 }
0x1bf1   :  { %1874 = vmatpush.msra.mxu3 %v3444_v39 }
0x1bf2   :  { %1744 = vmatpush.msra.mxu0 %v3444_v39 }
0x1bf3   :  { %1875 = vmatpush.msra.mxu3 %v3449_v22 }
0x1bf4   :  { %1745 = vmatpush.msra.mxu0 %v3449_v22 }
0x1c45   :  { %v1236_v58 = vpop.permute.xlu1 %1235 }
0x1c46   :  { %v1238_v60 = vmul.f32 %v1236_v58, %v1230_v59 }
0x1c48   :  { %1240 = vrot.lane.b32.xlu2 %v1238_v60, %s3027_s21 }
0x1c50   :  { %697 = vrot.lane.b32.xlu2 %v2769_v61, %s3026_s19 }
0x1ca2   :  { %v1241_v63 = vpop.permute.xlu2 %1240 }
0x1ca3   :  { %v3429_v0 = vadd.f32 %v1241_v63, %v1233_v62 }
0x1ca5   :  { %2770 = vtanh.f32 %v3429_v0 }
0x1ca6   :  { %2772 = vpow2.f32 %v2571_v3 }
0x1caa   :  { %v698_v19 = vpop.permute.xlu2 %697 }
0x1cab   :  { %v2771_v40 = vpop.eup %2770 }
0x1cac   :  { %1246 = vrot.lane.b32.xlu0 %v2771_v40, %s3026_s19  ;;  %v2773_v1 = vpop.eup %2772  ;;  %v1384_v40 = vpop.f32.mrf.mxu1 }
0x1cad   :  { %v678_v2 = vadd.f32 1.0, %v2773_v1  ;;  %v1385_v3 = vadd.f32 %v3483_v26, %v1384_v40 }
0x1caf   :  { %2774 = vrcp.f32 %v678_v2  ;;  %v690_v4 = vand.u32 2147483648, %v678_v2  ;;  %vm684_vm14 = vweird.f32 %v678_v2  ;;  %v688_v5 = vand.u32 2147483647, %v678_v2 }
0x1cb1   :  { %v691_v6 = vor.u32 1.1754944e-38, %v690_v4  ;;  %vm689_vm1 = vcmp.eq.f32.partialorder %v688_v5, 8.507059e+37 }
0x1cb5   :  { %v2775_v10 = vpop.eup %2774 }
0x1cb6   :  { %v680_v11 = vmul.f32 %v2775_v10, %v678_v2  ;;  %vm685_vm13 = vweird.f32 %v2775_v10 }
0x1cb7   :  { %vm686_vm15 = vmor %vm684_vm14, %vm685_vm13 }
0x1cb8   :  { %v681_v12 = vsub.f32 1.0, %v680_v11 }
0x1cba   :  { %v682_v13 = vmul.f32 %v2775_v10, %v681_v12 }
0x1cbc   :  { %v683_v16 = vadd.f32 %v2775_v10, %v682_v13 }
0x1cbe   :  { %v687_v18 = vsel %vm686_vm15, %v2775_v10, %v683_v16 }
0x1cbf   :  { %v3434_v9 = vsel %vm689_vm1, %v691_v6, %v687_v18 }
0x1cc0   :  { %v700_v20 = vmul.f32 %v698_v19, %v3434_v9  ;;  %v695_v32 = vmul.f32 %v3434_v9, %v3333_v54 }
0x1d1e   :  { %v1247_v14 = vpop.permute.xlu0 %1246 }
0x1d1f   :  { %v1249_v17 = vmul.f32 %v1247_v14, %v1230_v59 }
0x1d21   :  { %1251 = vrot.lane.b32.xlu1 %v1249_v17, %s3027_s21 }
0x1d29   :  { %702 = vrot.lane.b32.xlu1 %v700_v20, %s3027_s21 }
0x1d93   :  { %v1252_v23 = vpop.permute.xlu1 %1251 }
0x1d94   :  { %1254 = vst.msk [vmem:[#allocation2 + $0x30] sm:$0xff] %vm195_vm5, %v1252_v23  ;;  %2593 = vmatmul.msk.f32.vlgmr.msrb.gmra.mxu2 %vm195_vm5, %v1252_v23 }
0x1d95   :  { %1547 = vmatpush.msrb.mxu2 %v3438_v21 }
0x1d97   :  { %1548 = vmatpush.msrb.mxu2 %v3440_v8 }
0x1d99   :  { %1549 = vmatpush.msrb.mxu2 %v3444_v39 }
0x1d9b   :  { %v1326_v24 = vld [vmem:[#allocation2 + $0x30] sm:$0xff]  ;;  %1550 = vmatpush.msrb.mxu2 %v3449_v22  ;;  %v703_v31 = vpop.permute.xlu1 %702 }
0x1d9c   :  { %2601 = vmatmul.msk.f32.gmra.mxu1 %vm195_vm5, %v1326_v24  ;;  %1421 = vmatmul.f32.vlgmr.msra.gmra.mxu2 %v3025_v7  ;;  %v705_v33 = vadd.f32 %v703_v31, %v695_v32 }
0x1d9d   :  { %1677 = vmatpush.msra.mxu2 %v3438_v21 }
0x1d9f   :  { %1678 = vmatpush.msra.mxu2 %v3440_v8 }
0x1da1   :  { %1679 = vmatpush.msra.mxu2 %v3444_v39 }
0x1da3   :  { %1680 = vmatpush.msra.mxu2 %v3449_v22 }
0x1e17   :  { %v3478_v25 = vpop.f32.mrf.mxu2 }
0x1e1f   :  { %v1422_v29 = vpop.f32.mrf.mxu2 }
0x1e20   :  { %v1425_v30 = vadd.f32 %v1422_v29, %v1382_v28 }
0x1e22   :  { %2776 = vtanh.f32 %v1425_v30  ;;  %v2603_v36 = vmul.f32 -1.442695, %v1425_v30 }
0x1e23   :  { %2778 = vtanh.f32 %v705_v33 }
0x1e24   :  { %2780 = vpow2.f32 %v2603_v36 }
0x1e28   :  { %v2777_v34 = vpop.eup %2776 }
0x1e29   :  { %1448 = vrot.lane.b32.xlu0 %v2777_v34, %s3026_s19  ;;  %v2779_v35 = vpop.eup %2778  ;;  %v1387_v34 = vpop.f32.mrf.mxu1 }
0x1e2a   :  { %v2781_v37 = vpop.eup %2780 }
0x1e2b   :  { %v1429_v38 = vadd.f32 1.0, %v2781_v37 }
0x1e2d   :  { %2782 = vrcp.f32 %v1429_v38  ;;  %v1441_v54 = vand.u32 2147483648, %v1429_v38  ;;  %vm1435_vm3 = vweird.f32 %v1429_v38  ;;  %v1439_v46 = vand.u32 2147483647, %v1429_v38 }
0x1e2f   :  { %v1442_v48 = vor.u32 1.1754944e-38, %v1441_v54  ;;  %vm1440_vm6 = vcmp.eq.f32.partialorder %v1439_v46, 8.507059e+37 }
0x1e31   :  { %708 = vrot.lane.b32.xlu0 %v2779_v35, %s3026_s19  ;;  %v1388_v35 = vadd.f32 %v3483_v26, %v1387_v34 }
0x1e33   :  { %v2783_v41 = vpop.eup %2782 }
0x1e34   :  { %v1431_v42 = vmul.f32 %v2783_v41, %v1429_v38  ;;  %vm1436_vm2 = vweird.f32 %v2783_v41 }
0x1e35   :  { %vm1437_vm4 = vmor %vm1435_vm3, %vm1436_vm2 }
0x1e36   :  { %v1432_v43 = vsub.f32 1.0, %v1431_v42 }
0x1e38   :  { %v1433_v44 = vmul.f32 %v2783_v41, %v1432_v43 }
0x1e3a   :  { %v1434_v45 = vadd.f32 %v2783_v41, %v1433_v44 }
0x1e3c   :  { %v1438_v47 = vsel %vm1437_vm4, %v2783_v41, %v1434_v45 }
0x1e3d   :  { %v1443_v50 = vsel %vm1440_vm6, %v1442_v48, %v1438_v47 }
0x1e3e   :  { %v1446_v53 = vmul.f32 0.0, %v1443_v50 }
0x1e9b   :  { %v1449_v49 = vpop.permute.xlu0 %1448 }
0x1e9c   :  { %v1451_v51 = vmul.f32 %v1449_v49, %v1443_v50 }
0x1e9e   :  { %1453 = vrot.lane.b32.xlu2 %v1451_v51, %s3027_s21 }
0x1ea3   :  { %v709_v15 = vpop.permute.xlu0 %708 }
0x1ea4   :  { %v711_v52 = vmul.f32 %v709_v15, %v3434_v9 }
0x1ea6   :  { %713 = vrot.lane.b32.xlu2 %v711_v52, %s3027_s21 }
0x1ef8   :  { %v1454_v55 = vpop.permute.xlu2 %1453 }
0x1ef9   :  { %v1456_v56 = vadd.f32 %v1454_v55, %v1446_v53 }
0x1efb   :  { %2784 = vtanh.f32 %v1456_v56 }
0x1f00   :  { %v714_v57 = vpop.permute.xlu2 %713 }
0x1f01   :  { %v2785_v58 = vpop.eup %2784  ;;  %716 = vst.msk [vmem:[#allocation2 + $0x38] sm:$0xff] %vm195_vm5, %v714_v57 }
0x1f02   :  { %1459 = vrot.lane.b32.xlu1 %v2785_v58, %s3026_s19  ;;  %v1390_v58 = vpop.f32.mrf.mxu1 }
0x1f08   :  { %v724_v59 = vld [vmem:[#allocation2 + $0x38] sm:$0xff] }
0x1f09   :  { %2579 = vmatmul.msk.f32.gmra.mxu3 %vm195_vm5, %v724_v59  ;;  %v1391_v59 = vadd.f32 %v3483_v26, %v1390_v58 }
0x1f74   :  { %v1460_v60 = vpop.permute.xlu1 %1459 }
0x1f75   :  { %v1462_v61 = vmul.f32 %v1460_v60, %v1443_v50 }
0x1f77   :  { %1464 = vrot.lane.b32.xlu0 %v1462_v61, %s3027_s21 }
0x1f8c   :  { %v3499_v63 = vpop.f32.mrf.mxu3 }
0x1fe9   :  { %v1465_v62 = vpop.permute.xlu0 %1464 }
0x1fea   :  { %1467 = vst.msk [vmem:[#allocation2] sm:$0xff] %vm195_vm5, %v1465_v62  ;;  %2604 = vmatmul.msk.f32.vlgmr.msrb.gmra.mxu3 %vm195_vm5, %v1465_v62 }
0x206d   :  { %v1487_v1 = vpop.f32.mrf.mxu3 }
0x206e   :  { %v1490_v2 = vadd.f32 %v1487_v1, %v1385_v3 }
0x2070   :  { %2786 = vtanh.f32 %v1490_v2  ;;  %v2605_v11 = vmul.f32 -1.442695, %v1490_v2 }
0x2072   :  { %2788 = vpow2.f32 %v2605_v11 }
0x2076   :  { %v2787_v10 = vpop.eup %2786 }
0x2077   :  { %1513 = vrot.lane.b32.xlu1 %v2787_v10, %s3026_s19 }
0x2078   :  { %v2789_v12 = vpop.eup %2788 }
0x2079   :  { %v1494_v13 = vadd.f32 1.0, %v2789_v12 }
0x207b   :  { %2790 = vrcp.f32 %v1494_v13  ;;  %v1506_v18 = vand.u32 2147483648, %v1494_v13  ;;  %vm1500_vm0 = vweird.f32 %v1494_v13  ;;  %v1504_v6 = vand.u32 2147483647, %v1494_v13 }
0x207d   :  { %v1507_v9 = vor.u32 1.1754944e-38, %v1506_v18  ;;  %vm1505_vm9 = vcmp.eq.f32.partialorder %v1504_v6, 8.507059e+37 }
0x2081   :  { %v2791_v14 = vpop.eup %2790 }
0x2082   :  { %v1496_v16 = vmul.f32 %v2791_v14, %v1494_v13  ;;  %vm1501_vm7 = vweird.f32 %v2791_v14 }
0x2083   :  { %vm1502_vm8 = vmor %vm1500_vm0, %vm1501_vm7 }
0x2084   :  { %v1497_v17 = vsub.f32 1.0, %v1496_v16 }
0x2086   :  { %v1498_v4 = vmul.f32 %v2791_v14, %v1497_v17 }
0x2088   :  { %v1499_v5 = vadd.f32 %v2791_v14, %v1498_v4 }
0x208a   :  { %v1503_v19 = vsel %vm1502_vm8, %v2791_v14, %v1499_v5 }
0x208b   :  { %v1508_v23 = vsel %vm1505_vm9, %v1507_v9, %v1503_v19 }
0x208c   :  { %v1511_v27 = vmul.f32 %v1508_v23, %v1456_v56 }
0x20e9   :  { %v1514_v20 = vpop.permute.xlu1 %1513 }
0x20ea   :  { %v1516_v24 = vmul.f32 %v1514_v20, %v1508_v23 }
0x20ec   :  { %1518 = vrot.lane.b32.xlu2 %v1516_v24, %s3027_s21 }
0x2146   :  { %v1519_v28 = vpop.permute.xlu2 %1518 }
0x2147   :  { %v1521_v29 = vadd.f32 %v1519_v28, %v1511_v27 }
0x2149   :  { %2792 = vtanh.f32 %v1521_v29 }
0x214f   :  { %v2793_v30 = vpop.eup %2792 }
0x2150   :  { %1524 = vrot.lane.b32.xlu0 %v2793_v30, %s3026_s19 }
0x21c2   :  { %v1525_v31 = vpop.permute.xlu0 %1524 }
0x21c3   :  { %v1527_v32 = vmul.f32 %v1525_v31, %v1508_v23 }
0x21c5   :  { %1529 = vrot.lane.b32.xlu1 %v1527_v32, %s3027_s21 }
0x2237   :  { %v1530_v33 = vpop.permute.xlu1 %1529 }
0x2238   :  { %1532 = vst.msk [vmem:[#allocation2 + $0x8] sm:$0xff] %vm195_vm5, %v1530_v33  ;;  %2606 = vmatmul.msk.f32.vlgmr.msrb.gmra.mxu2 %vm195_vm5, %v1530_v33 }
0x2239   :  { %1807 = vmatpush.msrb.mxu2 %v3438_v21 }
0x223b   :  { %1808 = vmatpush.msrb.mxu2 %v3440_v8 }
0x223d   :  { %1809 = vmatpush.msrb.mxu2 %v3444_v39 }
0x223f   :  { %1810 = vmatpush.msrb.mxu2 %v3449_v22  ;;  %v1924_v58 = vld [vmem:[#allocation2 + $0x8] sm:$0xff] }
0x22bb   :  { %v1552_v36 = vpop.f32.mrf.mxu2 }
0x22bc   :  { %v1555_v37 = vadd.f32 %v1552_v36, %v1388_v35 }
0x22be   :  { %2794 = vtanh.f32 %v1555_v37  ;;  %v2607_v41 = vmul.f32 -1.442695, %v1555_v37 }
0x22c0   :  { %2796 = vpow2.f32 %v2607_v41 }
0x22c4   :  { %v2795_v38 = vpop.eup %2794 }
0x22c5   :  { %1578 = vrot.lane.b32.xlu2 %v2795_v38, %s3026_s19 }
0x22c6   :  { %v2797_v42 = vpop.eup %2796 }
0x22c7   :  { %v1559_v43 = vadd.f32 1.0, %v2797_v42 }
0x22c9   :  { %2798 = vrcp.f32 %v1559_v43  ;;  %v1571_v22 = vand.u32 2147483648, %v1559_v43  ;;  %vm1565_vm11 = vweird.f32 %v1559_v43  ;;  %v1569_v54 = vand.u32 2147483647, %v1559_v43 }
0x22cb   :  { %v1572_v47 = vor.u32 1.1754944e-38, %v1571_v22  ;;  %vm1570_vm13 = vcmp.eq.f32.partialorder %v1569_v54, 8.507059e+37 }
0x22cf   :  { %v2799_v21 = vpop.eup %2798 }
0x22d0   :  { %v1561_v8 = vmul.f32 %v2799_v21, %v1559_v43  ;;  %vm1566_vm10 = vweird.f32 %v2799_v21 }
0x22d1   :  { %vm1567_vm12 = vmor %vm1565_vm11, %vm1566_vm10 }
0x22d2   :  { %v1562_v44 = vsub.f32 1.0, %v1561_v8 }
0x22d4   :  { %v1563_v39 = vmul.f32 %v2799_v21, %v1562_v44 }
0x22d6   :  { %v1564_v45 = vadd.f32 %v2799_v21, %v1563_v39 }
0x22d8   :  { %v1568_v46 = vsel %vm1567_vm12, %v2799_v21, %v1564_v45 }
0x22d9   :  { %v1573_v49 = vsel %vm1570_vm13, %v1572_v47, %v1568_v46 }
0x22da   :  { %v1576_v51 = vmul.f32 %v1573_v49, %v1521_v29  ;;  %v1393_v29 = vpop.f32.mrf.mxu1 }
0x22db   :  { %v1394_v30 = vadd.f32 %v3483_v26, %v1393_v29 }
0x231f   :  { %v1579_v48 = vpop.permute.xlu2 %1578 }
0x2320   :  { %v1581_v50 = vmul.f32 %v1579_v48, %v1573_v49 }
0x2322   :  { %1583 = vrot.lane.b32.xlu0 %v1581_v50, %s3027_s21 }
0x2394   :  { %v1584_v15 = vpop.permute.xlu0 %1583 }
0x2395   :  { %v1586_v52 = vadd.f32 %v1584_v15, %v1576_v51  ;;  %v1934_v15 = vld [vmem:[#allocation5 + $0x18] sm:$0xff] }
0x2397   :  { %2800 = vtanh.f32 %v1586_v52 }
0x239d   :  { %v2801_v53 = vpop.eup %2800 }
0x239e   :  { %1589 = vrot.lane.b32.xlu1 %v2801_v53, %s3026_s19  ;;  %v1932_v53 = vld [vmem:[#allocation5 + $0x8] sm:$0xff] }
0x2410   :  { %v1590_v55 = vpop.permute.xlu1 %1589 }
0x2411   :  { %v1592_v56 = vmul.f32 %v1590_v55, %v1573_v49  ;;  %v1931_v55 = vld [vmem:[#allocation5] sm:$0xff] }
0x2413   :  { %1594 = vrot.lane.b32.xlu2 %v1592_v56, %s3027_s21 }
0x246d   :  { %v1595_v57 = vpop.permute.xlu2 %1594 }
0x246e   :  { %1597 = vst.msk [vmem:[#allocation2 + $0x10] sm:$0xff] %vm195_vm5, %v1595_v57  ;;  %2608 = vmatmul.msk.f32.vlgmr.msrb.gmra.mxu0 %vm195_vm5, %v1595_v57  ;;  %v1923_v57 = vld [vmem:[#allocation2] sm:$0xff] }
0x246f   :  { %1979 = vmatpush.msrb.mxu0 %v1934_v15 }
0x24eb   :  { %v1617_v60 = vpop.f32.mrf.mxu0 }
0x24ec   :  { %v1620_v61 = vadd.f32 %v1617_v60, %v1391_v59  ;;  %v1925_v59 = vld [vmem:[#allocation2 + $0x10] sm:$0xff] }
0x24ee   :  { %2802 = vtanh.f32 %v1620_v61  ;;  %v2609_v40 = vmul.f32 -1.442695, %v1620_v61 }
0x24f0   :  { %2804 = vpow2.f32 %v2609_v40 }
0x24f4   :  { %v2803_v62 = vpop.eup %2802 }
0x24f5   :  { %1643 = vrot.lane.b32.xlu0 %v2803_v62, %s3026_s19  ;;  %v1396_v62 = vpop.f32.mrf.mxu1 }
0x24f6   :  { %v2805_v3 = vpop.eup %2804  ;;  %v1397_v40 = vadd.f32 %v3483_v26, %v1396_v62 }
0x24f7   :  { %v1624_v1 = vadd.f32 1.0, %v2805_v3 }
0x24f9   :  { %2806 = vrcp.f32 %v1624_v1  ;;  %v1636_v14 = vand.u32 2147483648, %v1624_v1  ;;  %vm1630_vm15 = vweird.f32 %v1624_v1  ;;  %v1634_v16 = vand.u32 2147483647, %v1624_v1 }
0x24fb   :  { %v1637_v4 = vor.u32 1.1754944e-38, %v1636_v14  ;;  %vm1635_vm2 = vcmp.eq.f32.partialorder %v1634_v16, 8.507059e+37 }
0x24ff   :  { %v2807_v2 = vpop.eup %2806 }
0x2500   :  { %v1626_v10 = vmul.f32 %v2807_v2, %v1624_v1  ;;  %vm1631_vm14 = vweird.f32 %v2807_v2 }
0x2501   :  { %vm1632_vm1 = vmor %vm1630_vm15, %vm1631_vm14 }
0x2502   :  { %v1627_v11 = vsub.f32 1.0, %v1626_v10 }
0x2504   :  { %v1628_v12 = vmul.f32 %v2807_v2, %v1627_v11 }
0x2506   :  { %v1629_v13 = vadd.f32 %v2807_v2, %v1628_v12 }
0x2508   :  { %v1633_v17 = vsel %vm1632_vm1, %v2807_v2, %v1629_v13 }
0x2509   :  { %v1638_v18 = vsel %vm1635_vm2, %v1637_v4, %v1633_v17 }
0x250a   :  { %v1641_v19 = vmul.f32 %v1638_v18, %v1586_v52  ;;  %v1933_v52 = vld [vmem:[#allocation5 + $0x10] sm:$0xff] }
0x250b   :  { %1980 = vmatpush.msrb.mxu0 %v1933_v52 }
0x250d   :  { %1981 = vmatpush.msrb.mxu0 %v1932_v53 }
0x250f   :  { %1982 = vmatpush.msrb.mxu0 %v1931_v55 }
0x2567   :  { %v1644_v5 = vpop.permute.xlu0 %1643 }
0x2568   :  { %v1646_v6 = vmul.f32 %v1644_v5, %v1638_v18 }
0x256a   :  { %1648 = vrot.lane.b32.xlu1 %v1646_v6, %s3027_s21 }
0x25dc   :  { %v1649_v9 = vpop.permute.xlu1 %1648 }
0x25dd   :  { %v1651_v20 = vadd.f32 %v1649_v9, %v1641_v19 }
0x25df   :  { %2808 = vtanh.f32 %v1651_v20 }
0x25e5   :  { %v2809_v23 = vpop.eup %2808 }
0x25e6   :  { %1654 = vrot.lane.b32.xlu2 %v2809_v23, %s3026_s19 }
0x2640   :  { %v1655_v24 = vpop.permute.xlu2 %1654 }
0x2641   :  { %v1657_v27 = vmul.f32 %v1655_v24, %v1638_v18 }
0x2643   :  { %1659 = vrot.lane.b32.xlu0 %v1657_v27, %s3027_s21 }
0x26b5   :  { %v1660_v28 = vpop.permute.xlu0 %1659 }
0x26b6   :  { %1662 = vst.msk [vmem:[#allocation2 + $0x18] sm:$0xff] %vm195_vm5, %v1660_v28  ;;  %2610 = vmatmul.msk.f32.vlgmr.msra.gmra.mxu2 %vm195_vm5, %v1660_v28 }
0x26bd   :  { %v1926_v60 = vld [vmem:[#allocation2 + $0x18] sm:$0xff] }
0x2739   :  { %v1682_v31 = vpop.f32.mrf.mxu2 }
0x273a   :  { %v1685_v32 = vadd.f32 %v1682_v31, %v1394_v30 }
0x273c   :  { %2810 = vtanh.f32 %v1685_v32  ;;  %v2611_v34 = vmul.f32 -1.442695, %v1685_v32  ;;  %v3546_v32 = vld [vmem:[#allocation7 + $0x18] sm:$0xff] }
0x273d   :  { %2020 = vmatpush.msra.mxu2 %v3546_v32  ;;  %2083 = vmatpush.msrb.mxu3 %v3546_v32 }
0x273e   :  { %2812 = vpow2.f32 %v2611_v34  ;;  %v3552_v34 = vld [vmem:[#allocation7 + $0x8] sm:$0xff] }
0x2742   :  { %v2811_v33 = vpop.eup %2810 }
0x2743   :  { %1708 = vrot.lane.b32.xlu1 %v2811_v33, %s3026_s19  ;;  %v3548_v33 = vld [vmem:[#allocation7 + $0x10] sm:$0xff] }
0x2744   :  { %v2813_v35 = vpop.eup %2812  ;;  %2021 = vmatpush.msra.mxu2 %v3548_v33  ;;  %2084 = vmatpush.msrb.mxu3 %v3548_v33 }
0x2745   :  { %v1689_v36 = vadd.f32 1.0, %v2813_v35  ;;  %v3556_v35 = vld [vmem:[#allocation7] sm:$0xff] }
0x2746   :  { %2022 = vmatpush.msra.mxu2 %v3552_v34  ;;  %2085 = vmatpush.msrb.mxu3 %v3552_v34 }
0x2747   :  { %2814 = vrcp.f32 %v1689_v36  ;;  %v1701_v21 = vand.u32 2147483648, %v1689_v36  ;;  %vm1695_vm4 = vweird.f32 %v1689_v36  ;;  %v1699_v8 = vand.u32 2147483647, %v1689_v36 }
0x2748   :  { %2023 = vmatpush.msra.mxu2 %v3556_v35  ;;  %2086 = vmatpush.msrb.mxu3 %v3556_v35 }
0x2749   :  { %v1702_v39 = vor.u32 1.1754944e-38, %v1701_v21  ;;  %vm1700_vm7 = vcmp.eq.f32.partialorder %v1699_v8, 8.507059e+37  ;;  %v3575_v21 = vld [vmem:[#allocation8] ss:$0 sm:$0xff] }
0x274d   :  { %v2815_v37 = vpop.eup %2814 }
0x274e   :  { %v1691_v38 = vmul.f32 %v2815_v37, %v1689_v36  ;;  %vm1696_vm3 = vweird.f32 %v2815_v37 }
0x274f   :  { %vm1697_vm6 = vmor %vm1695_vm4, %vm1696_vm3 }
0x2750   :  { %v1692_v41 = vsub.f32 1.0, %v1691_v38  ;;  %v1399_v38 = vpop.f32.mrf.mxu1 }
0x2752   :  { %v1693_v42 = vmul.f32 %v2815_v37, %v1692_v41  ;;  %v1400_v41 = vadd.f32 %v3483_v26, %v1399_v38 }
0x2754   :  { %v1694_v43 = vadd.f32 %v2815_v37, %v1693_v42 }
0x2756   :  { %v1698_v44 = vsel %vm1697_vm6, %v2815_v37, %v1694_v43 }
0x2757   :  { %v1703_v22 = vsel %vm1700_vm7, %v1702_v39, %v1698_v44 }
0x2758   :  { %v1706_v46 = vmul.f32 %v1703_v22, %v1651_v20 }
0x27b5   :  { %v1709_v45 = vpop.permute.xlu1 %1708 }
0x27b6   :  { %v1711_v54 = vmul.f32 %v1709_v45, %v1703_v22 }
0x27b8   :  { %1713 = vrot.lane.b32.xlu2 %v1711_v54, %s3027_s21 }
0x2812   :  { %v1714_v47 = vpop.permute.xlu2 %1713 }
0x2813   :  { %v1716_v48 = vadd.f32 %v1714_v47, %v1706_v46 }
0x2815   :  { %2816 = vtanh.f32 %v1716_v48 }
0x281b   :  { %v2817_v49 = vpop.eup %2816 }
0x281c   :  { %1719 = vrot.lane.b32.xlu0 %v2817_v49, %s3026_s19 }
0x288e   :  { %v1720_v50 = vpop.permute.xlu0 %1719 }
0x288f   :  { %v1722_v51 = vmul.f32 %v1720_v50, %v1703_v22 }
0x2891   :  { %1724 = vrot.lane.b32.xlu1 %v1722_v51, %s3027_s21 }
0x2903   :  { %v1725_v56 = vpop.permute.xlu1 %1724 }
0x2904   :  { %1727 = vst.msk [vmem:[#allocation2 + $0x20] sm:$0xff] %vm195_vm5, %v1725_v56  ;;  %2612 = vmatmul.msk.f32.vlgmr.msra.gmra.mxu0 %vm195_vm5, %v1725_v56 }
0x290b   :  { %v1927_v61 = vld [vmem:[#allocation2 + $0x20] sm:$0xff] }
0x290c   :  { %2618 = vmatmul.msk.f32.vlgmr.msrb.gmra.mxu0 %vm195_vm5, %v1923_v57 }
0x2914   :  { %2619 = vmatmul.msk.f32.gmra.mxu0 %vm195_vm5, %v1924_v58 }
0x291c   :  { %2620 = vmatmul.msk.f32.gmra.mxu0 %vm195_vm5, %v1925_v59 }
0x2924   :  { %2621 = vmatmul.msk.f32.gmra.mxu0 %vm195_vm5, %v1926_v60 }
0x292c   :  { %2622 = vmatmul.msk.f32.gmra.mxu0 %vm195_vm5, %v1927_v61 }
0x2981   :  { %v1747_v3 = vpop.f32.mrf.mxu0 }
0x2982   :  { %v1750_v1 = vadd.f32 %v1747_v3, %v1397_v40 }
0x2984   :  { %2818 = vtanh.f32 %v1750_v1  ;;  %v2613_v10 = vmul.f32 -1.442695, %v1750_v1 }
0x2986   :  { %2820 = vpow2.f32 %v2613_v10 }
0x2989   :  { %v1984_v8 = vpop.f32.mrf.mxu0 }
0x298a   :  { %v2819_v2 = vpop.eup %2818  ;;  %v1985_v44 = vadd.f32 %v3575_v21, %v1984_v8 }
0x298b   :  { %1773 = vrot.lane.b32.xlu2 %v2819_v2, %s3026_s19 }
0x298c   :  { %v2821_v11 = vpop.eup %2820 }
0x298d   :  { %v1754_v12 = vadd.f32 1.0, %v2821_v11 }
0x298f   :  { %2822 = vrcp.f32 %v1754_v12  ;;  %v1766_v5 = vand.u32 2147483648, %v1754_v12  ;;  %vm1760_vm8 = vweird.f32 %v1754_v12  ;;  %v1764_v18 = vand.u32 2147483647, %v1754_v12 }
0x2991   :  { %v1767_v19 = vor.u32 1.1754944e-38, %v1766_v5  ;;  %vm1765_vm10 = vcmp.eq.f32.partialorder %v1764_v18, 8.507059e+37  ;;  %v1987_v38 = vpop.f32.mrf.mxu0 }
0x2995   :  { %v2823_v13 = vpop.eup %2822 }
0x2996   :  { %v1756_v14 = vmul.f32 %v2823_v13, %v1754_v12  ;;  %vm1761_vm0 = vweird.f32 %v2823_v13 }
0x2997   :  { %vm1762_vm9 = vmor %vm1760_vm8, %vm1761_vm0 }
0x2998   :  { %v1757_v16 = vsub.f32 1.0, %v1756_v14 }
0x299a   :  { %v1758_v17 = vmul.f32 %v2823_v13, %v1757_v16 }
0x299c   :  { %v1759_v4 = vadd.f32 %v2823_v13, %v1758_v17 }
0x299e   :  { %v1763_v6 = vsel %vm1762_vm9, %v2823_v13, %v1759_v4 }
0x299f   :  { %v1768_v20 = vsel %vm1765_vm10, %v1767_v19, %v1763_v6 }
0x29a0   :  { %v1771_v24 = vmul.f32 %v1768_v20, %v1716_v48 }
0x29e5   :  { %v1774_v9 = vpop.permute.xlu2 %1773 }
0x29e6   :  { %v1776_v23 = vmul.f32 %v1774_v9, %v1768_v20 }
0x29e8   :  { %1778 = vrot.lane.b32.xlu0 %v1776_v23, %s3027_s21 }
0x2a5a   :  { %v1779_v27 = vpop.permute.xlu0 %1778 }
0x2a5b   :  { %v3541_v28 = vadd.f32 %v1779_v27, %v1771_v24 }
0x2a5d   :  { %2824 = vtanh.f32 %v3541_v28 }
0x2a63   :  { %v2825_v29 = vpop.eup %2824 }
0x2a64   :  { %1784 = vrot.lane.b32.xlu1 %v2825_v29, %s3026_s19 }
0x2ad6   :  { %v1785_v30 = vpop.permute.xlu1 %1784 }
0x2ad7   :  { %v1787_v31 = vmul.f32 %v1785_v30, %v1768_v20 }
0x2ad9   :  { %1789 = vrot.lane.b32.xlu2 %v1787_v31, %s3027_s21 }
0x2b33   :  { %v1790_v36 = vpop.permute.xlu2 %1789 }
0x2b34   :  { %1792 = vst.msk [vmem:[#allocation2 + $0x28] sm:$0xff] %vm195_vm5, %v1790_v36  ;;  %2614 = vmatmul.msk.f32.vlgmr.msrb.gmra.mxu2 %vm195_vm5, %v1790_v36 }
0x2b35   :  { %2146 = vmatpush.msrb.mxu2 %v3546_v32 }
0x2b37   :  { %2147 = vmatpush.msrb.mxu2 %v3548_v33 }
0x2b39   :  { %2148 = vmatpush.msrb.mxu2 %v3552_v34 }
0x2b3b   :  { %v1928_v37 = vld [vmem:[#allocation2 + $0x28] sm:$0xff]  ;;  %2149 = vmatpush.msrb.mxu2 %v3556_v35 }
0x2b3c   :  { %2623 = vmatmul.msk.f32.gmra.mxu0 %vm195_vm5, %v1928_v37  ;;  %2024 = vmatmul.f32.vlgmr.msra.gmra.mxu2 %v3025_v7 }
0x2b3d   :  { %2272 = vmatpush.msra.mxu2 %v3546_v32 }
0x2b3f   :  { %2273 = vmatpush.msra.mxu2 %v3548_v33 }
0x2b41   :  { %2274 = vmatpush.msra.mxu2 %v3552_v34 }
0x2b43   :  { %2275 = vmatpush.msra.mxu2 %v3556_v35 }
0x2bb7   :  { %v1812_v42 = vpop.f32.mrf.mxu2 }
0x2bb8   :  { %v1815_v43 = vadd.f32 %v1812_v42, %v1400_v41  ;;  %v1988_v41 = vadd.f32 %v3575_v21, %v1987_v38 }
0x2bba   :  { %2826 = vtanh.f32 %v1815_v43  ;;  %v2615_v54 = vmul.f32 -1.442695, %v1815_v43 }
0x2bbf   :  { %v2025_v7 = vpop.f32.mrf.mxu2 }
0x2bc0   :  { %v2827_v39 = vpop.eup %2826  ;;  %v2028_v45 = vadd.f32 %v2025_v7, %v1985_v44 }
0x2bc1   :  { %1838 = vrot.lane.b32.xlu0 %v2827_v39, %s3026_s19 }
0x2bc2   :  { %2828 = vtanh.f32 %v2028_v45  ;;  %v2626_v26 = vmul.f32 -1.442695, %v2028_v45 }
0x2bc3   :  { %2830 = vpow2.f32 %v2615_v54 }
0x2bc4   :  { %2832 = vpow2.f32 %v2626_v26 }
0x2bc8   :  { %v2829_v22 = vpop.eup %2828 }
0x2bc9   :  { %2051 = vrot.lane.b32.xlu1 %v2829_v22, %s3026_s19  ;;  %v2831_v46 = vpop.eup %2830 }
0x2bca   :  { %v1819_v47 = vadd.f32 1.0, %v2831_v46  ;;  %v2833_v48 = vpop.eup %2832 }
0x2bcb   :  { %v2032_v49 = vadd.f32 1.0, %v2833_v48 }
0x2bcc   :  { %2834 = vrcp.f32 %v1819_v47  ;;  %v1831_v58 = vand.u32 2147483648, %v1819_v47  ;;  %vm1825_vm12 = vweird.f32 %v1819_v47  ;;  %v1829_v59 = vand.u32 2147483647, %v1819_v47 }
0x2bcd   :  { %2836 = vrcp.f32 %v2032_v49  ;;  %v2044_v10 = vand.u32 2147483648, %v2032_v49  ;;  %vm2038_vm1 = vweird.f32 %v2032_v49  ;;  %v2042_v11 = vand.u32 2147483647, %v2032_v49 }
0x2bce   :  { %v1832_v62 = vor.u32 1.1754944e-38, %v1831_v58  ;;  %vm1830_vm14 = vcmp.eq.f32.partialorder %v1829_v59, 8.507059e+37 }
0x2bcf   :  { %v2045_v13 = vor.u32 1.1754944e-38, %v2044_v10  ;;  %vm2043_vm3 = vcmp.eq.f32.partialorder %v2042_v11, 8.507059e+37 }
0x2bd2   :  { %v2835_v50 = vpop.eup %2834 }
0x2bd3   :  { %v1821_v51 = vmul.f32 %v2835_v50, %v1819_v47  ;;  %v2837_v52 = vpop.eup %2836  ;;  %vm1826_vm11 = vweird.f32 %v2835_v50 }
0x2bd4   :  { %v2034_v55 = vmul.f32 %v2837_v52, %v2032_v49  ;;  %vm1827_vm13 = vmor %vm1825_vm12, %vm1826_vm11  ;;  %vm2039_vm15 = vweird.f32 %v2837_v52 }
0x2bd5   :  { %v1822_v15 = vsub.f32 1.0, %v1821_v51  ;;  %vm2040_vm2 = vmor %vm2038_vm1, %vm2039_vm15 }
0x2bd6   :  { %v2035_v57 = vsub.f32 1.0, %v2034_v55 }
0x2bd7   :  { %v1823_v53 = vmul.f32 %v2835_v50, %v1822_v15 }
0x2bd8   :  { %v2036_v61 = vmul.f32 %v2837_v52, %v2035_v57 }
0x2bd9   :  { %v1824_v56 = vadd.f32 %v2835_v50, %v1823_v53 }
0x2bda   :  { %v2037_v2 = vadd.f32 %v2837_v52, %v2036_v61  ;;  %v1990_v61 = vpop.f32.mrf.mxu0 }
0x2bdb   :  { %v1828_v60 = vsel %vm1827_vm13, %v2835_v50, %v1824_v56 }
0x2bdc   :  { %v1833_v3 = vsel %vm1830_vm14, %v1832_v62, %v1828_v60  ;;  %v2041_v12 = vsel %vm2040_vm2, %v2837_v52, %v2037_v2  ;;  %v1991_v62 = vadd.f32 %v3575_v21, %v1990_v61 }
0x2bdd   :  { %v2046_v16 = vsel %vm2043_vm3, %v2045_v13, %v2041_v12  ;;  %v1836_v4 = vmul.f32 %v1833_v3, %v3541_v28 }
0x2bde   :  { %v2049_v19 = vmul.f32 0.0, %v2046_v16 }
0x2be2   :  { %v1993_v38 = vpop.f32.mrf.mxu0 }
0x2c33   :  { %v1839_v40 = vpop.permute.xlu0 %1838 }
0x2c34   :  { %v1841_v1 = vmul.f32 %v1839_v40, %v1833_v3 }
0x2c36   :  { %1843 = vrot.lane.b32.xlu2 %v1841_v1, %s3027_s21 }
0x2c3b   :  { %v2052_v14 = vpop.permute.xlu1 %2051 }
0x2c3c   :  { %v2054_v17 = vmul.f32 %v2052_v14, %v2046_v16 }
0x2c3e   :  { %2056 = vrot.lane.b32.xlu0 %v2054_v17, %s3027_s21 }
0x2c90   :  { %v1844_v5 = vpop.permute.xlu2 %1843 }
0x2c91   :  { %v3583_v18 = vadd.f32 %v1844_v5, %v1836_v4 }
0x2c93   :  { %2838 = vtanh.f32 %v3583_v18 }
0x2c99   :  { %v2839_v6 = vpop.eup %2838 }
0x2c9a   :  { %1849 = vrot.lane.b32.xlu1 %v2839_v6, %s3026_s19 }
0x2cb0   :  { %v2057_v9 = vpop.permute.xlu0 %2056 }
0x2cb1   :  { %v2059_v20 = vadd.f32 %v2057_v9, %v2049_v19 }
0x2cb3   :  { %2840 = vtanh.f32 %v2059_v20 }
0x2cb9   :  { %v2841_v23 = vpop.eup %2840 }
0x2cba   :  { %2062 = vrot.lane.b32.xlu2 %v2841_v23, %s3026_s19 }
0x2d0c   :  { %v1850_v24 = vpop.permute.xlu1 %1849 }
0x2d0d   :  { %v1852_v27 = vmul.f32 %v1850_v24, %v1833_v3 }
0x2d0f   :  { %1854 = vrot.lane.b32.xlu0 %v1852_v27, %s3027_s21 }
0x2d14   :  { %v2063_v28 = vpop.permute.xlu2 %2062 }
0x2d15   :  { %v2065_v29 = vmul.f32 %v2063_v28, %v2046_v16 }
0x2d17   :  { %2067 = vrot.lane.b32.xlu1 %v2065_v29, %s3027_s21 }
0x2d81   :  { %v1855_v30 = vpop.permute.xlu0 %1854 }
0x2d82   :  { %1857 = vst.msk [vmem:[#allocation2 + $0x30] sm:$0xff] %vm195_vm5, %v1855_v30  ;;  %2616 = vmatmul.msk.f32.vlgmr.msra.gmra.mxu3 %vm195_vm5, %v1855_v30 }
0x2d83   :  { %2209 = vmatpush.msra.mxu3 %v3546_v32 }
0x2d85   :  { %2210 = vmatpush.msra.mxu3 %v3548_v33 }
0x2d87   :  { %2211 = vmatpush.msra.mxu3 %v3552_v34 }
0x2d89   :  { %v2068_v31 = vpop.permute.xlu1 %2067  ;;  %v1929_v36 = vld [vmem:[#allocation2 + $0x30] sm:$0xff]  ;;  %2212 = vmatpush.msra.mxu3 %v3556_v35 }
0x2d8a   :  { %2624 = vmatmul.msk.f32.gmra.mxu0 %vm195_vm5, %v1929_v36  ;;  %2627 = vmatmul.msk.f32.vlgmr.msrb.gmra.mxu3 %vm195_vm5, %v2068_v31 }
0x2d8b   :  { %2335 = vmatpush.msrb.mxu3 %v3546_v32 }
0x2d8d   :  { %2336 = vmatpush.msrb.mxu3 %v3548_v33 }
0x2d8f   :  { %2337 = vmatpush.msrb.mxu3 %v3552_v34 }
0x2d91   :  { %2338 = vmatpush.msrb.mxu3 %v3556_v35 }
0x2e05   :  { %v3602_v37 = vpop.f32.mrf.mxu3 }
0x2e0d   :  { %v2088_v42 = vpop.f32.mrf.mxu3 }
0x2e0e   :  { %v2091_v43 = vadd.f32 %v2088_v42, %v1988_v41  ;;  %v1994_v41 = vadd.f32 %v3575_v21, %v1993_v38 }
0x2e10   :  { %2842 = vtanh.f32 %v2091_v43  ;;  %v2628_v44 = vmul.f32 -1.442695, %v2091_v43 }
0x2e12   :  { %2844 = vpow2.f32 %v2628_v44 }
0x2e16   :  { %v2843_v8 = vpop.eup %2842 }
0x2e17   :  { %2114 = vrot.lane.b32.xlu2 %v2843_v8, %s3026_s19 }
0x2e18   :  { %v2845_v7 = vpop.eup %2844 }
0x2e19   :  { %v2095_v39 = vadd.f32 1.0, %v2845_v7 }
0x2e1b   :  { %2846 = vrcp.f32 %v2095_v39  ;;  %v2107_v47 = vand.u32 2147483648, %v2095_v39  ;;  %vm2101_vm6 = vweird.f32 %v2095_v39  ;;  %v2105_v48 = vand.u32 2147483647, %v2095_v39 }
0x2e1d   :  { %v2108_v50 = vor.u32 1.1754944e-38, %v2107_v47  ;;  %vm2106_vm0 = vcmp.eq.f32.partialorder %v2105_v48, 8.507059e+37 }
0x2e21   :  { %v2847_v45 = vpop.eup %2846 }
0x2e22   :  { %v2097_v22 = vmul.f32 %v2847_v45, %v2095_v39  ;;  %vm2102_vm4 = vweird.f32 %v2847_v45 }
0x2e23   :  { %vm2103_vm7 = vmor %vm2101_vm6, %vm2102_vm4 }
0x2e24   :  { %v2098_v54 = vsub.f32 1.0, %v2097_v22 }
0x2e26   :  { %v2099_v26 = vmul.f32 %v2847_v45, %v2098_v54 }
0x2e28   :  { %v2100_v46 = vadd.f32 %v2847_v45, %v2099_v26 }
0x2e2a   :  { %v2104_v49 = vsel %vm2103_vm7, %v2847_v45, %v2100_v46 }
0x2e2b   :  { %v2109_v15 = vsel %vm2106_vm0, %v2108_v50, %v2104_v49 }
0x2e2c   :  { %v2112_v53 = vmul.f32 %v2109_v15, %v2059_v20 }
0x2e71   :  { %v2115_v51 = vpop.permute.xlu2 %2114 }
0x2e72   :  { %v2117_v52 = vmul.f32 %v2115_v51, %v2109_v15 }
0x2e74   :  { %2119 = vrot.lane.b32.xlu0 %v2117_v52, %s3027_s21 }
0x2ee6   :  { %v2120_v55 = vpop.permute.xlu0 %2119 }
0x2ee7   :  { %v2122_v56 = vadd.f32 %v2120_v55, %v2112_v53 }
0x2ee9   :  { %2848 = vtanh.f32 %v2122_v56 }
0x2eef   :  { %v2849_v57 = vpop.eup %2848 }
0x2ef0   :  { %2125 = vrot.lane.b32.xlu1 %v2849_v57, %s3026_s19  ;;  %v1996_v57 = vpop.f32.mrf.mxu0 }
0x2f62   :  { %v2126_v58 = vpop.permute.xlu1 %2125 }
0x2f63   :  { %v2128_v59 = vmul.f32 %v2126_v58, %v2109_v15  ;;  %v1997_v58 = vadd.f32 %v3575_v21, %v1996_v57 }
0x2f65   :  { %2130 = vrot.lane.b32.xlu2 %v2128_v59, %s3027_s21 }
0x2fbf   :  { %v2131_v60 = vpop.permute.xlu2 %2130 }
0x2fc0   :  { %2629 = vmatmul.msk.f32.vlgmr.msrb.gmra.mxu2 %vm195_vm5, %v2131_v60 }
0x2fc1   :  { %2398 = vmatpush.msrb.mxu2 %v3546_v32 }
0x2fc3   :  { %2399 = vmatpush.msrb.mxu2 %v3548_v33 }
0x2fc5   :  { %2400 = vmatpush.msrb.mxu2 %v3552_v34 }
0x2fc7   :  { %2401 = vmatpush.msrb.mxu2 %v3556_v35 }
0x3043   :  { %v2151_v40 = vpop.f32.mrf.mxu2 }
0x3044   :  { %v2154_v3 = vadd.f32 %v2151_v40, %v1991_v62 }
0x3046   :  { %2850 = vtanh.f32 %v2154_v3  ;;  %v2630_v2 = vmul.f32 -1.442695, %v2154_v3 }
0x3048   :  { %2852 = vpow2.f32 %v2630_v2 }
0x304c   :  { %v2851_v1 = vpop.eup %2850 }
0x304d   :  { %2177 = vrot.lane.b32.xlu0 %v2851_v1, %s3026_s19 }
0x304e   :  { %v2853_v10 = vpop.eup %2852 }
0x304f   :  { %v2158_v11 = vadd.f32 1.0, %v2853_v10 }
0x3051   :  { %2854 = vrcp.f32 %v2158_v11  ;;  %v2170_v4 = vand.u32 2147483648, %v2158_v11  ;;  %vm2164_vm9 = vweird.f32 %v2158_v11  ;;  %v2168_v5 = vand.u32 2147483647, %v2158_v11 }
0x3053   :  { %v2171_v19 = vor.u32 1.1754944e-38, %v2170_v4  ;;  %vm2169_vm11 = vcmp.eq.f32.partialorder %v2168_v5, 8.507059e+37 }
0x3057   :  { %v2855_v12 = vpop.eup %2854 }
0x3058   :  { %v2160_v13 = vmul.f32 %v2855_v12, %v2158_v11  ;;  %vm2165_vm8 = vweird.f32 %v2855_v12 }
0x3059   :  { %vm2166_vm10 = vmor %vm2164_vm9, %vm2165_vm8 }
0x305a   :  { %v2161_v14 = vsub.f32 1.0, %v2160_v13 }
0x305c   :  { %v2162_v16 = vmul.f32 %v2855_v12, %v2161_v14 }
0x305e   :  { %v2163_v17 = vadd.f32 %v2855_v12, %v2162_v16  ;;  %v2915_v16 = vld [vmem:[%s3709_s6] ss:$0 sm:$0xff] }
0x3060   :  { %v2167_v6 = vsel %vm2166_vm10, %v2855_v12, %v2163_v17  ;;  %v800_v17 = vadd.f32 %v2915_v16, %v3499_v63 }
0x3061   :  { %v2172_v20 = vsel %vm2169_vm11, %v2171_v19, %v2167_v6 }
0x3062   :  { %v2175_v24 = vmul.f32 %v2172_v20, %v2122_v56  ;;  %v1277_v6 = vadd.f32 %v3478_v25, %v800_v17 }
0x30bf   :  { %v2178_v9 = vpop.permute.xlu0 %2177 }
0x30c0   :  { %v2180_v23 = vmul.f32 %v2178_v9, %v2172_v20 }
0x30c2   :  { %2182 = vrot.lane.b32.xlu1 %v2180_v23, %s3027_s21 }
0x3134   :  { %v2183_v27 = vpop.permute.xlu1 %2182 }
0x3135   :  { %v2185_v28 = vadd.f32 %v2183_v27, %v2175_v24 }
0x3137   :  { %2856 = vtanh.f32 %v2185_v28 }
0x313d   :  { %v2857_v29 = vpop.eup %2856 }
0x313e   :  { %2188 = vrot.lane.b32.xlu2 %v2857_v29, %s3026_s19  ;;  %v2594_v29 = vmul.f32 -1.442695, %v1277_v6 }
0x3198   :  { %v2189_v30 = vpop.permute.xlu2 %2188 }
0x3199   :  { %v2191_v31 = vmul.f32 %v2189_v30, %v2172_v20 }
0x319b   :  { %2193 = vrot.lane.b32.xlu0 %v2191_v31, %s3027_s21 }
0x320d   :  { %v2194_v36 = vpop.permute.xlu0 %2193 }
0x320e   :  { %2631 = vmatmul.msk.f32.vlgmr.msra.gmra.mxu3 %vm195_vm5, %v2194_v36 }
0x320f   :  { %2461 = vmatpush.msra.mxu3 %v3546_v32 }
0x3211   :  { %2462 = vmatpush.msra.mxu3 %v3548_v33 }
0x3213   :  { %2463 = vmatpush.msra.mxu3 %v3552_v34 }
0x3215   :  { %2464 = vmatpush.msra.mxu3 %v3556_v35 }
0x3291   :  { %v2214_v42 = vpop.f32.mrf.mxu3 }
0x3292   :  { %v2217_v43 = vadd.f32 %v2214_v42, %v1994_v41 }
0x3294   :  { %2858 = vtanh.f32 %v2217_v43  ;;  %v2632_v44 = vmul.f32 -1.442695, %v2217_v43 }
0x3296   :  { %2860 = vpow2.f32 %v2632_v44 }
0x329a   :  { %v2859_v8 = vpop.eup %2858 }
0x329b   :  { %2240 = vrot.lane.b32.xlu1 %v2859_v8, %s3026_s19 }
0x329c   :  { %v2861_v7 = vpop.eup %2860 }
0x329d   :  { %v2221_v39 = vadd.f32 1.0, %v2861_v7 }
0x329f   :  { %2862 = vrcp.f32 %v2221_v39  ;;  %v2233_v35 = vand.u32 2147483648, %v2221_v39  ;;  %vm2227_vm13 = vweird.f32 %v2221_v39  ;;  %v2231_v54 = vand.u32 2147483647, %v2221_v39 }
0x32a1   :  { %v2234_v46 = vor.u32 1.1754944e-38, %v2233_v35  ;;  %vm2232_vm15 = vcmp.eq.f32.partialorder %v2231_v54, 8.507059e+37  ;;  %v1999_v35 = vpop.f32.mrf.mxu0 }
0x32a2   :  { %v2000_v54 = vadd.f32 %v3575_v21, %v1999_v35 }
0x32a5   :  { %v2863_v32 = vpop.eup %2862 }
0x32a6   :  { %v2223_v33 = vmul.f32 %v2863_v32, %v2221_v39  ;;  %vm2228_vm12 = vweird.f32 %v2863_v32 }
0x32a7   :  { %vm2229_vm14 = vmor %vm2227_vm13, %vm2228_vm12 }
0x32a8   :  { %v2224_v45 = vsub.f32 1.0, %v2223_v33 }
0x32aa   :  { %v2225_v34 = vmul.f32 %v2863_v32, %v2224_v45 }
0x32ac   :  { %v2226_v22 = vadd.f32 %v2863_v32, %v2225_v34 }
0x32ae   :  { %v2230_v26 = vsel %vm2229_vm14, %v2863_v32, %v2226_v22 }
0x32af   :  { %v2235_v48 = vsel %vm2232_vm15, %v2234_v46, %v2230_v26 }
0x32b0   :  { %v2238_v50 = vmul.f32 %v2235_v48, %v2185_v28 }
0x330d   :  { %v2241_v47 = vpop.permute.xlu1 %2240 }
0x330e   :  { %v2243_v49 = vmul.f32 %v2241_v47, %v2235_v48 }
0x3310   :  { %2245 = vrot.lane.b32.xlu2 %v2243_v49, %s3027_s21 }
0x336a   :  { %v2246_v51 = vpop.permute.xlu2 %2245 }
0x336b   :  { %v2248_v15 = vadd.f32 %v2246_v51, %v2238_v50 }
0x336d   :  { %2864 = vtanh.f32 %v2248_v15 }
0x3373   :  { %v2865_v52 = vpop.eup %2864 }
0x3374   :  { %2251 = vrot.lane.b32.xlu0 %v2865_v52, %s3026_s19 }
0x33e6   :  { %v2252_v53 = vpop.permute.xlu0 %2251 }
0x33e7   :  { %v2254_v55 = vmul.f32 %v2252_v53, %v2235_v48 }
0x33e9   :  { %2256 = vrot.lane.b32.xlu1 %v2254_v55, %s3027_s21 }
0x345b   :  { %v2257_v56 = vpop.permute.xlu1 %2256 }
0x345c   :  { %2633 = vmatmul.msk.f32.vlgmr.msra.gmra.mxu2 %vm195_vm5, %v2257_v56 }
0x34df   :  { %v2277_v59 = vpop.f32.mrf.mxu2 }
0x34e0   :  { %v2280_v60 = vadd.f32 %v2277_v59, %v1997_v58 }
0x34e2   :  { %2866 = vtanh.f32 %v2280_v60  ;;  %v2634_v62 = vmul.f32 -1.442695, %v2280_v60 }
0x34e4   :  { %2868 = vpow2.f32 %v2634_v62 }
0x34e8   :  { %v2867_v61 = vpop.eup %2866 }
0x34e9   :  { %2303 = vrot.lane.b32.xlu2 %v2867_v61, %s3026_s19 }
0x34ea   :  { %v2869_v40 = vpop.eup %2868 }
0x34eb   :  { %v2284_v3 = vadd.f32 1.0, %v2869_v40 }
0x34ed   :  { %2870 = vrcp.f32 %v2284_v3  ;;  %v2296_v13 = vand.u32 2147483648, %v2284_v3  ;;  %vm2290_vm2 = vweird.f32 %v2284_v3  ;;  %v2294_v14 = vand.u32 2147483647, %v2284_v3 }
0x34ee   :  { %2872 = vtanh.f32 %v1277_v6 }
0x34ef   :  { %v2297_v5 = vor.u32 1.1754944e-38, %v2296_v13  ;;  %vm2295_vm4 = vcmp.eq.f32.partialorder %v2294_v14, 8.507059e+37 }
0x34f3   :  { %v2871_v1 = vpop.eup %2870 }
0x34f4   :  { %v2286_v2 = vmul.f32 %v2871_v1, %v2284_v3  ;;  %vm2291_vm1 = vweird.f32 %v2871_v1  ;;  %v2873_v23 = vpop.eup %2872 }
0x34f5   :  { %vm2292_vm3 = vmor %vm2290_vm2, %vm2291_vm1 }
0x34f6   :  { %v2287_v10 = vsub.f32 1.0, %v2286_v2 }
0x34f8   :  { %v2288_v11 = vmul.f32 %v2871_v1, %v2287_v10 }
0x34fa   :  { %v2289_v12 = vadd.f32 %v2871_v1, %v2288_v11 }
0x34fc   :  { %v2293_v4 = vsel %vm2292_vm3, %v2871_v1, %v2289_v12 }
0x34fd   :  { %v2298_v9 = vsel %vm2295_vm4, %v2297_v5, %v2293_v4 }
0x34fe   :  { %v2301_v24 = vmul.f32 %v2298_v9, %v2248_v15 }
0x3543   :  { %v2304_v19 = vpop.permute.xlu2 %2303 }
0x3544   :  { %v2306_v20 = vmul.f32 %v2304_v19, %v2298_v9  ;;  %v2916_v19 = vld [vmem:[%s3712_s9] ss:$0 sm:$0xff] }
0x3546   :  { %2308 = vrot.lane.b32.xlu0 %v2306_v20, %s3027_s21 }
0x354e   :  { %1300 = vrot.lane.b32.xlu0 %v2873_v23, %s3026_s19 }
0x35b8   :  { %v2309_v27 = vpop.permute.xlu0 %2308 }
0x35b9   :  { %v3639_v28 = vadd.f32 %v2309_v27, %v2301_v24 }
0x35bb   :  { %2874 = vtanh.f32 %v3639_v28 }
0x35bc   :  { %2876 = vpow2.f32 %v2594_v29 }
0x35c0   :  { %v1301_v33 = vpop.permute.xlu0 %1300 }
0x35c1   :  { %v2875_v63 = vpop.eup %2874 }
0x35c2   :  { %2314 = vrot.lane.b32.xlu1 %v2875_v63, %s3026_s19  ;;  %v2877_v25 = vpop.eup %2876 }
0x35c3   :  { %v1281_v30 = vadd.f32 1.0, %v2877_v25 }
0x35c5   :  { %2878 = vrcp.f32 %v1281_v30  ;;  %v1293_v44 = vand.u32 2147483648, %v1281_v30  ;;  %vm1287_vm7 = vweird.f32 %v1281_v30  ;;  %v1291_v7 = vand.u32 2147483647, %v1281_v30 }
0x35c7   :  { %v1294_v32 = vor.u32 1.1754944e-38, %v1293_v44  ;;  %vm1292_vm8 = vcmp.eq.f32.partialorder %v1291_v7, 8.507059e+37  ;;  %v2002_v7 = vpop.f32.mrf.mxu0 }
0x35cb   :  { %v2879_v31 = vpop.eup %2878 }
0x35cc   :  { %v1283_v36 = vmul.f32 %v2879_v31, %v1281_v30  ;;  %vm1288_vm6 = vweird.f32 %v2879_v31 }
0x35cd   :  { %vm1289_vm0 = vmor %vm1287_vm7, %vm1288_vm6 }
0x35ce   :  { %v1284_v38 = vsub.f32 1.0, %v1283_v36 }
0x35d0   :  { %v1285_v41 = vmul.f32 %v2879_v31, %v1284_v38 }
0x35d2   :  { %v1286_v43 = vadd.f32 %v2879_v31, %v1285_v41 }
0x35d4   :  { %v1290_v39 = vsel %vm1289_vm0, %v2879_v31, %v1286_v43 }
0x35d5   :  { %v1295_v45 = vsel %vm1292_vm8, %v1294_v32, %v1290_v39  ;;  %v2003_v39 = vadd.f32 %v3575_v21, %v2002_v7 }
0x35d6   :  { %v1303_v34 = vmul.f32 %v1301_v33, %v1295_v45  ;;  %v1298_v48 = vmul.f32 %v1295_v45, %v3429_v0 }
0x3634   :  { %v2315_v42 = vpop.permute.xlu1 %2314 }
0x3635   :  { %v2317_v8 = vmul.f32 %v2315_v42, %v2298_v9 }
0x3637   :  { %2319 = vrot.lane.b32.xlu2 %v2317_v8, %s3027_s21 }
0x363f   :  { %1305 = vrot.lane.b32.xlu2 %v1303_v34, %s3027_s21 }
0x3691   :  { %v2320_v22 = vpop.permute.xlu2 %2319 }
0x3692   :  { %2635 = vmatmul.msk.f32.vlgmr.msrb.gmra.mxu3 %vm195_vm5, %v2320_v22 }
0x3699   :  { %v1306_v47 = vpop.permute.xlu2 %1305 }
0x369a   :  { %v1308_v49 = vadd.f32 %v1306_v47, %v1298_v48 }
0x3715   :  { %v2340_v26 = vpop.f32.mrf.mxu3 }
0x3716   :  { %v2343_v46 = vadd.f32 %v2340_v26, %v2000_v54 }
0x3718   :  { %2880 = vtanh.f32 %v2343_v46  ;;  %v2636_v15 = vmul.f32 -1.442695, %v2343_v46 }
0x3719   :  { %2882 = vtanh.f32 %v1308_v49 }
0x371a   :  { %2884 = vpow2.f32 %v2636_v15 }
0x371e   :  { %v2881_v50 = vpop.eup %2880 }
0x371f   :  { %2366 = vrot.lane.b32.xlu1 %v2881_v50, %s3026_s19  ;;  %v2883_v51 = vpop.eup %2882 }
0x3720   :  { %v2885_v52 = vpop.eup %2884 }
0x3721   :  { %v2347_v53 = vadd.f32 1.0, %v2885_v52 }
0x3723   :  { %2886 = vrcp.f32 %v2347_v53  ;;  %v2359_v0 = vand.u32 2147483648, %v2347_v53  ;;  %vm2353_vm10 = vweird.f32 %v2347_v53  ;;  %v2357_v60 = vand.u32 2147483647, %v2347_v53 }
0x3725   :  { %v2360_v62 = vor.u32 1.1754944e-38, %v2359_v0  ;;  %vm2358_vm12 = vcmp.eq.f32.partialorder %v2357_v60, 8.507059e+37 }
0x3727   :  { %1311 = vrot.lane.b32.xlu1 %v2883_v51, %s3026_s19 }
0x3729   :  { %v2887_v55 = vpop.eup %2886 }
0x372a   :  { %v2349_v56 = vmul.f32 %v2887_v55, %v2347_v53  ;;  %vm2354_vm9 = vweird.f32 %v2887_v55 }
0x372b   :  { %vm2355_vm11 = vmor %vm2353_vm10, %vm2354_vm9  ;;  %vm2540_vm10 = vcmask 15360  }
0x372c   :  { %v2350_v57 = vsub.f32 1.0, %v2349_v56 }
0x372e   :  { %v2351_v58 = vmul.f32 %v2887_v55, %v2350_v57 }
0x3730   :  { %v2352_v59 = vadd.f32 %v2887_v55, %v2351_v58 }
0x3732   :  { %v2356_v61 = vsel %vm2355_vm11, %v2887_v55, %v2352_v59 }
0x3733   :  { %v2361_v3 = vsel %vm2358_vm12, %v2360_v62, %v2356_v61 }
0x3734   :  { %v2364_v11 = vmul.f32 %v2361_v3, %v3639_v28 }
0x3791   :  { %v2367_v40 = vpop.permute.xlu1 %2366 }
0x3792   :  { %v2369_v1 = vmul.f32 %v2367_v40, %v2361_v3 }
0x3794   :  { %2371 = vrot.lane.b32.xlu0 %v2369_v1, %s3027_s21 }
0x3799   :  { %v1312_v2 = vpop.permute.xlu1 %1311 }
0x379a   :  { %v1314_v10 = vmul.f32 %v1312_v2, %v1295_v45 }
0x379c   :  { %1316 = vrot.lane.b32.xlu0 %v1314_v10, %s3027_s21 }
0x3806   :  { %v2372_v12 = vpop.permute.xlu0 %2371 }
0x3807   :  { %v3653_v13 = vadd.f32 %v2372_v12, %v2364_v11 }
0x3809   :  { %2888 = vtanh.f32 %v3653_v13 }
0x380e   :  { %v1317_v14 = vpop.permute.xlu0 %1316 }
0x380f   :  { %v2889_v16 = vpop.eup %2888  ;;  %1319 = vst.msk [vmem:[#allocation2 + $0x38] sm:$0xff] %vm195_vm5, %v1317_v14 }
0x3810   :  { %2377 = vrot.lane.b32.xlu2 %v2889_v16, %s3026_s19 }
0x3816   :  { %v1327_v17 = vld [vmem:[#allocation2 + $0x38] sm:$0xff] }
0x3817   :  { %2602 = vmatmul.msk.f32.gmra.mxu1 %vm195_vm5, %v1327_v17 }
0x386a   :  { %v2378_v4 = vpop.permute.xlu2 %2377 }
0x386b   :  { %v2380_v5 = vmul.f32 %v2378_v4, %v2361_v3 }
0x386d   :  { %2382 = vrot.lane.b32.xlu1 %v2380_v5, %s3027_s21 }
0x3894   :  { %v1402_v6 = vpop.f32.mrf.mxu1 }
0x3895   :  { %v1403_v9 = vadd.f32 %v2916_v19, %v1402_v6 }
0x3897   :  { %v1880_v20 = vadd.f32 %v3602_v37, %v1403_v9 }
0x3899   :  { %2890 = vtanh.f32 %v1880_v20  ;;  %v2617_v24 = vmul.f32 -1.442695, %v1880_v20 }
0x389b   :  { %2892 = vpow2.f32 %v2617_v24 }
0x389f   :  { %v2891_v23 = vpop.eup %2890 }
0x38a0   :  { %1903 = vrot.lane.b32.xlu2 %v2891_v23, %s3026_s19 }
0x38a1   :  { %v2893_v27 = vpop.eup %2892 }
0x38a2   :  { %v1884_v28 = vadd.f32 1.0, %v2893_v27 }
0x38a4   :  { %2894 = vrcp.f32 %v1884_v28  ;;  %v1896_v38 = vand.u32 2147483648, %v1884_v28  ;;  %vm1890_vm14 = vweird.f32 %v1884_v28  ;;  %v1894_v37 = vand.u32 2147483647, %v1884_v28 }
0x38a6   :  { %v1897_v42 = vor.u32 1.1754944e-38, %v1896_v38  ;;  %vm1895_vm1 = vcmp.eq.f32.partialorder %v1894_v37, 8.507059e+37 }
0x38aa   :  { %v2895_v29 = vpop.eup %2894 }
0x38ab   :  { %v1886_v25 = vmul.f32 %v2895_v29, %v1884_v28  ;;  %vm1891_vm13 = vweird.f32 %v2895_v29 }
0x38ac   :  { %vm1892_vm15 = vmor %vm1890_vm14, %vm1891_vm13 }
0x38ad   :  { %v1887_v30 = vsub.f32 1.0, %v1886_v25 }
0x38af   :  { %v1888_v31 = vmul.f32 %v2895_v29, %v1887_v30 }
0x38b1   :  { %v1889_v36 = vadd.f32 %v2895_v29, %v1888_v31 }
0x38b3   :  { %v1893_v41 = vsel %vm1892_vm15, %v2895_v29, %v1889_v36 }
0x38b4   :  { %v1898_v43 = vsel %vm1895_vm1, %v1897_v42, %v1893_v41  ;;  %v2510_v41 = vld [vmem:[%s3716_s13 + $0x18] sm:$0xff]  ;;  %v2509_v42 = vld [vmem:[%s3716_s13 + $0x10] sm:$0xff] }
0x38b5   :  { %v1901_v34 = vmul.f32 %v1898_v43, %v3583_v18  ;;  %2532 = vmatpush.msra.mxu1 %v2510_v41 }
0x38b7   :  { %2533 = vmatpush.msra.mxu1 %v2509_v42 }
0x38df   :  { %v2383_v63 = vpop.permute.xlu1 %2382 }
0x38e0   :  { %2637 = vmatmul.msk.f32.vlgmr.msrb.gmra.mxu2 %vm195_vm5, %v2383_v63 }
0x38fa   :  { %v1904_v8 = vpop.permute.xlu2 %1903 }
0x38fb   :  { %v1906_v44 = vmul.f32 %v1904_v8, %v1898_v43  ;;  %v2507_v8 = vld [vmem:[%s3716_s13] sm:$0xff] }
0x38fd   :  { %1908 = vrot.lane.b32.xlu1 %v1906_v44, %s3027_s21 }
0x3963   :  { %v2403_v32 = vpop.f32.mrf.mxu2 }
0x3964   :  { %v2406_v33 = vadd.f32 %v2403_v32, %v2003_v39  ;;  %v2657_v32 = vld [vmem:[%s3717_s14] ss:$0 sm:$0xff] }
0x3966   :  { %2896 = vtanh.f32 %v2406_v33  ;;  %v2638_v26 = vmul.f32 -1.442695, %v2406_v33 }
0x396c   :  { %v2897_v45 = vpop.eup %2896 }
0x396d   :  { %2429 = vrot.lane.b32.xlu0 %v2897_v45, %s3026_s19 }
0x396f   :  { %v1909_v22 = vpop.permute.xlu1 %1908 }
0x3970   :  { %v1911_v35 = vadd.f32 %v1909_v22, %v1901_v34 }
0x3972   :  { %2898 = vtanh.f32 %v1911_v35 }
0x3973   :  { %2900 = vpow2.f32 %v2638_v26 }
0x3978   :  { %v2899_v54 = vpop.eup %2898 }
0x3979   :  { %1914 = vrot.lane.b32.xlu0 %v2899_v54, %s3026_s19  ;;  %v2901_v46 = vpop.eup %2900 }
0x397a   :  { %v2410_v47 = vadd.f32 1.0, %v2901_v46 }
0x397c   :  { %2902 = vrcp.f32 %v2410_v47  ;;  %v2422_v52 = vand.u32 2147483648, %v2410_v47  ;;  %vm2416_vm3 = vweird.f32 %v2410_v47  ;;  %v2420_v18 = vand.u32 2147483647, %v2410_v47 }
0x397e   :  { %v2423_v55 = vor.u32 1.1754944e-38, %v2422_v52  ;;  %vm2421_vm6 = vcmp.eq.f32.partialorder %v2420_v18, 8.507059e+37 }
0x3982   :  { %v2903_v48 = vpop.eup %2902 }
0x3983   :  { %v2412_v49 = vmul.f32 %v2903_v48, %v2410_v47  ;;  %vm2417_vm2 = vweird.f32 %v2903_v48 }
0x3984   :  { %vm2418_vm4 = vmor %vm2416_vm3, %vm2417_vm2 }
0x3985   :  { %v2413_v50 = vsub.f32 1.0, %v2412_v49 }
0x3987   :  { %v2414_v51 = vmul.f32 %v2903_v48, %v2413_v50 }
0x3989   :  { %v2415_v15 = vadd.f32 %v2903_v48, %v2414_v51 }
0x398b   :  { %v2419_v53 = vsel %vm2418_vm4, %v2903_v48, %v2415_v15 }
0x398c   :  { %v2424_v57 = vsel %vm2421_vm6, %v2423_v55, %v2419_v53 }
0x398d   :  { %v2427_v60 = vmul.f32 %v2424_v57, %v3653_v13 }
0x39df   :  { %v2430_v56 = vpop.permute.xlu0 %2429 }
0x39e0   :  { %v2432_v58 = vmul.f32 %v2430_v56, %v2424_v57 }
0x39e2   :  { %2434 = vrot.lane.b32.xlu2 %v2432_v58, %s3027_s21 }
0x39eb   :  { %v1915_v59 = vpop.permute.xlu0 %1914 }
0x39ec   :  { %v1917_v0 = vmul.f32 %v1915_v59, %v1898_v43  ;;  %v2508_v43 = vld [vmem:[%s3716_s13 + $0x8] sm:$0xff] }
0x39ed   :  { %2534 = vmatpush.msra.mxu1 %v2508_v43 }
0x39ee   :  { %1919 = vrot.lane.b32.xlu2 %v1917_v0, %s3027_s21 }
0x39ef   :  { %2535 = vmatpush.msra.mxu1 %v2507_v8 }
0x3a3c   :  { %v2435_v61 = vpop.permute.xlu2 %2434 }
0x3a3d   :  { %v2437_v62 = vadd.f32 %v2435_v61, %v2427_v60 }
0x3a3f   :  { %2904 = vtanh.f32 %v2437_v62 }
0x3a45   :  { %v2905_v40 = vpop.eup %2904 }
0x3a46   :  { %2440 = vrot.lane.b32.xlu1 %v2905_v40, %s3026_s19 }
0x3a48   :  { %v1920_v3 = vpop.permute.xlu2 %1919 }
0x3a49   :  { %1922 = vst.msk [vmem:[#allocation2 + $0x38] sm:$0xff] %vm195_vm5, %v1920_v3 }
0x3a50   :  { %v1930_v1 = vld [vmem:[#allocation2 + $0x38] sm:$0xff] }
0x3a51   :  { %2625 = vmatmul.msk.f32.gmra.mxu0 %vm195_vm5, %v1930_v1 }
0x3ab8   :  { %v2441_v2 = vpop.permute.xlu1 %2440 }
0x3ab9   :  { %v2443_v10 = vmul.f32 %v2441_v2, %v2424_v57 }
0x3abb   :  { %2445 = vrot.lane.b32.xlu0 %v2443_v10, %s3027_s21 }
0x3ace   :  { %v2005_v12 = vpop.f32.mrf.mxu0 }
0x3acf   :  { %v2006_v13 = vadd.f32 %v3575_v21, %v2005_v12 }
0x3b2d   :  { %v2446_v11 = vpop.permute.xlu0 %2445 }
0x3b2e   :  { %2639 = vmatmul.msk.f32.vlgmr.msra.gmra.mxu3 %vm195_vm5, %v2446_v11 }
0x3bb1   :  { %v2466_v14 = vpop.f32.mrf.mxu3 }
0x3bb2   :  { %v2469_v16 = vadd.f32 %v2466_v14, %v2006_v13 }
0x3bb4   :  { %2906 = vtanh.f32 %v2469_v16  ;;  %v2640_v4 = vmul.f32 -1.442695, %v2469_v16 }
0x3bb6   :  { %2908 = vpow2.f32 %v2640_v4 }
0x3bba   :  { %v2907_v17 = vpop.eup %2906 }
0x3bbb   :  { %2492 = vrot.lane.b32.xlu1 %v2907_v17, %s3026_s19 }
0x3bbc   :  { %v2909_v5 = vpop.eup %2908 }
0x3bbd   :  { %v2473_v6 = vadd.f32 1.0, %v2909_v5 }
0x3bbf   :  { %2910 = vrcp.f32 %v2473_v6  ;;  %v2485_v27 = vand.u32 2147483648, %v2473_v6  ;;  %vm2479_vm0 = vweird.f32 %v2473_v6  ;;  %v2483_v21 = vand.u32 2147483647, %v2473_v6 }
0x3bc1   :  { %v2486_v63 = vor.u32 1.1754944e-38, %v2485_v27  ;;  %vm2484_vm9 = vcmp.eq.f32.partialorder %v2483_v21, 8.507059e+37 }
0x3bc5   :  { %v2911_v19 = vpop.eup %2910 }
0x3bc6   :  { %v2475_v9 = vmul.f32 %v2911_v19, %v2473_v6  ;;  %vm2480_vm7 = vweird.f32 %v2911_v19 }
0x3bc7   :  { %vm2481_vm8 = vmor %vm2479_vm0, %vm2480_vm7 }
0x3bc8   :  { %v2476_v20 = vsub.f32 1.0, %v2475_v9 }
0x3bca   :  { %v2477_v23 = vmul.f32 %v2911_v19, %v2476_v20 }
0x3bcc   :  { %v2478_v24 = vadd.f32 %v2911_v19, %v2477_v23 }
0x3bce   :  { %v2482_v28 = vsel %vm2481_vm8, %v2911_v19, %v2478_v24 }
0x3bcf   :  { %v2487_v25 = vsel %vm2484_vm9, %v2486_v63, %v2482_v28 }
0x3bd0   :  { %v2490_v31 = vmul.f32 %v2487_v25, %v2437_v62 }
0x3c2d   :  { %v2493_v29 = vpop.permute.xlu1 %2492 }
0x3c2e   :  { %v2495_v30 = vmul.f32 %v2493_v29, %v2487_v25 }
0x3c30   :  { %2497 = vrot.lane.b32.xlu2 %v2495_v30, %s3027_s21 }
0x3c8a   :  { %v2498_v36 = vpop.permute.xlu2 %2497 }
0x3c8b   :  { %v2500_v38 = vadd.f32 %v2498_v36, %v2490_v31 }
0x3c8d   :  { %2912 = vtanh.f32 %v2500_v38 }
0x3c93   :  { %v2913_v37 = vpop.eup %2912 }
0x3c94   :  { %2503 = vrot.lane.b32.xlu0 %v2913_v37, %s3026_s19 }
0x3d06   :  { %v2504_v44 = vpop.permute.xlu0 %2503 }
0x3d07   :  { %v2506_v7 = vmul.f32 %v2504_v44, %v2487_v25 }
0x3d09   :  { %2516 = vrot.lane.b32.xlu1 %v2506_v7, %s3027_s21 }
0x3d7b   :  { %v2517_v39 = vpop.permute.xlu1 %2516 }
0x3d7c   :  { %2641 = vmatmul.msk.f32.vlgmr.msra.gmra.mxu1 %vm195_vm5, %v2517_v39 }
0x3df9   :  { %v2537_v33 = vpop.f32.mrf.mxu1 }
0x3dfa   :  { %v2538_v45 = vadd.f32 %v2657_v32, %v2537_v33 }
0x3dfc   :  { %2541 = vst.msk [vmem:[%s3718_s15] sm:$0xff] %vm2540_vm10, %v2538_v45 }
0x3dfd   :  { %2546 = vsyncpa [#allocation4], 1 }
0x3dfe   :  { %2547 = vsyncpa [#allocation6], 1 }
0x3dff   :  { %2548 = vsyncpa [#allocation9], 1 }

</bundles_post_ra>
